<compile_context>
chip_gen: v7x
topology: tpu7x:2x2x1
jax: 0.10.0
libtpu: 0.0.40
codegen_flags: <defaults>
</compile_context>

<pallas_src>
import functools

import jax
import jax.numpy as jnp
import numpy as np
from jax import lax
from jax.experimental import pallas as pl
from jax.experimental.pallas import tpu as pltpu


# -----------------------------------------------------------------------------
# Fused kernel factory
# -----------------------------------------------------------------------------
def _make_fused_kernel(T, Bp, Hp, num_layers):
    """Fused bidirectional multi-layer LSTM + attention + fc forward kernel.

    Kernel refs (in order):
      x_ref                      (T*Bp, D0)   flat time-major, batch padded to 8
      [w_in, w_hh, b] * L        (D_l, 4G), (2Hp, 4G), (1, 4G)   per layer
      wa_ref                     (1, 2Hp)     attention weight row (padded)
      wf_ref                     (2Hp, Cpad)  fc weight (zero padded)
      bf_ref                     (1, Cpad)
      out_ref                    (Bp, Cpad)
    """
    L = num_layers
    G = 2 * Hp          # per-gate width (fwd | bwd halves) = 128-lane aligned
    F = 2 * Hp          # bidirectional hidden width = 128-lane aligned
    R = T * Bp          # flat time-major row count (sublane-tile aligned)

    def kernel(*refs):
        x_ref = refs[0]
        layer_refs = refs[1:1 + 3 * L]
        wa_ref, wf_ref, bf_ref = refs[1 + 3 * L:4 + 3 * L]
        out_ref = refs[4 + 3 * L]

        # Hoisted lane masks (built once, exact operand shapes, reused by every
        # layer; never inside the recurrence loop).
        lane_g = lax.broadcasted_iota(jnp.int32, (R, 4 * G), 1)
        fwd_gate_mask = (lane_g % G) < Hp        # fwd-direction gate lanes
        lane_f = lax.broadcasted_iota(jnp.int32, (R, F), 1)
        fwd_half_mask = lane_f < Hp              # fwd half of [h_f | h_b]

        cur = x_ref[...]                         # (R, D_l) flat time-major

        for l in range(L):
            w_in = layer_refs[3 * l][...]        # (D_l, 4G) interleaved gates
            w_hh = layer_refs[3 * l + 1][...]    # (2Hp, 4G) block-diag per dir
            bias = layer_refs[3 * l + 2][...]    # (1, 4G)   b_ih + b_hh fused

            # Whole-sequence input projection: one MXU matmul, bias folded in.
            proj = jnp.dot(cur, w_in,
                           preferred_element_type=jnp.float32) + bias  # (R,4G)
            # Backward direction sees x[T-1-s]: one-time row-reversed copy of
            # proj plus ONE whole-buffer select, hoisted off the serial chain.
            proj_rev = jnp.concatenate(
                [proj[(T - 1 - s) * Bp:(T - s) * Bp, :] for s in range(T)],
                axis=0)
            gx_all = jnp.where(fwd_gate_mask, proj, proj_rev)           # (R,4G)

            h = jnp.zeros((Bp, F), jnp.float32)  # [h_fwd | h_bwd]
            c = jnp.zeros((Bp, F), jnp.float32)
            hs = []
            # T small & static -> fully unrolled; only h @ W_hh serializes.
            for s in range(T):
                gates = gx_all[s * Bp:(s + 1) * Bp, :] + jnp.dot(
                    h, w_hh, preferred_element_type=jnp.float32)        # (Bp,4G)
                i_g = jax.nn.sigmoid(gates[:, 0 * G:1 * G])
                f_g = jax.nn.sigmoid(gates[:, 1 * G:2 * G])
                g_g = jnp.tanh(gates[:, 2 * G:3 * G])
                o_g = jax.nn.sigmoid(gates[:, 3 * G:4 * G])
                c = f_g * c + i_g * g_g
                h = o_g * jnp.tanh(c)
                hs.append(h)                     # = [h_f(s) | h_b(T-1-s)]

            # Next-layer input built straight from vregs (no scratch round-trip):
            # out[t] = [h_f(t) | h_b(t)].
            h_fwd_major = jnp.concatenate(hs, axis=0)          # rows t -> hs[t]
            h_bwd_major = jnp.concatenate(hs[::-1], axis=0)    # rows t -> hs[T-1-t]
            cur = jnp.where(fwd_half_mask, h_fwd_major, h_bwd_major)   # (R, F)

        # ---- attention pooling over time + final linear ----
        # Score matvec as VPU multiply + lane reduce (keeps MXU free).
        wa_row = wa_ref[...]                                    # (1, F)
        sc = jnp.sum(cur * wa_row, axis=-1, keepdims=True)      # (R, 1)
        # Per-batch max / sum over time (small (Bp,1) tiles, off critical path).
        m = sc[0:Bp, :]
        for t in range(1, T):
            m = jnp.maximum(m, sc[t * Bp:(t + 1) * Bp, :])
        e = jnp.exp(sc - jnp.concatenate([m] * T, axis=0))      # one EUP op
        den = e[0:Bp, :]
        for t in range(1, T):
            den = den + e[t * Bp:(t + 1) * Bp, :]
        inv = pl.reciprocal(den, approx=True)                   # (Bp, 1)
        w_all = e * jnp.concatenate([inv] * T, axis=0)          # (R, 1)
        weighted = w_all * cur                                  # (R, F) one VPU op
        ctx = weighted[0:Bp, :]
        for t in range(1, T):
            ctx = ctx + weighted[t * Bp:(t + 1) * Bp, :]        # full-tile adds

        out_ref[...] = (jnp.dot(ctx, wf_ref[...],
                                preferred_element_type=jnp.float32)
                        + bf_ref[...])           # (Bp, Cpad) lane-dense store

    return kernel


# -----------------------------------------------------------------------------
# One-time parameter preparation (hoisted out of the forward call)
# -----------------------------------------------------------------------------
def prepare_fused_params(params, hidden_size, num_classes):
    """Convert PyTorch-layout weights into the fused / interleaved / padded
    kernel layout.  Hidden padded to Hp (multiple of 64) so G = 2*Hp is a
    multiple of 128 lanes; padded lanes get zero weights & biases so the
    padded hidden/cell states stay exactly zero."""
    H = hidden_size
    Hp = ((max(H, 64) + 63) // 64) * 64
    G = 2 * Hp
    F = 2 * Hp
    layers = []
    for li, layer_params in enumerate(params["lstm"]):
        ((w_ih_f, w_hh_f, b_ih_f, b_hh_f),
         (w_ih_b, w_hh_b, b_ih_b, b_hh_b)) = layer_params
        wihf = np.asarray(w_ih_f, np.float32).T     # (D, 4H) gate order i,f,g,o
        wihb = np.asarray(w_ih_b, np.float32).T
        whhf = np.asarray(w_hh_f, np.float32).T     # (H, 4H)
        whhb = np.asarray(w_hh_b, np.float32).T
        bsum_f = np.asarray(b_ih_f + b_hh_f, np.float32)
        bsum_b = np.asarray(b_ih_b + b_hh_b, np.float32)

        D_in = wihf.shape[0] if li == 0 else F
        w_in = np.zeros((D_in, 4 * G), np.float32)
        w_hh = np.zeros((F, 4 * G), np.float32)
        bias = np.zeros((1, 4 * G), np.float32)

        for g in range(4):
            fcols = slice(g * G, g * G + H)              # fwd real lanes
            bcols = slice(g * G + Hp, g * G + Hp + H)    # bwd real lanes
            gsrc = slice(g * H, (g + 1) * H)
            if li == 0:
                w_in[:, fcols] = wihf[:, gsrc]
                w_in[:, bcols] = wihb[:, gsrc]
            else:
                # previous layer hidden layout: fwd in lanes [0:H], bwd in [Hp:Hp+H]
                w_in[0:H, fcols] = wihf[0:H, gsrc]
                w_in[Hp:Hp + H, fcols] = wihf[H:2 * H, gsrc]
                w_in[0:H, bcols] = wihb[0:H, gsrc]
                w_in[Hp:Hp + H, bcols] = wihb[H:2 * H, gsrc]
            w_hh[0:H, fcols] = whhf[:, gsrc]
            w_hh[Hp:Hp + H, bcols] = whhb[:, gsrc]
            bias[0, fcols] = bsum_f[gsrc]
            bias[0, bcols] = bsum_b[gsrc]
        layers.append((jnp.asarray(w_in), jnp.asarray(w_hh), jnp.asarray(bias)))

    C = num_classes
    C_pad = ((C + 127) // 128) * 128
    wa = np.asarray(params["w_attn"], np.float32)        # (1, 2H)
    wa_row = np.zeros((1, F), np.float32)
    wa_row[0, 0:H] = wa[0, 0:H]
    wa_row[0, Hp:Hp + H] = wa[0, H:2 * H]
    wfc = np.asarray(params["w_fc"], np.float32)         # (C, 2H)
    wf_pad = np.zeros((F, C_pad), np.float32)
    wf_pad[0:H, :C] = wfc[:, 0:H].T
    wf_pad[Hp:Hp + H, :C] = wfc[:, H:2 * H].T
    bf_pad = np.zeros((1, C_pad), np.float32)
    bf_pad[0, :C] = np.asarray(params["b_fc"], np.float32)
    return {"layers": layers, "wa": jnp.asarray(wa_row),
            "wf": jnp.asarray(wf_pad), "bf": jnp.asarray(bf_pad)}


# -----------------------------------------------------------------------------
# Forward wrapper: one pallas_call for the whole model
# -----------------------------------------------------------------------------
def lstm_with_attention_forward(x, fused, *, num_classes):
    """x: (B, T, input_size) float32 -> (B, num_classes)."""
    B, T, D = x.shape
    F = fused["wa"].shape[1]        # 2 * Hp (static shape, jit-safe)
    Hp = F // 2
    L = len(fused["layers"])
    Bp = ((B + 7) // 8) * 8         # pad batch to a full sublane tile

    # TODO(synk): fold this relayout into a time-chunk BlockSpec index_map once
    #             a time grid axis exists (production T); negligible here.
    xp = jnp.zeros((Bp, T, D), jnp.float32).at[:B].set(x.astype(jnp.float32))
    x2d = jnp.transpose(xp, (1, 0, 2)).reshape(T * Bp, D)

    kernel = _make_fused_kernel(T, Bp, Hp, L)

    flat_inputs = [x2d]
    in_specs = [pl.BlockSpec(x2d.shape, lambda i: (0, 0))]
    for (w_in, w_hh, b) in fused["layers"]:
        for a in (w_in, w_hh, b):
            flat_inputs.append(a)
            in_specs.append(pl.BlockSpec(a.shape, lambda i: (0, 0)))
    for a in (fused["wa"], fused["wf"], fused["bf"]):
        flat_inputs.append(a)
        in_specs.append(pl.BlockSpec(a.shape, lambda i: (0, 0)))

    C_pad = fused["wf"].shape[1]
    out = pl.pallas_call(
        kernel,
        out_shape=jax.ShapeDtypeStruct((Bp, C_pad), jnp.float32),
        grid=(1,),
        in_specs=in_specs,
        out_specs=pl.BlockSpec((Bp, C_pad), lambda i: (0, 0)),
        compiler_params=pltpu.CompilerParams(
            dimension_semantics=("arbitrary",),
            vmem_limit_bytes=32 * 1024 * 1024),
    )(*flat_inputs)
    return out[:B, :num_classes]


# -----------------------------------------------------------------------------
# Pure-JAX reference (for verification)
# -----------------------------------------------------------------------------
def _lstm_seq_ref(x_tbd, w_ih, w_hh, b_ih, b_hh):
    T, B, _ = x_tbd.shape
    H = w_hh.shape[1]

    def step(carry, x_t):
        h, c = carry
        gates = x_t @ w_ih.T + h @ w_hh.T + b_ih + b_hh
        i, f, g, o = jnp.split(gates, 4, axis=-1)
        i = jax.nn.sigmoid(i)
        f = jax.nn.sigmoid(f)
        g = jnp.tanh(g)
        o = jax.nn.sigmoid(o)
        c = f * c + i * g
        h = o * jnp.tanh(c)
        return (h, c), h

    init = (jnp.zeros((B, H), jnp.float32), jnp.zeros((B, H), jnp.float32))
    _, ys = lax.scan(step, init, x_tbd)
    return ys


def reference_forward(x, params):
    h = jnp.transpose(x, (1, 0, 2)).astype(jnp.float32)
    for layer_params in params["lstm"]:
        dir_outputs = []
        for d, (w_ih, w_hh, b_ih, b_hh) in enumerate(layer_params):
            inp = h if d == 0 else h[::-1]
            y = _lstm_seq_ref(inp, w_ih, w_hh, b_ih, b_hh)
            if d == 1:
                y = y[::-1]
            dir_outputs.append(y)
        h = jnp.concatenate(dir_outputs, axis=-1)
    hl = jnp.transpose(h, (1, 0, 2))                       # (B, T, 2H)
    scores = hl @ params["w_attn"].T                       # (B, T, 1)
    w = jax.nn.softmax(scores, axis=1)
    context = jnp.sum(w * hl, axis=1)                      # (B, 2H)
    return context @ params["w_fc"].T + params["b_fc"]


# -----------------------------------------------------------------------------
# Deterministic parameter initialization (mirrors nn.LSTM / nn.Linear shapes)
# -----------------------------------------------------------------------------
def init_params(key, input_size, hidden_size, num_layers, num_classes,
                bidirectional=True):
    num_dirs = 2 if bidirectional else 1
    feat = hidden_size * num_dirs
    k = 1.0 / np.sqrt(hidden_size)
    params = {"lstm": []}
    for layer in range(num_layers):
        in_l = input_size if layer == 0 else feat
        layer_params = []
        for _ in range(num_dirs):
            key, k1, k2, k3, k4 = jax.random.split(key, 5)
            w_ih = jax.random.uniform(k1, (4 * hidden_size, in_l), jnp.float32, -k, k)
            w_hh = jax.random.uniform(k2, (4 * hidden_size, hidden_size), jnp.float32, -k, k)
            b_ih = jax.random.uniform(k3, (4 * hidden_size,), jnp.float32, -k, k)
            b_hh = jax.random.uniform(k4, (4 * hidden_size,), jnp.float32, -k, k)
            layer_params.append((w_ih, w_hh, b_ih, b_hh))
        params["lstm"].append(layer_params)
    key, ka, kf, kb = jax.random.split(key, 4)
    kf_scale = 1.0 / np.sqrt(feat)
    params["w_attn"] = jax.random.uniform(ka, (1, feat), jnp.float32, -kf_scale, kf_scale)
    params["w_fc"] = jax.random.uniform(kf, (num_classes, feat), jnp.float32, -kf_scale, kf_scale)
    params["b_fc"] = jax.random.uniform(kb, (num_classes,), jnp.float32, -kf_scale, kf_scale)
    return params


# -----------------------------------------------------------------------------
# Main
# -----------------------------------------------------------------------------
if __name__ == "__main__":
    B, T = 2, 8
    input_size, hidden_size, num_layers, num_classes = 16, 32, 2, 1

    key = jax.random.PRNGKey(0)
    key, kx = jax.random.split(key)
    x = jax.random.normal(kx, (B, T, input_size), jnp.float32)

    params = init_params(key, input_size, hidden_size, num_layers, num_classes,
                         bidirectional=True)
    fused = prepare_fused_params(params, hidden_size, num_classes)

    fwd = jax.jit(functools.partial(lstm_with_attention_forward,
                                    num_classes=num_classes))
    out = jax.block_until_ready(fwd(x, fused))

    ref = jax.block_until_ready(reference_forward(x, params))
    np.testing.assert_allclose(np.asarray(out), np.asarray(ref),
                               rtol=2e-3, atol=2e-3)

    assert out.shape == (B, num_classes)
    print("KERNEL_OK")
</pallas_src>

<mosaic_0001>
module attributes {stable_mosaic.version = 11 : i64} {
  func.func @kernel(%arg0: i32, %arg1: memref<64x16xf32, #tpu.memory_space<vmem>>, %arg2: memref<16x512xf32, #tpu.memory_space<vmem>>, %arg3: memref<128x512xf32, #tpu.memory_space<vmem>>, %arg4: memref<1x512xf32, #tpu.memory_space<vmem>>, %arg5: memref<128x512xf32, #tpu.memory_space<vmem>>, %arg6: memref<128x512xf32, #tpu.memory_space<vmem>>, %arg7: memref<1x512xf32, #tpu.memory_space<vmem>>, %arg8: memref<1x128xf32, #tpu.memory_space<vmem>>, %arg9: memref<128x128xf32, #tpu.memory_space<vmem>>, %arg10: memref<1x128xf32, #tpu.memory_space<vmem>>, %arg11: memref<8x128xf32, #tpu.memory_space<vmem>>) attributes {dimension_semantics = [#tpu.dimension_semantics<arbitrary>], iteration_bounds = array<i64: 1>, scalar_prefetch = 0 : i64, scratch_operands = 0 : i64, tpu.core_type = #tpu.core_type<tc>, window_params = [{pipeline_mode = #tpu.pipeline_mode<synchronous>, transform_indices = @transform_0, window_bounds = array<i64: 64, 16>}, {pipeline_mode = #tpu.pipeline_mode<synchronous>, transform_indices = @transform_1, window_bounds = array<i64: 16, 512>}, {pipeline_mode = #tpu.pipeline_mode<synchronous>, transform_indices = @transform_2, window_bounds = array<i64: 128, 512>}, {pipeline_mode = #tpu.pipeline_mode<synchronous>, transform_indices = @transform_3, window_bounds = array<i64: 1, 512>}, {pipeline_mode = #tpu.pipeline_mode<synchronous>, transform_indices = @transform_4, window_bounds = array<i64: 128, 512>}, {pipeline_mode = #tpu.pipeline_mode<synchronous>, transform_indices = @transform_5, window_bounds = array<i64: 128, 512>}, {pipeline_mode = #tpu.pipeline_mode<synchronous>, transform_indices = @transform_6, window_bounds = array<i64: 1, 512>}, {pipeline_mode = #tpu.pipeline_mode<synchronous>, transform_indices = @transform_7, window_bounds = array<i64: 1, 128>}, {pipeline_mode = #tpu.pipeline_mode<synchronous>, transform_indices = @transform_8, window_bounds = array<i64: 128, 128>}, {pipeline_mode = #tpu.pipeline_mode<synchronous>, transform_indices = @transform_9, window_bounds = array<i64: 1, 128>}, {pipeline_mode = #tpu.pipeline_mode<synchronous>, transform_indices = @transform_10, window_bounds = array<i64: 8, 128>}]} {
    %0 = tpu.iota {dimensions = array<i32: 1>} : vector<64x512xi32>
    %c128_i32 = arith.constant 128 : i32
    %c0_i32 = arith.constant 0 : i32
    %1 = arith.cmpi eq, %c128_i32, %c0_i32 : i32
    %c1_i32 = arith.constant 1 : i32
    %2 = arith.select %1, %c1_i32, %c128_i32 : i32
    %3 = vector.broadcast %2 : i32 to vector<64x512xi32>
    %4 = arith.remsi %0, %3 : vector<64x512xi32>
    %c0_i32_0 = arith.constant 0 : i32
    %5 = vector.broadcast %c0_i32_0 : i32 to vector<64x512xi32>
    %6 = arith.cmpi ne, %4, %5 : vector<64x512xi32>
    %c0_i32_1 = arith.constant 0 : i32
    %7 = vector.broadcast %c0_i32_1 : i32 to vector<64x512xi32>
    %8 = arith.cmpi slt, %4, %7 : vector<64x512xi32>
    %c0_i32_2 = arith.constant 0 : i32
    %9 = arith.cmpi slt, %2, %c0_i32_2 : i32
    %10 = vector.broadcast %9 : i1 to vector<64x512xi1>
    %11 = vector.broadcast %10 : vector<64x512xi1> to vector<64x512xi1>
    %12 = arith.xori %8, %11 : vector<64x512xi1>
    %13 = arith.andi %12, %6 : vector<64x512xi1>
    %14 = vector.broadcast %2 : i32 to vector<64x512xi32>
    %15 = arith.addi %4, %14 : vector<64x512xi32>
    %16 = arith.select %13, %15, %4 : vector<64x512xi1>, vector<64x512xi32>
    %c64_i32 = arith.constant 64 : i32
    %17 = vector.broadcast %c64_i32 : i32 to vector<64x512xi32>
    %18 = arith.cmpi slt, %16, %17 : vector<64x512xi32>
    %19 = tpu.iota {dimensions = array<i32: 1>} : vector<64x128xi32>
    %c64_i32_3 = arith.constant 64 : i32
    %20 = vector.broadcast %c64_i32_3 : i32 to vector<64x128xi32>
    %21 = arith.cmpi slt, %19, %20 : vector<64x128xi32>
    %c0 = arith.constant 0 : index
    %c0_4 = arith.constant 0 : index
    %22 = vector.load %arg1[%c0, %c0_4] : memref<64x16xf32, #tpu.memory_space<vmem>>, vector<64x16xf32>
    %c0_5 = arith.constant 0 : index
    %c0_6 = arith.constant 0 : index
    %23 = vector.load %arg2[%c0_5, %c0_6] : memref<16x512xf32, #tpu.memory_space<vmem>>, vector<16x512xf32>
    %c0_7 = arith.constant 0 : index
    %c0_8 = arith.constant 0 : index
    %24 = vector.load %arg3[%c0_7, %c0_8] : memref<128x512xf32, #tpu.memory_space<vmem>>, vector<128x512xf32>
    %c0_9 = arith.constant 0 : index
    %c0_10 = arith.constant 0 : index
    %25 = vector.load %arg4[%c0_9, %c0_10] : memref<1x512xf32, #tpu.memory_space<vmem>>, vector<1x512xf32>
    %cst = arith.constant dense<0.000000e+00> : vector<64x512xf32>
    %26 = tpu.matmul %22, %23, %cst {dimension_numbers = #tpu.dot_dimension_numbers<[1], [0], [0], [1], [0, 0, 1, 1], [], []>} : vector<64x16xf32>, vector<16x512xf32>, vector<64x512xf32> -> vector<64x512xf32>
    %27 = vector.broadcast %25 : vector<1x512xf32> to vector<64x512xf32>
    %28 = arith.addf %26, %27 : vector<64x512xf32>
    %29 = vector.extract_strided_slice %28 {offsets = [56, 0], sizes = [8, 512], strides = [1, 1]} : vector<64x512xf32> to vector<8x512xf32>
    %30 = vector.extract_strided_slice %28 {offsets = [48, 0], sizes = [8, 512], strides = [1, 1]} : vector<64x512xf32> to vector<8x512xf32>
    %31 = vector.extract_strided_slice %28 {offsets = [40, 0], sizes = [8, 512], strides = [1, 1]} : vector<64x512xf32> to vector<8x512xf32>
    %32 = vector.extract_strided_slice %28 {offsets = [32, 0], sizes = [8, 512], strides = [1, 1]} : vector<64x512xf32> to vector<8x512xf32>
    %33 = vector.extract_strided_slice %28 {offsets = [24, 0], sizes = [8, 512], strides = [1, 1]} : vector<64x512xf32> to vector<8x512xf32>
    %34 = vector.extract_strided_slice %28 {offsets = [16, 0], sizes = [8, 512], strides = [1, 1]} : vector<64x512xf32> to vector<8x512xf32>
    %35 = vector.extract_strided_slice %28 {offsets = [8, 0], sizes = [8, 512], strides = [1, 1]} : vector<64x512xf32> to vector<8x512xf32>
    %36 = vector.extract_strided_slice %28 {offsets = [0, 0], sizes = [8, 512], strides = [1, 1]} : vector<64x512xf32> to vector<8x512xf32>
    %37 = tpu.concatenate %29, %30, %31, %32, %33, %34, %35, %36 in 0 : vector<8x512xf32>, vector<8x512xf32>, vector<8x512xf32>, vector<8x512xf32>, vector<8x512xf32>, vector<8x512xf32>, vector<8x512xf32>, vector<8x512xf32> -> vector<64x512xf32>
    %38 = arith.select %18, %28, %37 : vector<64x512xi1>, vector<64x512xf32>
    %cst_11 = arith.constant 0.000000e+00 : f32
    %39 = vector.broadcast %cst_11 : f32 to vector<8x128xf32>
    %cst_12 = arith.constant 0.000000e+00 : f32
    %40 = vector.broadcast %cst_12 : f32 to vector<8x128xf32>
    %41 = vector.extract_strided_slice %38 {offsets = [0, 0], sizes = [8, 512], strides = [1, 1]} : vector<64x512xf32> to vector<8x512xf32>
    %cst_13 = arith.constant dense<0.000000e+00> : vector<8x512xf32>
    %42 = tpu.matmul %39, %24, %cst_13 {dimension_numbers = #tpu.dot_dimension_numbers<[1], [0], [0], [1], [0, 0, 1, 1], [], []>} : vector<8x128xf32>, vector<128x512xf32>, vector<8x512xf32> -> vector<8x512xf32>
    %43 = arith.addf %41, %42 : vector<8x512xf32>
    %44 = vector.extract_strided_slice %43 {offsets = [0, 0], sizes = [8, 128], strides = [1, 1]} : vector<8x512xf32> to vector<8x128xf32>
    %45 = arith.negf %44 : vector<8x128xf32>
    %46 = math.exp %45 : vector<8x128xf32>
    %cst_14 = arith.constant 1.000000e+00 : f32
    %47 = vector.broadcast %cst_14 : f32 to vector<8x128xf32>
    %48 = arith.addf %47, %46 : vector<8x128xf32>
    %49 = arith.divf %47, %48 : vector<8x128xf32>
    %50 = vector.extract_strided_slice %43 {offsets = [0, 128], sizes = [8, 128], strides = [1, 1]} : vector<8x512xf32> to vector<8x128xf32>
    %51 = arith.negf %50 : vector<8x128xf32>
    %52 = math.exp %51 : vector<8x128xf32>
    %cst_15 = arith.constant 1.000000e+00 : f32
    %53 = vector.broadcast %cst_15 : f32 to vector<8x128xf32>
    %54 = arith.addf %53, %52 : vector<8x128xf32>
    %55 = arith.divf %53, %54 : vector<8x128xf32>
    %56 = vector.extract_strided_slice %43 {offsets = [0, 256], sizes = [8, 128], strides = [1, 1]} : vector<8x512xf32> to vector<8x128xf32>
    %57 = math.tanh %56 : vector<8x128xf32>
    %58 = vector.extract_strided_slice %43 {offsets = [0, 384], sizes = [8, 128], strides = [1, 1]} : vector<8x512xf32> to vector<8x128xf32>
    %59 = arith.negf %58 : vector<8x128xf32>
    %60 = math.exp %59 : vector<8x128xf32>
    %cst_16 = arith.constant 1.000000e+00 : f32
    %61 = vector.broadcast %cst_16 : f32 to vector<8x128xf32>
    %62 = arith.addf %61, %60 : vector<8x128xf32>
    %63 = arith.divf %61, %62 : vector<8x128xf32>
    %64 = arith.mulf %55, %40 : vector<8x128xf32>
    %65 = arith.mulf %49, %57 : vector<8x128xf32>
    %66 = arith.addf %64, %65 : vector<8x128xf32>
    %67 = math.tanh %66 : vector<8x128xf32>
    %68 = arith.mulf %63, %67 : vector<8x128xf32>
    %69 = vector.extract_strided_slice %38 {offsets = [8, 0], sizes = [8, 512], strides = [1, 1]} : vector<64x512xf32> to vector<8x512xf32>
    %cst_17 = arith.constant dense<0.000000e+00> : vector<8x512xf32>
    %70 = tpu.matmul %68, %24, %cst_17 {dimension_numbers = #tpu.dot_dimension_numbers<[1], [0], [0], [1], [0, 0, 1, 1], [], []>} : vector<8x128xf32>, vector<128x512xf32>, vector<8x512xf32> -> vector<8x512xf32>
    %71 = arith.addf %69, %70 : vector<8x512xf32>
    %72 = vector.extract_strided_slice %71 {offsets = [0, 0], sizes = [8, 128], strides = [1, 1]} : vector<8x512xf32> to vector<8x128xf32>
    %73 = arith.negf %72 : vector<8x128xf32>
    %74 = math.exp %73 : vector<8x128xf32>
    %cst_18 = arith.constant 1.000000e+00 : f32
    %75 = vector.broadcast %cst_18 : f32 to vector<8x128xf32>
    %76 = arith.addf %75, %74 : vector<8x128xf32>
    %77 = arith.divf %75, %76 : vector<8x128xf32>
    %78 = vector.extract_strided_slice %71 {offsets = [0, 128], sizes = [8, 128], strides = [1, 1]} : vector<8x512xf32> to vector<8x128xf32>
    %79 = arith.negf %78 : vector<8x128xf32>
    %80 = math.exp %79 : vector<8x128xf32>
    %cst_19 = arith.constant 1.000000e+00 : f32
    %81 = vector.broadcast %cst_19 : f32 to vector<8x128xf32>
    %82 = arith.addf %81, %80 : vector<8x128xf32>
    %83 = arith.divf %81, %82 : vector<8x128xf32>
    %84 = vector.extract_strided_slice %71 {offsets = [0, 256], sizes = [8, 128], strides = [1, 1]} : vector<8x512xf32> to vector<8x128xf32>
    %85 = math.tanh %84 : vector<8x128xf32>
    %86 = vector.extract_strided_slice %71 {offsets = [0, 384], sizes = [8, 128], strides = [1, 1]} : vector<8x512xf32> to vector<8x128xf32>
    %87 = arith.negf %86 : vector<8x128xf32>
    %88 = math.exp %87 : vector<8x128xf32>
    %cst_20 = arith.constant 1.000000e+00 : f32
    %89 = vector.broadcast %cst_20 : f32 to vector<8x128xf32>
    %90 = arith.addf %89, %88 : vector<8x128xf32>
    %91 = arith.divf %89, %90 : vector<8x128xf32>
    %92 = arith.mulf %83, %66 : vector<8x128xf32>
    %93 = arith.mulf %77, %85 : vector<8x128xf32>
    %94 = arith.addf %92, %93 : vector<8x128xf32>
    %95 = math.tanh %94 : vector<8x128xf32>
    %96 = arith.mulf %91, %95 : vector<8x128xf32>
    %97 = vector.extract_strided_slice %38 {offsets = [16, 0], sizes = [8, 512], strides = [1, 1]} : vector<64x512xf32> to vector<8x512xf32>
    %cst_21 = arith.constant dense<0.000000e+00> : vector<8x512xf32>
    %98 = tpu.matmul %96, %24, %cst_21 {dimension_numbers = #tpu.dot_dimension_numbers<[1], [0], [0], [1], [0, 0, 1, 1], [], []>} : vector<8x128xf32>, vector<128x512xf32>, vector<8x512xf32> -> vector<8x512xf32>
    %99 = arith.addf %97, %98 : vector<8x512xf32>
    %100 = vector.extract_strided_slice %99 {offsets = [0, 0], sizes = [8, 128], strides = [1, 1]} : vector<8x512xf32> to vector<8x128xf32>
    %101 = arith.negf %100 : vector<8x128xf32>
    %102 = math.exp %101 : vector<8x128xf32>
    %cst_22 = arith.constant 1.000000e+00 : f32
    %103 = vector.broadcast %cst_22 : f32 to vector<8x128xf32>
    %104 = arith.addf %103, %102 : vector<8x128xf32>
    %105 = arith.divf %103, %104 : vector<8x128xf32>
    %106 = vector.extract_strided_slice %99 {offsets = [0, 128], sizes = [8, 128], strides = [1, 1]} : vector<8x512xf32> to vector<8x128xf32>
    %107 = arith.negf %106 : vector<8x128xf32>
    %108 = math.exp %107 : vector<8x128xf32>
    %cst_23 = arith.constant 1.000000e+00 : f32
    %109 = vector.broadcast %cst_23 : f32 to vector<8x128xf32>
    %110 = arith.addf %109, %108 : vector<8x128xf32>
    %111 = arith.divf %109, %110 : vector<8x128xf32>
    %112 = vector.extract_strided_slice %99 {offsets = [0, 256], sizes = [8, 128], strides = [1, 1]} : vector<8x512xf32> to vector<8x128xf32>
    %113 = math.tanh %112 : vector<8x128xf32>
    %114 = vector.extract_strided_slice %99 {offsets = [0, 384], sizes = [8, 128], strides = [1, 1]} : vector<8x512xf32> to vector<8x128xf32>
    %115 = arith.negf %114 : vector<8x128xf32>
    %116 = math.exp %115 : vector<8x128xf32>
    %cst_24 = arith.constant 1.000000e+00 : f32
    %117 = vector.broadcast %cst_24 : f32 to vector<8x128xf32>
    %118 = arith.addf %117, %116 : vector<8x128xf32>
    %119 = arith.divf %117, %118 : vector<8x128xf32>
    %120 = arith.mulf %111, %94 : vector<8x128xf32>
    %121 = arith.mulf %105, %113 : vector<8x128xf32>
    %122 = arith.addf %120, %121 : vector<8x128xf32>
    %123 = math.tanh %122 : vector<8x128xf32>
    %124 = arith.mulf %119, %123 : vector<8x128xf32>
    %125 = vector.extract_strided_slice %38 {offsets = [24, 0], sizes = [8, 512], strides = [1, 1]} : vector<64x512xf32> to vector<8x512xf32>
    %cst_25 = arith.constant dense<0.000000e+00> : vector<8x512xf32>
    %126 = tpu.matmul %124, %24, %cst_25 {dimension_numbers = #tpu.dot_dimension_numbers<[1], [0], [0], [1], [0, 0, 1, 1], [], []>} : vector<8x128xf32>, vector<128x512xf32>, vector<8x512xf32> -> vector<8x512xf32>
    %127 = arith.addf %125, %126 : vector<8x512xf32>
    %128 = vector.extract_strided_slice %127 {offsets = [0, 0], sizes = [8, 128], strides = [1, 1]} : vector<8x512xf32> to vector<8x128xf32>
    %129 = arith.negf %128 : vector<8x128xf32>
    %130 = math.exp %129 : vector<8x128xf32>
    %cst_26 = arith.constant 1.000000e+00 : f32
    %131 = vector.broadcast %cst_26 : f32 to vector<8x128xf32>
    %132 = arith.addf %131, %130 : vector<8x128xf32>
    %133 = arith.divf %131, %132 : vector<8x128xf32>
    %134 = vector.extract_strided_slice %127 {offsets = [0, 128], sizes = [8, 128], strides = [1, 1]} : vector<8x512xf32> to vector<8x128xf32>
    %135 = arith.negf %134 : vector<8x128xf32>
    %136 = math.exp %135 : vector<8x128xf32>
    %cst_27 = arith.constant 1.000000e+00 : f32
    %137 = vector.broadcast %cst_27 : f32 to vector<8x128xf32>
    %138 = arith.addf %137, %136 : vector<8x128xf32>
    %139 = arith.divf %137, %138 : vector<8x128xf32>
    %140 = vector.extract_strided_slice %127 {offsets = [0, 256], sizes = [8, 128], strides = [1, 1]} : vector<8x512xf32> to vector<8x128xf32>
    %141 = math.tanh %140 : vector<8x128xf32>
    %142 = vector.extract_strided_slice %127 {offsets = [0, 384], sizes = [8, 128], strides = [1, 1]} : vector<8x512xf32> to vector<8x128xf32>
    %143 = arith.negf %142 : vector<8x128xf32>
    %144 = math.exp %143 : vector<8x128xf32>
    %cst_28 = arith.constant 1.000000e+00 : f32
    %145 = vector.broadcast %cst_28 : f32 to vector<8x128xf32>
    %146 = arith.addf %145, %144 : vector<8x128xf32>
    %147 = arith.divf %145, %146 : vector<8x128xf32>
    %148 = arith.mulf %139, %122 : vector<8x128xf32>
    %149 = arith.mulf %133, %141 : vector<8x128xf32>
    %150 = arith.addf %148, %149 : vector<8x128xf32>
    %151 = math.tanh %150 : vector<8x128xf32>
    %152 = arith.mulf %147, %151 : vector<8x128xf32>
    %153 = vector.extract_strided_slice %38 {offsets = [32, 0], sizes = [8, 512], strides = [1, 1]} : vector<64x512xf32> to vector<8x512xf32>
    %cst_29 = arith.constant dense<0.000000e+00> : vector<8x512xf32>
    %154 = tpu.matmul %152, %24, %cst_29 {dimension_numbers = #tpu.dot_dimension_numbers<[1], [0], [0], [1], [0, 0, 1, 1], [], []>} : vector<8x128xf32>, vector<128x512xf32>, vector<8x512xf32> -> vector<8x512xf32>
    %155 = arith.addf %153, %154 : vector<8x512xf32>
    %156 = vector.extract_strided_slice %155 {offsets = [0, 0], sizes = [8, 128], strides = [1, 1]} : vector<8x512xf32> to vector<8x128xf32>
    %157 = arith.negf %156 : vector<8x128xf32>
    %158 = math.exp %157 : vector<8x128xf32>
    %cst_30 = arith.constant 1.000000e+00 : f32
    %159 = vector.broadcast %cst_30 : f32 to vector<8x128xf32>
    %160 = arith.addf %159, %158 : vector<8x128xf32>
    %161 = arith.divf %159, %160 : vector<8x128xf32>
    %162 = vector.extract_strided_slice %155 {offsets = [0, 128], sizes = [8, 128], strides = [1, 1]} : vector<8x512xf32> to vector<8x128xf32>
    %163 = arith.negf %162 : vector<8x128xf32>
    %164 = math.exp %163 : vector<8x128xf32>
    %cst_31 = arith.constant 1.000000e+00 : f32
    %165 = vector.broadcast %cst_31 : f32 to vector<8x128xf32>
    %166 = arith.addf %165, %164 : vector<8x128xf32>
    %167 = arith.divf %165, %166 : vector<8x128xf32>
    %168 = vector.extract_strided_slice %155 {offsets = [0, 256], sizes = [8, 128], strides = [1, 1]} : vector<8x512xf32> to vector<8x128xf32>
    %169 = math.tanh %168 : vector<8x128xf32>
    %170 = vector.extract_strided_slice %155 {offsets = [0, 384], sizes = [8, 128], strides = [1, 1]} : vector<8x512xf32> to vector<8x128xf32>
    %171 = arith.negf %170 : vector<8x128xf32>
    %172 = math.exp %171 : vector<8x128xf32>
    %cst_32 = arith.constant 1.000000e+00 : f32
    %173 = vector.broadcast %cst_32 : f32 to vector<8x128xf32>
    %174 = arith.addf %173, %172 : vector<8x128xf32>
    %175 = arith.divf %173, %174 : vector<8x128xf32>
    %176 = arith.mulf %167, %150 : vector<8x128xf32>
    %177 = arith.mulf %161, %169 : vector<8x128xf32>
    %178 = arith.addf %176, %177 : vector<8x128xf32>
    %179 = math.tanh %178 : vector<8x128xf32>
    %180 = arith.mulf %175, %179 : vector<8x128xf32>
    %181 = vector.extract_strided_slice %38 {offsets = [40, 0], sizes = [8, 512], strides = [1, 1]} : vector<64x512xf32> to vector<8x512xf32>
    %cst_33 = arith.constant dense<0.000000e+00> : vector<8x512xf32>
    %182 = tpu.matmul %180, %24, %cst_33 {dimension_numbers = #tpu.dot_dimension_numbers<[1], [0], [0], [1], [0, 0, 1, 1], [], []>} : vector<8x128xf32>, vector<128x512xf32>, vector<8x512xf32> -> vector<8x512xf32>
    %183 = arith.addf %181, %182 : vector<8x512xf32>
    %184 = vector.extract_strided_slice %183 {offsets = [0, 0], sizes = [8, 128], strides = [1, 1]} : vector<8x512xf32> to vector<8x128xf32>
    %185 = arith.negf %184 : vector<8x128xf32>
    %186 = math.exp %185 : vector<8x128xf32>
    %cst_34 = arith.constant 1.000000e+00 : f32
    %187 = vector.broadcast %cst_34 : f32 to vector<8x128xf32>
    %188 = arith.addf %187, %186 : vector<8x128xf32>
    %189 = arith.divf %187, %188 : vector<8x128xf32>
    %190 = vector.extract_strided_slice %183 {offsets = [0, 128], sizes = [8, 128], strides = [1, 1]} : vector<8x512xf32> to vector<8x128xf32>
    %191 = arith.negf %190 : vector<8x128xf32>
    %192 = math.exp %191 : vector<8x128xf32>
    %cst_35 = arith.constant 1.000000e+00 : f32
    %193 = vector.broadcast %cst_35 : f32 to vector<8x128xf32>
    %194 = arith.addf %193, %192 : vector<8x128xf32>
    %195 = arith.divf %193, %194 : vector<8x128xf32>
    %196 = vector.extract_strided_slice %183 {offsets = [0, 256], sizes = [8, 128], strides = [1, 1]} : vector<8x512xf32> to vector<8x128xf32>
    %197 = math.tanh %196 : vector<8x128xf32>
    %198 = vector.extract_strided_slice %183 {offsets = [0, 384], sizes = [8, 128], strides = [1, 1]} : vector<8x512xf32> to vector<8x128xf32>
    %199 = arith.negf %198 : vector<8x128xf32>
    %200 = math.exp %199 : vector<8x128xf32>
    %cst_36 = arith.constant 1.000000e+00 : f32
    %201 = vector.broadcast %cst_36 : f32 to vector<8x128xf32>
    %202 = arith.addf %201, %200 : vector<8x128xf32>
    %203 = arith.divf %201, %202 : vector<8x128xf32>
    %204 = arith.mulf %195, %178 : vector<8x128xf32>
    %205 = arith.mulf %189, %197 : vector<8x128xf32>
    %206 = arith.addf %204, %205 : vector<8x128xf32>
    %207 = math.tanh %206 : vector<8x128xf32>
    %208 = arith.mulf %203, %207 : vector<8x128xf32>
    %209 = vector.extract_strided_slice %38 {offsets = [48, 0], sizes = [8, 512], strides = [1, 1]} : vector<64x512xf32> to vector<8x512xf32>
    %cst_37 = arith.constant dense<0.000000e+00> : vector<8x512xf32>
    %210 = tpu.matmul %208, %24, %cst_37 {dimension_numbers = #tpu.dot_dimension_numbers<[1], [0], [0], [1], [0, 0, 1, 1], [], []>} : vector<8x128xf32>, vector<128x512xf32>, vector<8x512xf32> -> vector<8x512xf32>
    %211 = arith.addf %209, %210 : vector<8x512xf32>
    %212 = vector.extract_strided_slice %211 {offsets = [0, 0], sizes = [8, 128], strides = [1, 1]} : vector<8x512xf32> to vector<8x128xf32>
    %213 = arith.negf %212 : vector<8x128xf32>
    %214 = math.exp %213 : vector<8x128xf32>
    %cst_38 = arith.constant 1.000000e+00 : f32
    %215 = vector.broadcast %cst_38 : f32 to vector<8x128xf32>
    %216 = arith.addf %215, %214 : vector<8x128xf32>
    %217 = arith.divf %215, %216 : vector<8x128xf32>
    %218 = vector.extract_strided_slice %211 {offsets = [0, 128], sizes = [8, 128], strides = [1, 1]} : vector<8x512xf32> to vector<8x128xf32>
    %219 = arith.negf %218 : vector<8x128xf32>
    %220 = math.exp %219 : vector<8x128xf32>
    %cst_39 = arith.constant 1.000000e+00 : f32
    %221 = vector.broadcast %cst_39 : f32 to vector<8x128xf32>
    %222 = arith.addf %221, %220 : vector<8x128xf32>
    %223 = arith.divf %221, %222 : vector<8x128xf32>
    %224 = vector.extract_strided_slice %211 {offsets = [0, 256], sizes = [8, 128], strides = [1, 1]} : vector<8x512xf32> to vector<8x128xf32>
    %225 = math.tanh %224 : vector<8x128xf32>
    %226 = vector.extract_strided_slice %211 {offsets = [0, 384], sizes = [8, 128], strides = [1, 1]} : vector<8x512xf32> to vector<8x128xf32>
    %227 = arith.negf %226 : vector<8x128xf32>
    %228 = math.exp %227 : vector<8x128xf32>
    %cst_40 = arith.constant 1.000000e+00 : f32
    %229 = vector.broadcast %cst_40 : f32 to vector<8x128xf32>
    %230 = arith.addf %229, %228 : vector<8x128xf32>
    %231 = arith.divf %229, %230 : vector<8x128xf32>
    %232 = arith.mulf %223, %206 : vector<8x128xf32>
    %233 = arith.mulf %217, %225 : vector<8x128xf32>
    %234 = arith.addf %232, %233 : vector<8x128xf32>
    %235 = math.tanh %234 : vector<8x128xf32>
    %236 = arith.mulf %231, %235 : vector<8x128xf32>
    %237 = vector.extract_strided_slice %38 {offsets = [56, 0], sizes = [8, 512], strides = [1, 1]} : vector<64x512xf32> to vector<8x512xf32>
    %cst_41 = arith.constant dense<0.000000e+00> : vector<8x512xf32>
    %238 = tpu.matmul %236, %24, %cst_41 {dimension_numbers = #tpu.dot_dimension_numbers<[1], [0], [0], [1], [0, 0, 1, 1], [], []>} : vector<8x128xf32>, vector<128x512xf32>, vector<8x512xf32> -> vector<8x512xf32>
    %239 = arith.addf %237, %238 : vector<8x512xf32>
    %240 = vector.extract_strided_slice %239 {offsets = [0, 0], sizes = [8, 128], strides = [1, 1]} : vector<8x512xf32> to vector<8x128xf32>
    %241 = arith.negf %240 : vector<8x128xf32>
    %242 = math.exp %241 : vector<8x128xf32>
    %cst_42 = arith.constant 1.000000e+00 : f32
    %243 = vector.broadcast %cst_42 : f32 to vector<8x128xf32>
    %244 = arith.addf %243, %242 : vector<8x128xf32>
    %245 = arith.divf %243, %244 : vector<8x128xf32>
    %246 = vector.extract_strided_slice %239 {offsets = [0, 128], sizes = [8, 128], strides = [1, 1]} : vector<8x512xf32> to vector<8x128xf32>
    %247 = arith.negf %246 : vector<8x128xf32>
    %248 = math.exp %247 : vector<8x128xf32>
    %cst_43 = arith.constant 1.000000e+00 : f32
    %249 = vector.broadcast %cst_43 : f32 to vector<8x128xf32>
    %250 = arith.addf %249, %248 : vector<8x128xf32>
    %251 = arith.divf %249, %250 : vector<8x128xf32>
    %252 = vector.extract_strided_slice %239 {offsets = [0, 256], sizes = [8, 128], strides = [1, 1]} : vector<8x512xf32> to vector<8x128xf32>
    %253 = math.tanh %252 : vector<8x128xf32>
    %254 = vector.extract_strided_slice %239 {offsets = [0, 384], sizes = [8, 128], strides = [1, 1]} : vector<8x512xf32> to vector<8x128xf32>
    %255 = arith.negf %254 : vector<8x128xf32>
    %256 = math.exp %255 : vector<8x128xf32>
    %cst_44 = arith.constant 1.000000e+00 : f32
    %257 = vector.broadcast %cst_44 : f32 to vector<8x128xf32>
    %258 = arith.addf %257, %256 : vector<8x128xf32>
    %259 = arith.divf %257, %258 : vector<8x128xf32>
    %260 = arith.mulf %251, %234 : vector<8x128xf32>
    %261 = arith.mulf %245, %253 : vector<8x128xf32>
    %262 = arith.addf %260, %261 : vector<8x128xf32>
    %263 = math.tanh %262 : vector<8x128xf32>
    %264 = arith.mulf %259, %263 : vector<8x128xf32>
    %265 = tpu.concatenate %68, %96, %124, %152, %180, %208, %236, %264 in 0 : vector<8x128xf32>, vector<8x128xf32>, vector<8x128xf32>, vector<8x128xf32>, vector<8x128xf32>, vector<8x128xf32>, vector<8x128xf32>, vector<8x128xf32> -> vector<64x128xf32>
    %266 = tpu.concatenate %264, %236, %208, %180, %152, %124, %96, %68 in 0 : vector<8x128xf32>, vector<8x128xf32>, vector<8x128xf32>, vector<8x128xf32>, vector<8x128xf32>, vector<8x128xf32>, vector<8x128xf32>, vector<8x128xf32> -> vector<64x128xf32>
    %267 = arith.select %21, %265, %266 : vector<64x128xi1>, vector<64x128xf32>
    %c0_45 = arith.constant 0 : index
    %c0_46 = arith.constant 0 : index
    %268 = vector.load %arg5[%c0_45, %c0_46] : memref<128x512xf32, #tpu.memory_space<vmem>>, vector<128x512xf32>
    %c0_47 = arith.constant 0 : index
    %c0_48 = arith.constant 0 : index
    %269 = vector.load %arg6[%c0_47, %c0_48] : memref<128x512xf32, #tpu.memory_space<vmem>>, vector<128x512xf32>
    %c0_49 = arith.constant 0 : index
    %c0_50 = arith.constant 0 : index
    %270 = vector.load %arg7[%c0_49, %c0_50] : memref<1x512xf32, #tpu.memory_space<vmem>>, vector<1x512xf32>
    %cst_51 = arith.constant dense<0.000000e+00> : vector<64x512xf32>
    %271 = tpu.matmul %267, %268, %cst_51 {dimension_numbers = #tpu.dot_dimension_numbers<[1], [0], [0], [1], [0, 0, 1, 1], [], []>} : vector<64x128xf32>, vector<128x512xf32>, vector<64x512xf32> -> vector<64x512xf32>
    %272 = vector.broadcast %270 : vector<1x512xf32> to vector<64x512xf32>
    %273 = arith.addf %271, %272 : vector<64x512xf32>
    %274 = vector.extract_strided_slice %273 {offsets = [56, 0], sizes = [8, 512], strides = [1, 1]} : vector<64x512xf32> to vector<8x512xf32>
    %275 = vector.extract_strided_slice %273 {offsets = [48, 0], sizes = [8, 512], strides = [1, 1]} : vector<64x512xf32> to vector<8x512xf32>
    %276 = vector.extract_strided_slice %273 {offsets = [40, 0], sizes = [8, 512], strides = [1, 1]} : vector<64x512xf32> to vector<8x512xf32>
    %277 = vector.extract_strided_slice %273 {offsets = [32, 0], sizes = [8, 512], strides = [1, 1]} : vector<64x512xf32> to vector<8x512xf32>
    %278 = vector.extract_strided_slice %273 {offsets = [24, 0], sizes = [8, 512], strides = [1, 1]} : vector<64x512xf32> to vector<8x512xf32>
    %279 = vector.extract_strided_slice %273 {offsets = [16, 0], sizes = [8, 512], strides = [1, 1]} : vector<64x512xf32> to vector<8x512xf32>
    %280 = vector.extract_strided_slice %273 {offsets = [8, 0], sizes = [8, 512], strides = [1, 1]} : vector<64x512xf32> to vector<8x512xf32>
    %281 = vector.extract_strided_slice %273 {offsets = [0, 0], sizes = [8, 512], strides = [1, 1]} : vector<64x512xf32> to vector<8x512xf32>
    %282 = tpu.concatenate %274, %275, %276, %277, %278, %279, %280, %281 in 0 : vector<8x512xf32>, vector<8x512xf32>, vector<8x512xf32>, vector<8x512xf32>, vector<8x512xf32>, vector<8x512xf32>, vector<8x512xf32>, vector<8x512xf32> -> vector<64x512xf32>
    %283 = arith.select %18, %273, %282 : vector<64x512xi1>, vector<64x512xf32>
    %cst_52 = arith.constant 0.000000e+00 : f32
    %284 = vector.broadcast %cst_52 : f32 to vector<8x128xf32>
    %cst_53 = arith.constant 0.000000e+00 : f32
    %285 = vector.broadcast %cst_53 : f32 to vector<8x128xf32>
    %286 = vector.extract_strided_slice %283 {offsets = [0, 0], sizes = [8, 512], strides = [1, 1]} : vector<64x512xf32> to vector<8x512xf32>
    %cst_54 = arith.constant dense<0.000000e+00> : vector<8x512xf32>
    %287 = tpu.matmul %284, %269, %cst_54 {dimension_numbers = #tpu.dot_dimension_numbers<[1], [0], [0], [1], [0, 0, 1, 1], [], []>} : vector<8x128xf32>, vector<128x512xf32>, vector<8x512xf32> -> vector<8x512xf32>
    %288 = arith.addf %286, %287 : vector<8x512xf32>
    %289 = vector.extract_strided_slice %288 {offsets = [0, 0], sizes = [8, 128], strides = [1, 1]} : vector<8x512xf32> to vector<8x128xf32>
    %290 = arith.negf %289 : vector<8x128xf32>
    %291 = math.exp %290 : vector<8x128xf32>
    %cst_55 = arith.constant 1.000000e+00 : f32
    %292 = vector.broadcast %cst_55 : f32 to vector<8x128xf32>
    %293 = arith.addf %292, %291 : vector<8x128xf32>
    %294 = arith.divf %292, %293 : vector<8x128xf32>
    %295 = vector.extract_strided_slice %288 {offsets = [0, 128], sizes = [8, 128], strides = [1, 1]} : vector<8x512xf32> to vector<8x128xf32>
    %296 = arith.negf %295 : vector<8x128xf32>
    %297 = math.exp %296 : vector<8x128xf32>
    %cst_56 = arith.constant 1.000000e+00 : f32
    %298 = vector.broadcast %cst_56 : f32 to vector<8x128xf32>
    %299 = arith.addf %298, %297 : vector<8x128xf32>
    %300 = arith.divf %298, %299 : vector<8x128xf32>
    %301 = vector.extract_strided_slice %288 {offsets = [0, 256], sizes = [8, 128], strides = [1, 1]} : vector<8x512xf32> to vector<8x128xf32>
    %302 = math.tanh %301 : vector<8x128xf32>
    %303 = vector.extract_strided_slice %288 {offsets = [0, 384], sizes = [8, 128], strides = [1, 1]} : vector<8x512xf32> to vector<8x128xf32>
    %304 = arith.negf %303 : vector<8x128xf32>
    %305 = math.exp %304 : vector<8x128xf32>
    %cst_57 = arith.constant 1.000000e+00 : f32
    %306 = vector.broadcast %cst_57 : f32 to vector<8x128xf32>
    %307 = arith.addf %306, %305 : vector<8x128xf32>
    %308 = arith.divf %306, %307 : vector<8x128xf32>
    %309 = arith.mulf %300, %285 : vector<8x128xf32>
    %310 = arith.mulf %294, %302 : vector<8x128xf32>
    %311 = arith.addf %309, %310 : vector<8x128xf32>
    %312 = math.tanh %311 : vector<8x128xf32>
    %313 = arith.mulf %308, %312 : vector<8x128xf32>
    %314 = vector.extract_strided_slice %283 {offsets = [8, 0], sizes = [8, 512], strides = [1, 1]} : vector<64x512xf32> to vector<8x512xf32>
    %cst_58 = arith.constant dense<0.000000e+00> : vector<8x512xf32>
    %315 = tpu.matmul %313, %269, %cst_58 {dimension_numbers = #tpu.dot_dimension_numbers<[1], [0], [0], [1], [0, 0, 1, 1], [], []>} : vector<8x128xf32>, vector<128x512xf32>, vector<8x512xf32> -> vector<8x512xf32>
    %316 = arith.addf %314, %315 : vector<8x512xf32>
    %317 = vector.extract_strided_slice %316 {offsets = [0, 0], sizes = [8, 128], strides = [1, 1]} : vector<8x512xf32> to vector<8x128xf32>
    %318 = arith.negf %317 : vector<8x128xf32>
    %319 = math.exp %318 : vector<8x128xf32>
    %cst_59 = arith.constant 1.000000e+00 : f32
    %320 = vector.broadcast %cst_59 : f32 to vector<8x128xf32>
    %321 = arith.addf %320, %319 : vector<8x128xf32>
    %322 = arith.divf %320, %321 : vector<8x128xf32>
    %323 = vector.extract_strided_slice %316 {offsets = [0, 128], sizes = [8, 128], strides = [1, 1]} : vector<8x512xf32> to vector<8x128xf32>
    %324 = arith.negf %323 : vector<8x128xf32>
    %325 = math.exp %324 : vector<8x128xf32>
    %cst_60 = arith.constant 1.000000e+00 : f32
    %326 = vector.broadcast %cst_60 : f32 to vector<8x128xf32>
    %327 = arith.addf %326, %325 : vector<8x128xf32>
    %328 = arith.divf %326, %327 : vector<8x128xf32>
    %329 = vector.extract_strided_slice %316 {offsets = [0, 256], sizes = [8, 128], strides = [1, 1]} : vector<8x512xf32> to vector<8x128xf32>
    %330 = math.tanh %329 : vector<8x128xf32>
    %331 = vector.extract_strided_slice %316 {offsets = [0, 384], sizes = [8, 128], strides = [1, 1]} : vector<8x512xf32> to vector<8x128xf32>
    %332 = arith.negf %331 : vector<8x128xf32>
    %333 = math.exp %332 : vector<8x128xf32>
    %cst_61 = arith.constant 1.000000e+00 : f32
    %334 = vector.broadcast %cst_61 : f32 to vector<8x128xf32>
    %335 = arith.addf %334, %333 : vector<8x128xf32>
    %336 = arith.divf %334, %335 : vector<8x128xf32>
    %337 = arith.mulf %328, %311 : vector<8x128xf32>
    %338 = arith.mulf %322, %330 : vector<8x128xf32>
    %339 = arith.addf %337, %338 : vector<8x128xf32>
    %340 = math.tanh %339 : vector<8x128xf32>
    %341 = arith.mulf %336, %340 : vector<8x128xf32>
    %342 = vector.extract_strided_slice %283 {offsets = [16, 0], sizes = [8, 512], strides = [1, 1]} : vector<64x512xf32> to vector<8x512xf32>
    %cst_62 = arith.constant dense<0.000000e+00> : vector<8x512xf32>
    %343 = tpu.matmul %341, %269, %cst_62 {dimension_numbers = #tpu.dot_dimension_numbers<[1], [0], [0], [1], [0, 0, 1, 1], [], []>} : vector<8x128xf32>, vector<128x512xf32>, vector<8x512xf32> -> vector<8x512xf32>
    %344 = arith.addf %342, %343 : vector<8x512xf32>
    %345 = vector.extract_strided_slice %344 {offsets = [0, 0], sizes = [8, 128], strides = [1, 1]} : vector<8x512xf32> to vector<8x128xf32>
    %346 = arith.negf %345 : vector<8x128xf32>
    %347 = math.exp %346 : vector<8x128xf32>
    %cst_63 = arith.constant 1.000000e+00 : f32
    %348 = vector.broadcast %cst_63 : f32 to vector<8x128xf32>
    %349 = arith.addf %348, %347 : vector<8x128xf32>
    %350 = arith.divf %348, %349 : vector<8x128xf32>
    %351 = vector.extract_strided_slice %344 {offsets = [0, 128], sizes = [8, 128], strides = [1, 1]} : vector<8x512xf32> to vector<8x128xf32>
    %352 = arith.negf %351 : vector<8x128xf32>
    %353 = math.exp %352 : vector<8x128xf32>
    %cst_64 = arith.constant 1.000000e+00 : f32
    %354 = vector.broadcast %cst_64 : f32 to vector<8x128xf32>
    %355 = arith.addf %354, %353 : vector<8x128xf32>
    %356 = arith.divf %354, %355 : vector<8x128xf32>
    %357 = vector.extract_strided_slice %344 {offsets = [0, 256], sizes = [8, 128], strides = [1, 1]} : vector<8x512xf32> to vector<8x128xf32>
    %358 = math.tanh %357 : vector<8x128xf32>
    %359 = vector.extract_strided_slice %344 {offsets = [0, 384], sizes = [8, 128], strides = [1, 1]} : vector<8x512xf32> to vector<8x128xf32>
    %360 = arith.negf %359 : vector<8x128xf32>
    %361 = math.exp %360 : vector<8x128xf32>
    %cst_65 = arith.constant 1.000000e+00 : f32
    %362 = vector.broadcast %cst_65 : f32 to vector<8x128xf32>
    %363 = arith.addf %362, %361 : vector<8x128xf32>
    %364 = arith.divf %362, %363 : vector<8x128xf32>
    %365 = arith.mulf %356, %339 : vector<8x128xf32>
    %366 = arith.mulf %350, %358 : vector<8x128xf32>
    %367 = arith.addf %365, %366 : vector<8x128xf32>
    %368 = math.tanh %367 : vector<8x128xf32>
    %369 = arith.mulf %364, %368 : vector<8x128xf32>
    %370 = vector.extract_strided_slice %283 {offsets = [24, 0], sizes = [8, 512], strides = [1, 1]} : vector<64x512xf32> to vector<8x512xf32>
    %cst_66 = arith.constant dense<0.000000e+00> : vector<8x512xf32>
    %371 = tpu.matmul %369, %269, %cst_66 {dimension_numbers = #tpu.dot_dimension_numbers<[1], [0], [0], [1], [0, 0, 1, 1], [], []>} : vector<8x128xf32>, vector<128x512xf32>, vector<8x512xf32> -> vector<8x512xf32>
    %372 = arith.addf %370, %371 : vector<8x512xf32>
    %373 = vector.extract_strided_slice %372 {offsets = [0, 0], sizes = [8, 128], strides = [1, 1]} : vector<8x512xf32> to vector<8x128xf32>
    %374 = arith.negf %373 : vector<8x128xf32>
    %375 = math.exp %374 : vector<8x128xf32>
    %cst_67 = arith.constant 1.000000e+00 : f32
    %376 = vector.broadcast %cst_67 : f32 to vector<8x128xf32>
    %377 = arith.addf %376, %375 : vector<8x128xf32>
    %378 = arith.divf %376, %377 : vector<8x128xf32>
    %379 = vector.extract_strided_slice %372 {offsets = [0, 128], sizes = [8, 128], strides = [1, 1]} : vector<8x512xf32> to vector<8x128xf32>
    %380 = arith.negf %379 : vector<8x128xf32>
    %381 = math.exp %380 : vector<8x128xf32>
    %cst_68 = arith.constant 1.000000e+00 : f32
    %382 = vector.broadcast %cst_68 : f32 to vector<8x128xf32>
    %383 = arith.addf %382, %381 : vector<8x128xf32>
    %384 = arith.divf %382, %383 : vector<8x128xf32>
    %385 = vector.extract_strided_slice %372 {offsets = [0, 256], sizes = [8, 128], strides = [1, 1]} : vector<8x512xf32> to vector<8x128xf32>
    %386 = math.tanh %385 : vector<8x128xf32>
    %387 = vector.extract_strided_slice %372 {offsets = [0, 384], sizes = [8, 128], strides = [1, 1]} : vector<8x512xf32> to vector<8x128xf32>
    %388 = arith.negf %387 : vector<8x128xf32>
    %389 = math.exp %388 : vector<8x128xf32>
    %cst_69 = arith.constant 1.000000e+00 : f32
    %390 = vector.broadcast %cst_69 : f32 to vector<8x128xf32>
    %391 = arith.addf %390, %389 : vector<8x128xf32>
    %392 = arith.divf %390, %391 : vector<8x128xf32>
    %393 = arith.mulf %384, %367 : vector<8x128xf32>
    %394 = arith.mulf %378, %386 : vector<8x128xf32>
    %395 = arith.addf %393, %394 : vector<8x128xf32>
    %396 = math.tanh %395 : vector<8x128xf32>
    %397 = arith.mulf %392, %396 : vector<8x128xf32>
    %398 = vector.extract_strided_slice %283 {offsets = [32, 0], sizes = [8, 512], strides = [1, 1]} : vector<64x512xf32> to vector<8x512xf32>
    %cst_70 = arith.constant dense<0.000000e+00> : vector<8x512xf32>
    %399 = tpu.matmul %397, %269, %cst_70 {dimension_numbers = #tpu.dot_dimension_numbers<[1], [0], [0], [1], [0, 0, 1, 1], [], []>} : vector<8x128xf32>, vector<128x512xf32>, vector<8x512xf32> -> vector<8x512xf32>
    %400 = arith.addf %398, %399 : vector<8x512xf32>
    %401 = vector.extract_strided_slice %400 {offsets = [0, 0], sizes = [8, 128], strides = [1, 1]} : vector<8x512xf32> to vector<8x128xf32>
    %402 = arith.negf %401 : vector<8x128xf32>
    %403 = math.exp %402 : vector<8x128xf32>
    %cst_71 = arith.constant 1.000000e+00 : f32
    %404 = vector.broadcast %cst_71 : f32 to vector<8x128xf32>
    %405 = arith.addf %404, %403 : vector<8x128xf32>
    %406 = arith.divf %404, %405 : vector<8x128xf32>
    %407 = vector.extract_strided_slice %400 {offsets = [0, 128], sizes = [8, 128], strides = [1, 1]} : vector<8x512xf32> to vector<8x128xf32>
    %408 = arith.negf %407 : vector<8x128xf32>
    %409 = math.exp %408 : vector<8x128xf32>
    %cst_72 = arith.constant 1.000000e+00 : f32
    %410 = vector.broadcast %cst_72 : f32 to vector<8x128xf32>
    %411 = arith.addf %410, %409 : vector<8x128xf32>
    %412 = arith.divf %410, %411 : vector<8x128xf32>
    %413 = vector.extract_strided_slice %400 {offsets = [0, 256], sizes = [8, 128], strides = [1, 1]} : vector<8x512xf32> to vector<8x128xf32>
    %414 = math.tanh %413 : vector<8x128xf32>
    %415 = vector.extract_strided_slice %400 {offsets = [0, 384], sizes = [8, 128], strides = [1, 1]} : vector<8x512xf32> to vector<8x128xf32>
    %416 = arith.negf %415 : vector<8x128xf32>
    %417 = math.exp %416 : vector<8x128xf32>
    %cst_73 = arith.constant 1.000000e+00 : f32
    %418 = vector.broadcast %cst_73 : f32 to vector<8x128xf32>
    %419 = arith.addf %418, %417 : vector<8x128xf32>
    %420 = arith.divf %418, %419 : vector<8x128xf32>
    %421 = arith.mulf %412, %395 : vector<8x128xf32>
    %422 = arith.mulf %406, %414 : vector<8x128xf32>
    %423 = arith.addf %421, %422 : vector<8x128xf32>
    %424 = math.tanh %423 : vector<8x128xf32>
    %425 = arith.mulf %420, %424 : vector<8x128xf32>
    %426 = vector.extract_strided_slice %283 {offsets = [40, 0], sizes = [8, 512], strides = [1, 1]} : vector<64x512xf32> to vector<8x512xf32>
    %cst_74 = arith.constant dense<0.000000e+00> : vector<8x512xf32>
    %427 = tpu.matmul %425, %269, %cst_74 {dimension_numbers = #tpu.dot_dimension_numbers<[1], [0], [0], [1], [0, 0, 1, 1], [], []>} : vector<8x128xf32>, vector<128x512xf32>, vector<8x512xf32> -> vector<8x512xf32>
    %428 = arith.addf %426, %427 : vector<8x512xf32>
    %429 = vector.extract_strided_slice %428 {offsets = [0, 0], sizes = [8, 128], strides = [1, 1]} : vector<8x512xf32> to vector<8x128xf32>
    %430 = arith.negf %429 : vector<8x128xf32>
    %431 = math.exp %430 : vector<8x128xf32>
    %cst_75 = arith.constant 1.000000e+00 : f32
    %432 = vector.broadcast %cst_75 : f32 to vector<8x128xf32>
    %433 = arith.addf %432, %431 : vector<8x128xf32>
    %434 = arith.divf %432, %433 : vector<8x128xf32>
    %435 = vector.extract_strided_slice %428 {offsets = [0, 128], sizes = [8, 128], strides = [1, 1]} : vector<8x512xf32> to vector<8x128xf32>
    %436 = arith.negf %435 : vector<8x128xf32>
    %437 = math.exp %436 : vector<8x128xf32>
    %cst_76 = arith.constant 1.000000e+00 : f32
    %438 = vector.broadcast %cst_76 : f32 to vector<8x128xf32>
    %439 = arith.addf %438, %437 : vector<8x128xf32>
    %440 = arith.divf %438, %439 : vector<8x128xf32>
    %441 = vector.extract_strided_slice %428 {offsets = [0, 256], sizes = [8, 128], strides = [1, 1]} : vector<8x512xf32> to vector<8x128xf32>
    %442 = math.tanh %441 : vector<8x128xf32>
    %443 = vector.extract_strided_slice %428 {offsets = [0, 384], sizes = [8, 128], strides = [1, 1]} : vector<8x512xf32> to vector<8x128xf32>
    %444 = arith.negf %443 : vector<8x128xf32>
    %445 = math.exp %444 : vector<8x128xf32>
    %cst_77 = arith.constant 1.000000e+00 : f32
    %446 = vector.broadcast %cst_77 : f32 to vector<8x128xf32>
    %447 = arith.addf %446, %445 : vector<8x128xf32>
    %448 = arith.divf %446, %447 : vector<8x128xf32>
    %449 = arith.mulf %440, %423 : vector<8x128xf32>
    %450 = arith.mulf %434, %442 : vector<8x128xf32>
    %451 = arith.addf %449, %450 : vector<8x128xf32>
    %452 = math.tanh %451 : vector<8x128xf32>
    %453 = arith.mulf %448, %452 : vector<8x128xf32>
    %454 = vector.extract_strided_slice %283 {offsets = [48, 0], sizes = [8, 512], strides = [1, 1]} : vector<64x512xf32> to vector<8x512xf32>
    %cst_78 = arith.constant dense<0.000000e+00> : vector<8x512xf32>
    %455 = tpu.matmul %453, %269, %cst_78 {dimension_numbers = #tpu.dot_dimension_numbers<[1], [0], [0], [1], [0, 0, 1, 1], [], []>} : vector<8x128xf32>, vector<128x512xf32>, vector<8x512xf32> -> vector<8x512xf32>
    %456 = arith.addf %454, %455 : vector<8x512xf32>
    %457 = vector.extract_strided_slice %456 {offsets = [0, 0], sizes = [8, 128], strides = [1, 1]} : vector<8x512xf32> to vector<8x128xf32>
    %458 = arith.negf %457 : vector<8x128xf32>
    %459 = math.exp %458 : vector<8x128xf32>
    %cst_79 = arith.constant 1.000000e+00 : f32
    %460 = vector.broadcast %cst_79 : f32 to vector<8x128xf32>
    %461 = arith.addf %460, %459 : vector<8x128xf32>
    %462 = arith.divf %460, %461 : vector<8x128xf32>
    %463 = vector.extract_strided_slice %456 {offsets = [0, 128], sizes = [8, 128], strides = [1, 1]} : vector<8x512xf32> to vector<8x128xf32>
    %464 = arith.negf %463 : vector<8x128xf32>
    %465 = math.exp %464 : vector<8x128xf32>
    %cst_80 = arith.constant 1.000000e+00 : f32
    %466 = vector.broadcast %cst_80 : f32 to vector<8x128xf32>
    %467 = arith.addf %466, %465 : vector<8x128xf32>
    %468 = arith.divf %466, %467 : vector<8x128xf32>
    %469 = vector.extract_strided_slice %456 {offsets = [0, 256], sizes = [8, 128], strides = [1, 1]} : vector<8x512xf32> to vector<8x128xf32>
    %470 = math.tanh %469 : vector<8x128xf32>
    %471 = vector.extract_strided_slice %456 {offsets = [0, 384], sizes = [8, 128], strides = [1, 1]} : vector<8x512xf32> to vector<8x128xf32>
    %472 = arith.negf %471 : vector<8x128xf32>
    %473 = math.exp %472 : vector<8x128xf32>
    %cst_81 = arith.constant 1.000000e+00 : f32
    %474 = vector.broadcast %cst_81 : f32 to vector<8x128xf32>
    %475 = arith.addf %474, %473 : vector<8x128xf32>
    %476 = arith.divf %474, %475 : vector<8x128xf32>
    %477 = arith.mulf %468, %451 : vector<8x128xf32>
    %478 = arith.mulf %462, %470 : vector<8x128xf32>
    %479 = arith.addf %477, %478 : vector<8x128xf32>
    %480 = math.tanh %479 : vector<8x128xf32>
    %481 = arith.mulf %476, %480 : vector<8x128xf32>
    %482 = vector.extract_strided_slice %283 {offsets = [56, 0], sizes = [8, 512], strides = [1, 1]} : vector<64x512xf32> to vector<8x512xf32>
    %cst_82 = arith.constant dense<0.000000e+00> : vector<8x512xf32>
    %483 = tpu.matmul %481, %269, %cst_82 {dimension_numbers = #tpu.dot_dimension_numbers<[1], [0], [0], [1], [0, 0, 1, 1], [], []>} : vector<8x128xf32>, vector<128x512xf32>, vector<8x512xf32> -> vector<8x512xf32>
    %484 = arith.addf %482, %483 : vector<8x512xf32>
    %485 = vector.extract_strided_slice %484 {offsets = [0, 0], sizes = [8, 128], strides = [1, 1]} : vector<8x512xf32> to vector<8x128xf32>
    %486 = arith.negf %485 : vector<8x128xf32>
    %487 = math.exp %486 : vector<8x128xf32>
    %cst_83 = arith.constant 1.000000e+00 : f32
    %488 = vector.broadcast %cst_83 : f32 to vector<8x128xf32>
    %489 = arith.addf %488, %487 : vector<8x128xf32>
    %490 = arith.divf %488, %489 : vector<8x128xf32>
    %491 = vector.extract_strided_slice %484 {offsets = [0, 128], sizes = [8, 128], strides = [1, 1]} : vector<8x512xf32> to vector<8x128xf32>
    %492 = arith.negf %491 : vector<8x128xf32>
    %493 = math.exp %492 : vector<8x128xf32>
    %cst_84 = arith.constant 1.000000e+00 : f32
    %494 = vector.broadcast %cst_84 : f32 to vector<8x128xf32>
    %495 = arith.addf %494, %493 : vector<8x128xf32>
    %496 = arith.divf %494, %495 : vector<8x128xf32>
    %497 = vector.extract_strided_slice %484 {offsets = [0, 256], sizes = [8, 128], strides = [1, 1]} : vector<8x512xf32> to vector<8x128xf32>
    %498 = math.tanh %497 : vector<8x128xf32>
    %499 = vector.extract_strided_slice %484 {offsets = [0, 384], sizes = [8, 128], strides = [1, 1]} : vector<8x512xf32> to vector<8x128xf32>
    %500 = arith.negf %499 : vector<8x128xf32>
    %501 = math.exp %500 : vector<8x128xf32>
    %cst_85 = arith.constant 1.000000e+00 : f32
    %502 = vector.broadcast %cst_85 : f32 to vector<8x128xf32>
    %503 = arith.addf %502, %501 : vector<8x128xf32>
    %504 = arith.divf %502, %503 : vector<8x128xf32>
    %505 = arith.mulf %496, %479 : vector<8x128xf32>
    %506 = arith.mulf %490, %498 : vector<8x128xf32>
    %507 = arith.addf %505, %506 : vector<8x128xf32>
    %508 = math.tanh %507 : vector<8x128xf32>
    %509 = arith.mulf %504, %508 : vector<8x128xf32>
    %510 = tpu.concatenate %313, %341, %369, %397, %425, %453, %481, %509 in 0 : vector<8x128xf32>, vector<8x128xf32>, vector<8x128xf32>, vector<8x128xf32>, vector<8x128xf32>, vector<8x128xf32>, vector<8x128xf32>, vector<8x128xf32> -> vector<64x128xf32>
    %511 = tpu.concatenate %509, %481, %453, %425, %397, %369, %341, %313 in 0 : vector<8x128xf32>, vector<8x128xf32>, vector<8x128xf32>, vector<8x128xf32>, vector<8x128xf32>, vector<8x128xf32>, vector<8x128xf32>, vector<8x128xf32> -> vector<64x128xf32>
    %512 = arith.select %21, %510, %511 : vector<64x128xi1>, vector<64x128xf32>
    %c0_86 = arith.constant 0 : index
    %c0_87 = arith.constant 0 : index
    %513 = vector.load %arg8[%c0_86, %c0_87] : memref<1x128xf32, #tpu.memory_space<vmem>>, vector<1x128xf32>
    %514 = vector.broadcast %513 : vector<1x128xf32> to vector<64x128xf32>
    %515 = arith.mulf %512, %514 : vector<64x128xf32>
    %cst_88 = arith.constant dense<0.000000e+00> : vector<64xf32>
    %516 = vector.multi_reduction <add>, %515, %cst_88 [1] : vector<64x128xf32> to vector<64xf32>
    %517 = vector.shape_cast %516 : vector<64xf32> to vector<64x1xf32>
    %518 = vector.extract_strided_slice %517 {offsets = [0, 0], sizes = [8, 1], strides = [1, 1]} : vector<64x1xf32> to vector<8x1xf32>
    %519 = vector.extract_strided_slice %517 {offsets = [8, 0], sizes = [8, 1], strides = [1, 1]} : vector<64x1xf32> to vector<8x1xf32>
    %520 = arith.maximumf %518, %519 : vector<8x1xf32>
    %521 = vector.extract_strided_slice %517 {offsets = [16, 0], sizes = [8, 1], strides = [1, 1]} : vector<64x1xf32> to vector<8x1xf32>
    %522 = arith.maximumf %520, %521 : vector<8x1xf32>
    %523 = vector.extract_strided_slice %517 {offsets = [24, 0], sizes = [8, 1], strides = [1, 1]} : vector<64x1xf32> to vector<8x1xf32>
    %524 = arith.maximumf %522, %523 : vector<8x1xf32>
    %525 = vector.extract_strided_slice %517 {offsets = [32, 0], sizes = [8, 1], strides = [1, 1]} : vector<64x1xf32> to vector<8x1xf32>
    %526 = arith.maximumf %524, %525 : vector<8x1xf32>
    %527 = vector.extract_strided_slice %517 {offsets = [40, 0], sizes = [8, 1], strides = [1, 1]} : vector<64x1xf32> to vector<8x1xf32>
    %528 = arith.maximumf %526, %527 : vector<8x1xf32>
    %529 = vector.extract_strided_slice %517 {offsets = [48, 0], sizes = [8, 1], strides = [1, 1]} : vector<64x1xf32> to vector<8x1xf32>
    %530 = arith.maximumf %528, %529 : vector<8x1xf32>
    %531 = vector.extract_strided_slice %517 {offsets = [56, 0], sizes = [8, 1], strides = [1, 1]} : vector<64x1xf32> to vector<8x1xf32>
    %532 = arith.maximumf %530, %531 : vector<8x1xf32>
    %533 = tpu.concatenate %532, %532, %532, %532, %532, %532, %532, %532 in 0 : vector<8x1xf32>, vector<8x1xf32>, vector<8x1xf32>, vector<8x1xf32>, vector<8x1xf32>, vector<8x1xf32>, vector<8x1xf32>, vector<8x1xf32> -> vector<64x1xf32>
    %534 = arith.subf %517, %533 : vector<64x1xf32>
    %535 = math.exp %534 : vector<64x1xf32>
    %536 = vector.extract_strided_slice %535 {offsets = [0, 0], sizes = [8, 1], strides = [1, 1]} : vector<64x1xf32> to vector<8x1xf32>
    %537 = vector.extract_strided_slice %535 {offsets = [8, 0], sizes = [8, 1], strides = [1, 1]} : vector<64x1xf32> to vector<8x1xf32>
    %538 = arith.addf %536, %537 : vector<8x1xf32>
    %539 = vector.extract_strided_slice %535 {offsets = [16, 0], sizes = [8, 1], strides = [1, 1]} : vector<64x1xf32> to vector<8x1xf32>
    %540 = arith.addf %538, %539 : vector<8x1xf32>
    %541 = vector.extract_strided_slice %535 {offsets = [24, 0], sizes = [8, 1], strides = [1, 1]} : vector<64x1xf32> to vector<8x1xf32>
    %542 = arith.addf %540, %541 : vector<8x1xf32>
    %543 = vector.extract_strided_slice %535 {offsets = [32, 0], sizes = [8, 1], strides = [1, 1]} : vector<64x1xf32> to vector<8x1xf32>
    %544 = arith.addf %542, %543 : vector<8x1xf32>
    %545 = vector.extract_strided_slice %535 {offsets = [40, 0], sizes = [8, 1], strides = [1, 1]} : vector<64x1xf32> to vector<8x1xf32>
    %546 = arith.addf %544, %545 : vector<8x1xf32>
    %547 = vector.extract_strided_slice %535 {offsets = [48, 0], sizes = [8, 1], strides = [1, 1]} : vector<64x1xf32> to vector<8x1xf32>
    %548 = arith.addf %546, %547 : vector<8x1xf32>
    %549 = vector.extract_strided_slice %535 {offsets = [56, 0], sizes = [8, 1], strides = [1, 1]} : vector<64x1xf32> to vector<8x1xf32>
    %550 = arith.addf %548, %549 : vector<8x1xf32>
    %551 = tpu.reciprocal %550 {approx = true} : vector<8x1xf32> -> vector<8x1xf32>
    %552 = tpu.concatenate %551, %551, %551, %551, %551, %551, %551, %551 in 0 : vector<8x1xf32>, vector<8x1xf32>, vector<8x1xf32>, vector<8x1xf32>, vector<8x1xf32>, vector<8x1xf32>, vector<8x1xf32>, vector<8x1xf32> -> vector<64x1xf32>
    %553 = arith.mulf %535, %552 : vector<64x1xf32>
    %554 = vector.broadcast %553 : vector<64x1xf32> to vector<64x128xf32>
    %555 = arith.mulf %554, %512 : vector<64x128xf32>
    %556 = vector.extract_strided_slice %555 {offsets = [0, 0], sizes = [8, 128], strides = [1, 1]} : vector<64x128xf32> to vector<8x128xf32>
    %557 = vector.extract_strided_slice %555 {offsets = [8, 0], sizes = [8, 128], strides = [1, 1]} : vector<64x128xf32> to vector<8x128xf32>
    %558 = arith.addf %556, %557 : vector<8x128xf32>
    %559 = vector.extract_strided_slice %555 {offsets = [16, 0], sizes = [8, 128], strides = [1, 1]} : vector<64x128xf32> to vector<8x128xf32>
    %560 = arith.addf %558, %559 : vector<8x128xf32>
    %561 = vector.extract_strided_slice %555 {offsets = [24, 0], sizes = [8, 128], strides = [1, 1]} : vector<64x128xf32> to vector<8x128xf32>
    %562 = arith.addf %560, %561 : vector<8x128xf32>
    %563 = vector.extract_strided_slice %555 {offsets = [32, 0], sizes = [8, 128], strides = [1, 1]} : vector<64x128xf32> to vector<8x128xf32>
    %564 = arith.addf %562, %563 : vector<8x128xf32>
    %565 = vector.extract_strided_slice %555 {offsets = [40, 0], sizes = [8, 128], strides = [1, 1]} : vector<64x128xf32> to vector<8x128xf32>
    %566 = arith.addf %564, %565 : vector<8x128xf32>
    %567 = vector.extract_strided_slice %555 {offsets = [48, 0], sizes = [8, 128], strides = [1, 1]} : vector<64x128xf32> to vector<8x128xf32>
    %568 = arith.addf %566, %567 : vector<8x128xf32>
    %569 = vector.extract_strided_slice %555 {offsets = [56, 0], sizes = [8, 128], strides = [1, 1]} : vector<64x128xf32> to vector<8x128xf32>
    %570 = arith.addf %568, %569 : vector<8x128xf32>
    %c0_89 = arith.constant 0 : index
    %c0_90 = arith.constant 0 : index
    %571 = vector.load %arg9[%c0_89, %c0_90] : memref<128x128xf32, #tpu.memory_space<vmem>>, vector<128x128xf32>
    %cst_91 = arith.constant dense<0.000000e+00> : vector<8x128xf32>
    %572 = tpu.matmul %570, %571, %cst_91 {dimension_numbers = #tpu.dot_dimension_numbers<[1], [0], [0], [1], [0, 0, 1, 1], [], []>} : vector<8x128xf32>, vector<128x128xf32>, vector<8x128xf32> -> vector<8x128xf32>
    %c0_92 = arith.constant 0 : index
    %c0_93 = arith.constant 0 : index
    %573 = vector.load %arg10[%c0_92, %c0_93] : memref<1x128xf32, #tpu.memory_space<vmem>>, vector<1x128xf32>
    %574 = vector.broadcast %573 : vector<1x128xf32> to vector<8x128xf32>
    %575 = arith.addf %572, %574 : vector<8x128xf32>
    %c0_94 = arith.constant 0 : index
    %c0_95 = arith.constant 0 : index
    %576 = vector.load %arg11[%c0_94, %c0_95] : memref<8x128xf32, #tpu.memory_space<vmem>>, vector<8x128xf32>
    tpu.vector_store %arg11[%c0_94, %c0_95], %575 {strides = array<i32>} : memref<8x128xf32, #tpu.memory_space<vmem>>, vector<8x128xf32>,
    return
  }
  func.func @transform_0(%arg0: i32) -> (i32, i32) {
    %c0_i32 = arith.constant 0 : i32
    %c0_i32_0 = arith.constant 0 : i32
    %c0_i32_1 = arith.constant 0 : i32
    return %c0_i32, %c0_i32_0 : i32, i32
  }
  func.func @transform_1(%arg0: i32) -> (i32, i32) {
    %c0_i32 = arith.constant 0 : i32
    %c0_i32_0 = arith.constant 0 : i32
    %c0_i32_1 = arith.constant 0 : i32
    return %c0_i32, %c0_i32_0 : i32, i32
  }
  func.func @transform_2(%arg0: i32) -> (i32, i32) {
    %c0_i32 = arith.constant 0 : i32
    %c0_i32_0 = arith.constant 0 : i32
    %c0_i32_1 = arith.constant 0 : i32
    return %c0_i32, %c0_i32_0 : i32, i32
  }
  func.func @transform_3(%arg0: i32) -> (i32, i32) {
    %c0_i32 = arith.constant 0 : i32
    %c0_i32_0 = arith.constant 0 : i32
    %c0_i32_1 = arith.constant 0 : i32
    return %c0_i32, %c0_i32_0 : i32, i32
  }
  func.func @transform_4(%arg0: i32) -> (i32, i32) {
    %c0_i32 = arith.constant 0 : i32
    %c0_i32_0 = arith.constant 0 : i32
    %c0_i32_1 = arith.constant 0 : i32
    return %c0_i32, %c0_i32_0 : i32, i32
  }
  func.func @transform_5(%arg0: i32) -> (i32, i32) {
    %c0_i32 = arith.constant 0 : i32
    %c0_i32_0 = arith.constant 0 : i32
    %c0_i32_1 = arith.constant 0 : i32
    return %c0_i32, %c0_i32_0 : i32, i32
  }
  func.func @transform_6(%arg0: i32) -> (i32, i32) {
    %c0_i32 = arith.constant 0 : i32
    %c0_i32_0 = arith.constant 0 : i32
    %c0_i32_1 = arith.constant 0 : i32
    return %c0_i32, %c0_i32_0 : i32, i32
  }
  func.func @transform_7(%arg0: i32) -> (i32, i32) {
    %c0_i32 = arith.constant 0 : i32
    %c0_i32_0 = arith.constant 0 : i32
    %c0_i32_1 = arith.constant 0 : i32
    return %c0_i32, %c0_i32_0 : i32, i32
  }
  func.func @transform_8(%arg0: i32) -> (i32, i32) {
    %c0_i32 = arith.constant 0 : i32
    %c0_i32_0 = arith.constant 0 : i32
    %c0_i32_1 = arith.constant 0 : i32
    return %c0_i32, %c0_i32_0 : i32, i32
  }
  func.func @transform_9(%arg0: i32) -> (i32, i32) {
    %c0_i32 = arith.constant 0 : i32
    %c0_i32_0 = arith.constant 0 : i32
    %c0_i32_1 = arith.constant 0 : i32
    return %c0_i32, %c0_i32_0 : i32, i32
  }
  func.func @transform_10(%arg0: i32) -> (i32, i32) {
    %c0_i32 = arith.constant 0 : i32
    %c0_i32_0 = arith.constant 0 : i32
    %c0_i32_1 = arith.constant 0 : i32
    return %c0_i32, %c0_i32_0 : i32, i32
  }
}

</mosaic_0001>

<bundles_post_ra>
// kernel: lstm_with_attention_forward.1
= control target key start
LH: loop header
LB: loop body
LE: loop exit
PB: predicated region body
PF: predicated region fallthrough
CT: control target
= control target key end

     0   :  { %15 = vsyncpa [#allocation3], 0  ;;  %s7375_s0 = inlined_call_operand.vmem [shape: f32[64,16], index: 0, kind: input, shape index: {}]   ;;  %s7376_s1 = inlined_call_operand.vmem [shape: f32[16,512], index: 1, kind: input, shape index: {}]   ;;  %s7377_s2 = inlined_call_operand.hbm [shape: f32[128,512], index: 2, kind: input, shape index: {}]   ;;  %s7378_s3 = inlined_call_operand.vmem [shape: f32[1,512], index: 3, kind: input, shape index: {}]   ;;  %s7379_s4 = inlined_call_operand.hbm [shape: f32[128,512], index: 4, kind: input, shape index: {}]   ;;  %s7380_s5 = inlined_call_operand.hbm [shape: f32[128,512], index: 5, kind: input, shape index: {}]   ;;  %s7381_s6 = inlined_call_operand.vmem [shape: f32[1,512], index: 6, kind: input, shape index: {}]   ;;  %s7382_s7 = inlined_call_operand.vmem [shape: f32[1,128], index: 7, kind: input, shape index: {}]   ;;  %s7383_s8 = inlined_call_operand.vmem [shape: f32[128,128], index: 8, kind: input, shape index: {}]   ;;  %s7384_s9 = inlined_call_operand.vmem [shape: f32[1,128], index: 9, kind: input, shape index: {}]   ;;  %s7385_s10 = inlined_call_operand.vmem [shape: f32[8,128], index: 10, kind: output, shape index: {}]  }
   0x1   :  { %16 = vsyncpa [#allocation5], 0  ;;  %s5489_s13 = smov [#allocation4]   ;;  %s5490_s15 = smov [#allocation2]  }
   0x2   :  { %s40_s14 = sshll.u32 %s5489_s13, 4  ;;  %s26_s16 = sshll.u32 %s5490_s15, 4  ;;  %s41_s14 = int_to_ptr.vmem [resolvable:$true] %s40_s14  ;;  %s5553_s16 = int_to_ptr.vmem [resolvable:$true] %s26_s16 }
   0x3   :  { %s5419_s19 = scalar_lea.hbm %s7379_s4, 8192 }
   0x4   :  { %p5420_p0 = scmp.ne.s32.totalorder %s7379_s4, %s5419_s19  ;;  %p5423_p1 = scmp.lt.u32.totalorder %s5419_s19, %s7379_s4 }
   0x6   :  { %p5425_p2 = pnand %p5423_p1, %p5420_p0 }
   0x8   :  { %5428 = shalt.err (!%p5425_p2)
}
   0x9   :  { %s5429_s24 = scalar_lea.vmem %s41_s14, 8192  ;;  %p5434_p4 = scmp.lt.s32.totalorder %s41_s14, %s41_s14 }
   0xa   :  { %p5430_p3 = scmp.ne.s32.totalorder %s41_s14, %s5429_s24  ;;  %p5435_p5 = scmp.lt.s32.totalorder %s5429_s24, %s5429_s24 }
   0xc   :  { %p5436_p6 = por %p5435_p5, %p5434_p4 }
   0xe   :  { %p5437_p7 = pnand %p5436_p6, %p5430_p3 }
  0x10   :  { %5440 = shalt.err (!%p5437_p7)
}
  0x11   :  { %s5491_s25 = smov 512   ;;  %s5492_s26 = smov 32  }
  0x12   :  { %46 = dma.hbm_to_vmem [thread:$0]  %s7379_s4, 8192, %s41_s14, [#allocation5], %s5491_s25, %s5491_s25, %s5492_s26  }
  0x13   :  { %s5441_s11 = scalar_lea.hbm %s7377_s2, 8192 }
  0x14   :  { %p5442_p8 = scmp.ne.s32.totalorder %s7377_s2, %s5441_s11  ;;  %p5445_p9 = scmp.lt.u32.totalorder %s5441_s11, %s7377_s2 }
  0x16   :  { %p5447_p10 = pnand %p5445_p9, %p5442_p8 }
  0x18   :  { %5450 = shalt.err (!%p5447_p10)
}
  0x19   :  { %s5451_s18 = scalar_lea.vmem %s5553_s16, 8192  ;;  %p5456_p12 = scmp.lt.s32.totalorder %s5553_s16, %s5553_s16 }
  0x1a   :  { %p5452_p11 = scmp.ne.s32.totalorder %s5553_s16, %s5451_s18  ;;  %p5457_p13 = scmp.lt.s32.totalorder %s5451_s18, %s5451_s18 }
  0x1c   :  { %p5458_p0 = por %p5457_p13, %p5456_p12 }
  0x1e   :  { %p5459_p1 = pnand %p5458_p0, %p5452_p11 }
  0x20   :  { %5462 = shalt.err (!%p5459_p1)
}
  0x21   :  { %32 = dma.hbm_to_vmem [thread:$0]  %s7377_s2, 8192, %s5553_s16, [#allocation3], %s5491_s25, %s5491_s25, %s5492_s26  }
  0x22   :  { %s5493_s19 = smov [#allocation6]   ;;  %s5463_s23 = scalar_lea.hbm %s7380_s5, 8192 }
  0x23   :  { %s52_s20 = sshll.u32 %s5493_s19, 4  ;;  %p5464_p2 = scmp.ne.s32.totalorder %s7380_s5, %s5463_s23  ;;  %s53_s20 = int_to_ptr.vmem [resolvable:$true] %s52_s20 }
  0x24   :  { %p5467_p3 = scmp.lt.u32.totalorder %s5463_s23, %s7380_s5 }
  0x26   :  { %p5469_p4 = pnand %p5467_p3, %p5464_p2 }
  0x28   :  { %5472 = shalt.err (!%p5469_p4)
}
  0x29   :  { %s5473_s30 = scalar_lea.vmem %s53_s20, 8192  ;;  %p5478_p6 = scmp.lt.s32.totalorder %s53_s20, %s53_s20 }
  0x2a   :  { %p5474_p5 = scmp.ne.s32.totalorder %s53_s20, %s5473_s30  ;;  %p5479_p7 = scmp.lt.s32.totalorder %s5473_s30, %s5473_s30 }
  0x2c   :  { %p5480_p8 = por %p5479_p7, %p5478_p6 }
  0x2e   :  { %p5481_p9 = pnand %p5480_p8, %p5474_p5 }
  0x30   :  { %5484 = shalt.err (!%p5481_p9)
}
  0x31   :  { %58 = dma.hbm_to_vmem [thread:$0]  %s7380_s5, 8192, %s53_s20, [#allocation5], %s5491_s25, %s5491_s25, %s5492_s26  }
  0x32   :  { %5485 = dma.done.wait [#allocation3], 8192  }
  0x33   :  { %5486 = vsyncadd [#allocation3], 4294959104 }
  0x34   :  { %5487 = dma.done.wait [#allocation5], 16384  }
  0x35   :  { %5488 = vsyncadd [#allocation5], 4294950912  ;;  %v7390_v0 = vmov 0.0   ;;  %v143_v1 = vld [vmem:[%s7376_s1 + $0x8] sm:$0xff]  ;;  %v145_v3 = vld [vmem:[%s7376_s1 + $0x18] sm:$0xff]  ;;  %vm236_vm0 = vcmask 130048  }
  0x36   :  { %325 = vmatprep.mubr.f32.mxu0 %v7390_v0  ;;  %438 = vmatprep.mubr.f32.mxu1 %v7390_v0  ;;  %v147_v2 = vld [vmem:[%s7376_s1 + $0x28] sm:$0xff]  ;;  %v149_v5 = vld [vmem:[%s7376_s1 + $0x38] sm:$0xff]  ;;  %v142_v6 = vld [vmem:[%s7376_s1] sm:$0xff]  ;;  %vm5497_vm5 = vmmov 0  }
  0x37   :  { %v4014_v4 = vpack.c.bf16 %v147_v2, %v143_v1  ;;  %v146_v7 = vld [vmem:[%s7376_s1 + $0x20] sm:$0xff]  ;;  %v4018_v8 = vpack.c.bf16 %v149_v5, %v145_v3  ;;  %v144_v10 = vld [vmem:[%s7376_s1 + $0x10] sm:$0xff]  ;;  %v151_v14 = vld [vmem:[#allocation2 + $0x8] sm:$0xff] }
  0x38   :  { %v4016_v9 = vpack.c.bf16 %v146_v7, %v142_v6  ;;  %v148_v11 = vld [vmem:[%s7376_s1 + $0x30] sm:$0xff]  ;;  %v134_v12 = vld [vmem:[%s7375_s0] sm:$0xff]  ;;  %v155_v15 = vld [vmem:[#allocation2 + $0x28] sm:$0xff] }
  0x39   :  { %4015 = vmatprep.subr.bf16.mxu0 %v4014_v4  ;;  %v4020_v13 = vpack.c.bf16 %v148_v11, %v144_v10  ;;  %v153_v16 = vld [vmem:[#allocation2 + $0x18] sm:$0xff]  ;;  %4019 = vmatprep.subr.bf16.mxu1 %v4018_v8  ;;  %v5634_v17 = vpack.c.bf16 %v155_v15, %v151_v14  ;;  %v150_v19 = vld [vmem:[#allocation2] sm:$0xff]  ;;  %v152_v23 = vld [vmem:[#allocation2 + $0x10] sm:$0xff] }
  0x3a   :  { %4017 = vmatpush1.bf16.msra.mxu0 %v4016_v9  ;;  %v157_v18 = vld [vmem:[#allocation2 + $0x38] sm:$0xff]  ;;  %v154_v20 = vld [vmem:[#allocation2 + $0x20] sm:$0xff]  ;;  %v156_v24 = vld [vmem:[#allocation2 + $0x30] sm:$0xff] }
  0x3b   :  { %7489 = vst [vmem:[#allocation9_spill] sm:$0xff] %v5634_v17  ;;  %4021 = vmatpush1.bf16.msra.mxu1 %v4020_v13  ;;  %v5636_v21 = vpack.c.bf16 %v157_v18, %v153_v16  ;;  %v5638_v22 = vpack.c.bf16 %v154_v20, %v150_v19  ;;  %4023 = vmatprep.subr.bf16.mxu0 %v5634_v17  ;;  %v159_v26 = vld [vmem:[#allocation2 + $0x48] sm:$0xff]  ;;  %v161_v28 = vld [vmem:[#allocation2 + $0x58] sm:$0xff]  ;;  %v158_v31 = vld [vmem:[#allocation2 + $0x40] sm:$0xff] }
  0x3c   :  { %v5641_v25 = vpack.c.bf16 %v156_v24, %v152_v23  ;;  %v163_v27 = vld [vmem:[#allocation2 + $0x68] sm:$0xff]  ;;  %v165_v30 = vld [vmem:[#allocation2 + $0x78] sm:$0xff]  ;;  %v162_v32 = vld [vmem:[#allocation2 + $0x60] sm:$0xff] }
  0x3d   :  { %7490 = vst [vmem:[#allocation10_spill] sm:$0xff] %v5636_v21  ;;  %3896 = vmatmul.mubr.msk.f32.vlgmr.msra.gmra.mrb[0].mxu0 %vm236_vm0, %v134_v12  ;;  %4055 = vmatprep.subr.bf16.mxu1 %v5636_v21  ;;  %v5645_v29 = vpack.c.bf16 %v163_v27, %v159_v26  ;;  %v135_v33 = vld [vmem:[%s7375_s0 + $0x8] sm:$0xff]  ;;  %v5652_v34 = vpack.c.bf16 %v165_v30, %v161_v28  ;;  %v160_v36 = vld [vmem:[#allocation2 + $0x50] sm:$0xff]  ;;  %v169_v41 = vld [vmem:[#allocation2 + $0x98] sm:$0xff] }
  0x3e   :  { %3904 = vmatmul.mubr.msk.f32.vlgmr.msra.gmra.mrb[0].mxu1 %vm236_vm0, %v134_v12  ;;  %4025 = vmatpush1.bf16.msra.mxu0 %v5638_v22  ;;  %v5654_v35 = vpack.c.bf16 %v162_v32, %v158_v31  ;;  %v164_v37 = vld [vmem:[#allocation2 + $0x70] sm:$0xff]  ;;  %v167_v39 = vld [vmem:[#allocation2 + $0x88] sm:$0xff]  ;;  %v173_v43 = vld [vmem:[#allocation2 + $0xb8] sm:$0xff] }
  0x3f   :  { %4057 = vmatpush1.bf16.msra.mxu1 %v5641_v25  ;;  %331 = vmatprep.mubr.f32.mxu0 %v7390_v0  ;;  %v5658_v38 = vpack.c.bf16 %v164_v37, %v160_v36  ;;  %v171_v40 = vld [vmem:[#allocation2 + $0xa8] sm:$0xff]  ;;  %v166_v44 = vld [vmem:[#allocation2 + $0x80] sm:$0xff]  ;;  %v136_v46 = vld [vmem:[%s7375_s0 + $0x10] sm:$0xff]  ;;  %v5669_v47 = vpack.c.bf16 %v173_v43, %v169_v41 }
  0x40   :  { %444 = vmatprep.mubr.f32.mxu1 %v7390_v0  ;;  %4027 = vmatprep.subr.bf16.mxu0 %v5645_v29  ;;  %v5662_v42 = vpack.c.bf16 %v171_v40, %v167_v39  ;;  %v170_v45 = vld [vmem:[#allocation2 + $0xa0] sm:$0xff]  ;;  %v168_v48 = vld [vmem:[#allocation2 + $0x90] sm:$0xff]  ;;  %v175_v51 = vld [vmem:[#allocation2 + $0xc8] sm:$0xff] }
  0x41   :  { %3897 = vmatmul.mubr.msk.f32.gmra.mrb[2].mxu0 %vm236_vm0, %v135_v33  ;;  %4059 = vmatprep.subr.bf16.mxu1 %v5652_v34  ;;  %v172_v49 = vld [vmem:[#allocation2 + $0xb0] sm:$0xff]  ;;  %v5673_v50 = vpack.c.bf16 %v170_v45, %v166_v44  ;;  %v179_v52 = vld [vmem:[#allocation2 + $0xe8] sm:$0xff]  ;;  %v177_v53 = vld [vmem:[#allocation2 + $0xd8] sm:$0xff] }
  0x42   :  { %3905 = vmatmul.mubr.msk.f32.gmra.mrb[2].mxu1 %vm236_vm0, %v135_v33  ;;  %4029 = vmatpush1.bf16.msra.mxu0 %v5654_v35  ;;  %v5677_v54 = vpack.c.bf16 %v172_v49, %v168_v48  ;;  %v181_v55 = vld [vmem:[#allocation2 + $0xf8] sm:$0xff]  ;;  %v174_v56 = vld [vmem:[#allocation2 + $0xc0] sm:$0xff]  ;;  %v5681_v58 = vpack.c.bf16 %v179_v52, %v175_v51  ;;  %v176_v59 = vld [vmem:[#allocation2 + $0xd0] sm:$0xff] }
  0x43   :  { %4061 = vmatpush1.bf16.msra.mxu1 %v5658_v38  ;;  %337 = vmatprep.mubr.f32.mxu0 %v7390_v0  ;;  %v178_v57 = vld [vmem:[#allocation2 + $0xe0] sm:$0xff]  ;;  %v180_v60 = vld [vmem:[#allocation2 + $0xf0] sm:$0xff]  ;;  %v5685_v61 = vpack.c.bf16 %v181_v55, %v177_v53  ;;  %v183_v62 = vld [vmem:[#allocation2 + $0x108] sm:$0xff] }
  0x44   :  { %450 = vmatprep.mubr.f32.mxu1 %v7390_v0  ;;  %4031 = vmatprep.subr.bf16.mxu0 %v5662_v42  ;;  %v187_v63 = vld [vmem:[#allocation2 + $0x128] sm:$0xff]  ;;  %v137_v1 = vld [vmem:[%s7375_s0 + $0x18] sm:$0xff]  ;;  %v5692_v2 = vpack.c.bf16 %v178_v57, %v174_v56  ;;  %v5696_v5 = vpack.c.bf16 %v180_v60, %v176_v59  ;;  %v182_v6 = vld [vmem:[#allocation2 + $0x100] sm:$0xff] }
  0x45   :  { %3898 = vmatmul.mubr.msk.f32.gmra.mrb[4].mxu0 %vm236_vm0, %v136_v46  ;;  %4063 = vmatprep.subr.bf16.mxu1 %v5669_v47  ;;  %v185_v3 = vld [vmem:[#allocation2 + $0x118] sm:$0xff]  ;;  %v186_v7 = vld [vmem:[#allocation2 + $0x120] sm:$0xff]  ;;  %v5700_v8 = vpack.c.bf16 %v187_v63, %v183_v62  ;;  %v184_v9 = vld [vmem:[#allocation2 + $0x110] sm:$0xff] }
  0x46   :  { %3906 = vmatmul.mubr.msk.f32.gmra.mrb[4].mxu1 %vm236_vm0, %v136_v46  ;;  %4033 = vmatpush1.bf16.msra.mxu0 %v5673_v50  ;;  %v189_v4 = vld [vmem:[#allocation2 + $0x138] sm:$0xff]  ;;  %v188_v10 = vld [vmem:[#allocation2 + $0x130] sm:$0xff]  ;;  %v191_v12 = vld [vmem:[#allocation2 + $0x148] sm:$0xff]  ;;  %v5711_v15 = vpack.c.bf16 %v186_v7, %v182_v6  ;;  %v76_v7 = vlaneseq }
  0x47   :  { %4065 = vmatpush1.bf16.msra.mxu1 %v5677_v54  ;;  %343 = vmatprep.mubr.f32.mxu0 %v7390_v0  ;;  %v5704_v11 = vpack.c.bf16 %v189_v4, %v185_v3  ;;  %v195_v13 = vld [vmem:[#allocation2 + $0x168] sm:$0xff]  ;;  %v138_v14 = vld [vmem:[%s7375_s0 + $0x20] sm:$0xff]  ;;  %v193_v16 = vld [vmem:[#allocation2 + $0x158] sm:$0xff]  ;;  %v5715_v19 = vpack.c.bf16 %v188_v10, %v184_v9 }
  0x48   :  { %456 = vmatprep.mubr.f32.mxu1 %v7390_v0  ;;  %4035 = vmatprep.subr.bf16.mxu0 %v5681_v58  ;;  %v197_v18 = vld [vmem:[#allocation2 + $0x178] sm:$0xff]  ;;  %v190_v20 = vld [vmem:[#allocation2 + $0x140] sm:$0xff]  ;;  %v5719_v24 = vpack.c.bf16 %v195_v13, %v191_v12  ;;  %v192_v26 = vld [vmem:[#allocation2 + $0x150] sm:$0xff]  ;;  %v5821_v9 = vshrl.u32 %v76_v7, 7 }
  0x49   :  { %3899 = vmatmul.mubr.msk.f32.gmra.mrb[6].mxu0 %vm236_vm0, %v137_v1  ;;  %4067 = vmatprep.subr.bf16.mxu1 %v5685_v61  ;;  %v194_v23 = vld [vmem:[#allocation2 + $0x160] sm:$0xff]  ;;  %v196_v27 = vld [vmem:[#allocation2 + $0x170] sm:$0xff]  ;;  %v5723_v28 = vpack.c.bf16 %v197_v18, %v193_v16  ;;  %v199_v30 = vld [vmem:[#allocation2 + $0x188] sm:$0xff] }
  0x4a   :  { %3907 = vmatmul.mubr.msk.f32.gmra.mrb[6].mxu1 %vm236_vm0, %v137_v1  ;;  %4037 = vmatpush1.bf16.msra.mxu0 %v5692_v2  ;;  %v203_v31 = vld [vmem:[#allocation2 + $0x1a8] sm:$0xff]  ;;  %v5730_v33 = vpack.c.bf16 %v194_v23, %v190_v20  ;;  %v201_v36 = vld [vmem:[#allocation2 + $0x198] sm:$0xff]  ;;  %v5734_v39 = vpack.c.bf16 %v196_v27, %v192_v26  ;;  %v198_v40 = vld [vmem:[#allocation2 + $0x180] sm:$0xff]  ;;  %7491 = vst [vmem:[#allocation11_spill] sm:$0xff] %v5821_v9  ;;  %v7389_v10 = vsub.s32 0, %v5821_v9  ;;  %v7388_v16 = vsub.s32 2, %v5821_v9 }
  0x4b   :  { %4069 = vmatpush1.bf16.msra.mxu1 %v5696_v5  ;;  %349 = vmatprep.mubr.f32.mxu0 %v7390_v0  ;;  %v139_v32 = vld [vmem:[%s7375_s0 + $0x28] sm:$0xff]  ;;  %v205_v37 = vld [vmem:[#allocation2 + $0x1b8] sm:$0xff]  ;;  %v202_v41 = vld [vmem:[#allocation2 + $0x1a0] sm:$0xff]  ;;  %v5738_v43 = vpack.c.bf16 %v203_v31, %v199_v30  ;;  %v7386_v23 = vsub.s32 3, %v5821_v9 }
  0x4c   :  { %462 = vmatprep.mubr.f32.mxu1 %v7390_v0  ;;  %4039 = vmatprep.subr.bf16.mxu0 %v5700_v8  ;;  %v200_v44 = vld [vmem:[#allocation2 + $0x190] sm:$0xff]  ;;  %v5742_v46 = vpack.c.bf16 %v205_v37, %v201_v36  ;;  %v207_v48 = vld [vmem:[#allocation2 + $0x1c8] sm:$0xff]  ;;  %v5749_v52 = vpack.c.bf16 %v202_v41, %v198_v40  ;;  %v209_v53 = vld [vmem:[#allocation2 + $0x1d8] sm:$0xff]  ;;  %v5853_v40 = vand.u32 127, %v76_v7 }
  0x4d   :  { %3900 = vmatmul.mubr.msk.f32.gmra.mrb[8].mxu0 %vm236_vm0, %v138_v14  ;;  %4071 = vmatprep.subr.bf16.mxu1 %v5704_v11  ;;  %v204_v45 = vld [vmem:[#allocation2 + $0x1b0] sm:$0xff]  ;;  %v211_v49 = vld [vmem:[#allocation2 + $0x1e8] sm:$0xff]  ;;  %v213_v55 = vld [vmem:[#allocation2 + $0x1f8] sm:$0xff] }
  0x4e   :  { %3908 = vmatmul.mubr.msk.f32.gmra.mrb[8].mxu1 %vm236_vm0, %v138_v14  ;;  %4041 = vmatpush1.bf16.msra.mxu0 %v5711_v15  ;;  %v140_v51 = vld [vmem:[%s7375_s0 + $0x30] sm:$0xff]  ;;  %v5753_v56 = vpack.c.bf16 %v204_v45, %v200_v44  ;;  %v206_v57 = vld [vmem:[#allocation2 + $0x1c0] sm:$0xff]  ;;  %v5757_v60 = vpack.c.bf16 %v211_v49, %v207_v48  ;;  %v5761_v1 = vpack.c.bf16 %v213_v55, %v209_v53  ;;  %v141_v3 = vld [vmem:[%s7375_s0 + $0x38] sm:$0xff]  ;;  %v7387_v14 = vsub.s32 1, %v5821_v9 }
  0x4f   :  { %4073 = vmatpush1.bf16.msra.mxu1 %v5715_v19  ;;  %355 = vmatprep.mubr.f32.mxu0 %v7390_v0  ;;  %v210_v59 = vld [vmem:[#allocation2 + $0x1e0] sm:$0xff]  ;;  %v208_v62 = vld [vmem:[#allocation2 + $0x1d0] sm:$0xff]  ;;  %7492 = vst [vmem:[#allocation12_spill] sm:$0xff] %v5853_v40  ;;  %vm129_vm1 = vcmp.lt.s32.totalorder %v5853_v40, 64 }
  0x50   :  { %468 = vmatprep.mubr.f32.mxu1 %v7390_v0  ;;  %4043 = vmatprep.subr.bf16.mxu0 %v5719_v24  ;;  %v212_v63 = vld [vmem:[#allocation2 + $0x1f0] sm:$0xff]  ;;  %v5768_v4 = vpack.c.bf16 %v210_v59, %v206_v57  ;;  %v214_v12 = vld [vmem:[%s7378_s3] sm:$0xf]  ;;  %v78_v59 = vadd.s32 128, %v5853_v40 }
  0x51   :  { %3901 = vmatmul.mubr.msk.f32.gmra.mrb[10].mxu0 %vm236_vm0, %v139_v32  ;;  %4075 = vmatprep.subr.bf16.mxu1 %v5723_v28  ;;  %v5772_v6 = vpack.c.bf16 %v212_v63, %v208_v62  ;;  %v5840_v27 = vrot.slane %v214_v12, %v7389_v10  ;;  %v5844_v30 = vrot.slane %v214_v12, %v7387_v14 }
  0x52   :  { %3909 = vmatmul.mubr.msk.f32.gmra.mrb[10].mxu1 %vm236_vm0, %v139_v32  ;;  %4045 = vmatpush1.bf16.msra.mxu0 %v5730_v33  ;;  %v5848_v32 = vrot.slane %v214_v12, %v7388_v16  ;;  %v5857_v41 = vrot.slane %v214_v12, %v7386_v23 }
  0x53   :  { %4077 = vmatpush1.bf16.msra.mxu1 %v5734_v39  ;;  %361 = vmatprep.mubr.f32.mxu0 %v7390_v0 }
  0x54   :  { %474 = vmatprep.mubr.f32.mxu1 %v7390_v0  ;;  %4047 = vmatprep.subr.bf16.mxu0 %v5738_v43 }
  0x55   :  { %3902 = vmatmul.mubr.msk.f32.gmra.mrb[12].mxu0 %vm236_vm0, %v140_v51  ;;  %4079 = vmatprep.subr.bf16.mxu1 %v5742_v46 }
  0x56   :  { %3910 = vmatmul.mubr.msk.f32.gmra.mrb[12].mxu1 %vm236_vm0, %v140_v51  ;;  %4049 = vmatpush1.bf16.msra.mxu0 %v5749_v52 }
  0x57   :  { %4081 = vmatpush1.bf16.msra.mxu1 %v5753_v56  ;;  %367 = vmatprep.mubr.f32.mxu0 %v7390_v0 }
  0x58   :  { %480 = vmatprep.mubr.f32.mxu1 %v7390_v0  ;;  %4051 = vmatprep.subr.bf16.mxu0 %v5757_v60 }
  0x59   :  { %3903 = vmatmul.mubr.msk.f32.gmra.mrb[14].mxu0 %vm236_vm0, %v141_v3  ;;  %4083 = vmatprep.subr.bf16.mxu1 %v5761_v1 }
  0x5a   :  { %3911 = vmatmul.mubr.msk.f32.gmra.mrb[14].mxu1 %vm236_vm0, %v141_v3  ;;  %4053 = vmatpush1.bf16.msra.mxu0 %v5768_v4  ;;  %v79_v3 = vadd.s32 256, %v5853_v40 }
  0x5b   :  { %4085 = vmatpush1.bf16.msra.mxu1 %v5772_v6  ;;  %583 = vmatprep.mubr.f32.mxu0 %v7390_v0 }
  0x5c   :  { %654 = vmatprep.mubr.f32.mxu1 %v7390_v0  ;;  %4087 = vmatprep.subr.bf16.mxu0 %v5634_v17  ;;  %v99_v16 = vand.u32 127, %v79_v3 }
  0x5d   :  { %584 = vmatmul.mubr.f32.vlgmr.msra.gmra.mrb[16].mxu0 %v7390_v0  ;;  %4119 = vmatprep.subr.bf16.mxu1 %v5636_v21 }
  0x5e   :  { %655 = vmatmul.mubr.f32.vlgmr.msra.gmra.mrb[16].mxu1 %v7390_v0  ;;  %4089 = vmatpush1.bf16.msra.mxu0 %v5638_v22  ;;  %vm5897_vm3 = vcmp.lt.s32.totalorder %v99_v16, 64 }
  0x5f   :  { %4121 = vmatpush1.bf16.msra.mxu1 %v5641_v25  ;;  %4091 = vmatprep.subr.bf16.mxu0 %v5645_v29 }
  0x60   :  { %4123 = vmatprep.subr.bf16.mxu1 %v5652_v34  ;;  %753 = vmatprep.mubr.f32.mxu0 %v7390_v0 }
  0x61   :  { %824 = vmatprep.mubr.f32.mxu1 %v7390_v0 }
  0x62   :  { %4093 = vmatpush1.bf16.msra.mxu0 %v5654_v35 }
  0x63   :  { %4125 = vmatpush1.bf16.msra.mxu1 %v5658_v38  ;;  %4095 = vmatprep.subr.bf16.mxu0 %v5662_v42 }
  0x64   :  { %4127 = vmatprep.subr.bf16.mxu1 %v5669_v47 }
  0x66   :  { %4097 = vmatpush1.bf16.msra.mxu0 %v5673_v50 }
  0x67   :  { %4129 = vmatpush1.bf16.msra.mxu1 %v5677_v54  ;;  %4099 = vmatprep.subr.bf16.mxu0 %v5681_v58 }
  0x68   :  { %4131 = vmatprep.subr.bf16.mxu1 %v5685_v61 }
  0x6a   :  { %4101 = vmatpush1.bf16.msra.mxu0 %v5692_v2 }
  0x6b   :  { %4133 = vmatpush1.bf16.msra.mxu1 %v5696_v5  ;;  %4103 = vmatprep.subr.bf16.mxu0 %v5700_v8 }
  0x6c   :  { %4135 = vmatprep.subr.bf16.mxu1 %v5704_v11 }
  0x6e   :  { %4105 = vmatpush1.bf16.msra.mxu0 %v5711_v15 }
  0x6f   :  { %4137 = vmatpush1.bf16.msra.mxu1 %v5715_v19  ;;  %4107 = vmatprep.subr.bf16.mxu0 %v5719_v24 }
  0x70   :  { %4139 = vmatprep.subr.bf16.mxu1 %v5723_v28 }
  0x72   :  { %4109 = vmatpush1.bf16.msra.mxu0 %v5730_v33 }
  0x73   :  { %4141 = vmatpush1.bf16.msra.mxu1 %v5734_v39  ;;  %4111 = vmatprep.subr.bf16.mxu0 %v5738_v43 }
  0x74   :  { %4143 = vmatprep.subr.bf16.mxu1 %v5742_v46 }
  0x76   :  { %4113 = vmatpush1.bf16.msra.mxu0 %v5749_v52 }
  0x77   :  { %4145 = vmatpush1.bf16.msra.mxu1 %v5753_v56  ;;  %4115 = vmatprep.subr.bf16.mxu0 %v5757_v60 }
  0x78   :  { %4147 = vmatprep.subr.bf16.mxu1 %v5761_v1 }
  0x7a   :  { %4117 = vmatpush1.bf16.msra.mxu0 %v5768_v4 }
  0x7b   :  { %4149 = vmatpush1.bf16.msra.mxu1 %v5772_v6  ;;  %4151 = vmatprep.subr.bf16.mxu0 %v5634_v17 }
  0x7c   :  { %4183 = vmatprep.subr.bf16.mxu1 %v5636_v21 }
 0x110   :  { %v5827_v13 = vpop.f32.mrb[0].mxu0 }
 0x111   :  { %v5831_v18 = vpop.f32.mrb[1].mxu0  ;;  %v5833_v20 = vpop.f32.mrb[0].mxu1 }
 0x112   :  { %v5836_v26 = vpop.f32.mrb[1].mxu1 }
 0x114   :  { %v333_v31 = vpop.f32.mrb[2].mxu0 }
 0x115   :  { %v5851_v36 = vadd.f32 %v333_v31, %v5840_v27  ;;  %v335_v37 = vpop.f32.mrb[3].mxu0  ;;  %v446_v44 = vpop.f32.mrb[2].mxu1  ;;  %v80_v31 = vadd.s32 384, %v5853_v40 }
 0x116   :  { %v5860_v45 = vadd.f32 %v335_v37, %v5844_v30  ;;  %v5863_v48 = vadd.f32 %v446_v44, %v5848_v32  ;;  %v448_v49 = vpop.f32.mrb[3].mxu1 }
 0x117   :  { %v5866_v51 = vadd.f32 %v448_v49, %v5857_v41  ;;  %v106_v0 = vand.u32 127, %v80_v31 }
 0x118   :  { %7493 = vst [vmem:[#allocation13_spill] sm:$0xff] %v5860_v45  ;;  %7494 = vst [vmem:[#allocation14_spill] sm:$0xff] %v5863_v48  ;;  %v339_v53 = vpop.f32.mrb[4].mxu0 }
 0x119   :  { %7495 = vst [vmem:[#allocation15_spill] sm:$0xff] %v5866_v51  ;;  %v340_v55 = vadd.f32 %v339_v53, %v5840_v27  ;;  %v341_v57 = vpop.f32.mrb[5].mxu0  ;;  %v452_v62 = vpop.f32.mrb[4].mxu1  ;;  %v92_v53 = vand.u32 127, %v78_v59  ;;  %vm5907_vm4 = vcmp.lt.s32.totalorder %v106_v0, 64 }
 0x11a   :  { %v5871_v63 = vadd.f32 %v341_v57, %v5844_v30  ;;  %v5875_v7 = vadd.f32 %v452_v62, %v5848_v32  ;;  %v454_v12 = vpop.f32.mrb[5].mxu1 }
 0x11b   :  { %v5879_v37 = vadd.f32 %v454_v12, %v5857_v41  ;;  %vm5892_vm2 = vcmp.lt.s32.totalorder %v92_v53, 64 }
 0x11c   :  { %7496 = vst [vmem:[#allocation16_spill] sm:$0xff] %v5871_v63  ;;  %v345_v44 = vpop.f32.mrb[6].mxu0 }
 0x11d   :  { %7497 = vst [vmem:[#allocation17_spill] sm:$0xff] %v5879_v37  ;;  %v346_v49 = vadd.f32 %v345_v44, %v5840_v27  ;;  %v347_v23 = vpop.f32.mrb[7].mxu0  ;;  %v458_v14 = vpop.f32.mrb[6].mxu1 }
 0x11e   :  { %v5883_v57 = vadd.f32 %v347_v23, %v5844_v30  ;;  %v5886_v10 = vadd.f32 %v458_v14, %v5848_v32  ;;  %v460_v62 = vpop.f32.mrb[7].mxu1 }
 0x11f   :  { %v5889_v9 = vadd.f32 %v460_v62, %v5857_v41 }
 0x120   :  { %7498 = vst [vmem:[#allocation18_spill] sm:$0xff] %v5883_v57  ;;  %7499 = vst [vmem:[#allocation19_spill] sm:$0xff] %v5886_v10  ;;  %v351_v12 = vpop.f32.mrb[8].mxu0 }
 0x121   :  { %7500 = vst [vmem:[#allocation20_spill] sm:$0xff] %v5889_v9  ;;  %v352_v59 = vadd.f32 %v351_v12, %v5840_v27  ;;  %v353_v3 = vpop.f32.mrb[9].mxu0  ;;  %v464_v23 = vpop.f32.mrb[8].mxu1 }
 0x122   :  { %v5902_v14 = vadd.f32 %v353_v3, %v5844_v30  ;;  %v5905_v31 = vadd.f32 %v464_v23, %v5848_v32  ;;  %v466_v62 = vpop.f32.mrb[9].mxu1 }
 0x123   :  { %v5912_v17 = vadd.f32 %v466_v62, %v5857_v41  ;;  %v5916_v16 = vsel %vm129_vm1, %v346_v49, %v352_v59  ;;  %v5920_v12 = vsel %vm129_vm1, %v352_v59, %v346_v49 }
 0x124   :  { %7505 = vst [vmem:[#allocation21_spill] sm:$0xff] %v5902_v14  ;;  %7506 = vst [vmem:[#allocation22_spill] sm:$0xff] %v5905_v31  ;;  %v357_v3 = vpop.f32.mrb[10].mxu0 }
 0x125   :  { %7509 = vst [vmem:[#allocation23_spill] sm:$0xff] %v5912_v17  ;;  %7510 = vst [vmem:[#allocation24_spill] sm:$0xff] %v5916_v16  ;;  %v358_v59 = vadd.f32 %v357_v3, %v5840_v27  ;;  %v470_v16 = vpop.f32.mrb[10].mxu1 }
 0x126   :  { %7511 = vst [vmem:[#allocation25_spill] sm:$0xff] %v5920_v12  ;;  %v359_v12 = vpop.f32.mrb[11].mxu0  ;;  %v5951_v31 = vadd.f32 %v470_v16, %v5848_v32  ;;  %v472_v49 = vpop.f32.mrb[11].mxu1 }
 0x127   :  { %v5948_v62 = vadd.f32 %v359_v12, %v5844_v30  ;;  %v5954_v3 = vadd.f32 %v472_v49, %v5857_v41  ;;  %v5958_v14 = vsel %vm129_vm1, %v340_v55, %v358_v59  ;;  %v5962_v0 = vsel %vm129_vm1, %v358_v59, %v340_v55 }
 0x128   :  { %7513 = vst [vmem:[#allocation27_spill] sm:$0xff] %v5951_v31  ;;  %7515 = vst [vmem:[#allocation29_spill] sm:$0xff] %v5962_v0  ;;  %v363_v57 = vpop.f32.mrb[12].mxu0 }
 0x129   :  { %7512 = vst [vmem:[#allocation26_spill] sm:$0xff] %v5948_v62  ;;  %7514 = vst [vmem:[#allocation28_spill] sm:$0xff] %v5954_v3  ;;  %v364_v59 = vadd.f32 %v363_v57, %v5840_v27  ;;  %v476_v23 = vpop.f32.mrb[12].mxu1  ;;  %v365_v0 = vpop.f32.mrb[13].mxu0  ;;  %v6051_v3 = vadd.f32 %v5836_v26, %v5857_v41 }
 0x12a   :  { %v5990_v49 = vadd.f32 %v476_v23, %v5848_v32  ;;  %v5993_v17 = vadd.f32 %v365_v0, %v5844_v30  ;;  %v478_v55 = vpop.f32.mrb[13].mxu1 }
 0x12b   :  { %v5996_v57 = vadd.f32 %v478_v55, %v5857_v41  ;;  %v6001_v9 = vsel %vm129_vm1, %v5851_v36, %v364_v59  ;;  %v6006_v12 = vsel %vm129_vm1, %v364_v59, %v5851_v36  ;;  %v328_v59 = vadd.f32 %v5827_v13, %v5840_v27  ;;  %7524 = vst [vmem:[#allocation38_spill] sm:$0xff] %v6051_v3 }
 0x12c   :  { %7516 = vst [vmem:[#allocation30_spill] sm:$0xff] %v5990_v49  ;;  %7517 = vst [vmem:[#allocation31_spill] sm:$0xff] %v5993_v17  ;;  %v369_v16 = vpop.f32.mrb[14].mxu0  ;;  %v6037_v36 = vadd.f32 %v5831_v18, %v5844_v30  ;;  %v6041_v13 = vadd.f32 %v5833_v20, %v5848_v32 }
 0x12d   :  { %7518 = vst [vmem:[#allocation32_spill] sm:$0xff] %v5996_v57  ;;  %7519 = vst [vmem:[#allocation33_spill] sm:$0xff] %v6006_v12  ;;  %v370_v0 = vadd.f32 %v369_v16, %v5840_v27  ;;  %v482_v12 = vpop.f32.mrb[14].mxu1  ;;  %v371_v10 = vpop.f32.mrb[15].mxu0 }
 0x12e   :  { %7520 = vst [vmem:[#allocation34_spill] sm:$0xff] %v6037_v36  ;;  %7521 = vst [vmem:[#allocation35_spill] sm:$0xff] %v6041_v13  ;;  %v6044_v27 = vadd.f32 %v482_v12, %v5848_v32  ;;  %v6047_v16 = vadd.f32 %v371_v10, %v5844_v30  ;;  %v484_v23 = vpop.f32.mrb[15].mxu1 }
 0x12f   :  { %v6054_v55 = vadd.f32 %v484_v23, %v5857_v41  ;;  %v487_v18 = vsel %vm129_vm1, %v328_v59, %v370_v0  ;;  %v6060_v20 = vsel %vm129_vm1, %v370_v0, %v328_v59 }
 0x130   :  { %7522 = vst [vmem:[#allocation36_spill] sm:$0xff] %v6044_v27  ;;  %7523 = vst [vmem:[#allocation37_spill] sm:$0xff] %v6047_v16  ;;  %v585_v32 = vpop.f32.mrb[16].mxu0  ;;  %v489_v10 = vsel %vm5897_vm3, %v6041_v13, %v6044_v27  ;;  %v488_v26 = vsel %vm5892_vm2, %v6037_v36, %v6047_v16 }
 0x131   :  { %7525 = vst [vmem:[#allocation39_spill] sm:$0xff] %v6054_v55  ;;  %7526 = vst [vmem:[#allocation40_spill] sm:$0xff] %v6060_v20  ;;  %v661_v12 = vadd.f32 %v585_v32, %v487_v18  ;;  %v656_v0 = vpop.f32.mrb[16].mxu1  ;;  %v587_v23 = vpop.f32.mrb[17].mxu0  ;;  %v490_v59 = vsel %vm5907_vm4, %v6051_v3, %v6054_v55 }
 0x132   :  { %v663_v20 = vadd.f32 %v656_v0, %v489_v10  ;;  %v662_v30 = vadd.f32 %v587_v23, %v488_v26  ;;  %v658_v13 = vpop.f32.mrb[17].mxu1 }
 0x133   :  { %v3912_v27 = vmul.f32 -1.442695, %v661_v12  ;;  %v664_v37 = vadd.f32 %v658_v13, %v490_v59 }
 0x134   :  { %v3913_v62 = vmul.f32 -1.442695, %v662_v30  ;;  %v7531_v30 = vsel %vm5897_vm3, %v5863_v48, %v5990_v49 }
 0x135   :  { %5145 = vpow2.f32 %v3912_v27  ;;  %v3914_v18 = vmul.f32 -1.442695, %v664_v37 }
 0x136   :  { %5147 = vpow2.f32 %v3913_v62 }
 0x137   :  { %5149 = vpow2.f32 %v3914_v18  ;;  %v7532_v18 = vsel %vm5892_vm2, %v5860_v45, %v5993_v17 }
 0x138   :  { %5151 = vtanh.f32 %v663_v20 }
 0x13f   :  { %v5146_v32 = vpop.eup %5145 }
 0x140   :  { %v5148_v41 = vpop.eup %5147  ;;  %v668_v36 = vadd.f32 1.0, %v5146_v32 }
 0x141   :  { %v674_v16 = vadd.f32 1.0, %v5148_v41  ;;  %v5150_v63 = vpop.eup %5149 }
 0x142   :  { %5153 = vrcp.f32 %v668_v36  ;;  %v5152_v31 = vpop.eup %5151  ;;  %v681_v0 = vadd.f32 1.0, %v5150_v63  ;;  %v7529_v63 = vld [vmem:[#allocation9_spill] sm:$0xff] }
 0x143   :  { %5155 = vrcp.f32 %v674_v16 }
 0x144   :  { %5157 = vrcp.f32 %v681_v0 }
 0x14c   :  { %v5154_v40 = vpop.eup %5153 }
 0x14d   :  { %v5156_v10 = vpop.eup %5155  ;;  %v685_v26 = vmul.f32 %v5154_v40, %v5152_v31  ;;  %v7528_v40 = vmov 0.0   ;;  %v7530_v31 = vld [vmem:[#allocation10_spill] sm:$0xff] }
 0x14e   :  { %v684_v12 = vmul.f32 0.0, %v5156_v10  ;;  %v5158_v37 = vpop.eup %5157  ;;  %v7533_v10 = vsel %vm5907_vm4, %v5866_v51, %v5996_v57 }
 0x150   :  { %v6086_v13 = vadd.f32 %v685_v26, %v684_v12 }
 0x152   :  { %5159 = vtanh.f32 %v6086_v13 }
 0x15c   :  { %v5160_v62 = vpop.eup %5159 }
 0x15d   :  { %v6089_v27 = vmul.f32 %v5160_v62, %v5158_v37 }
 0x15f   :  { %7527 = vst [vmem:[#allocation41_spill] sm:$0xff] %v6089_v27  ;;  %754 = vmatmul.mubr.f32.vlgmr.msra.gmra.mrb[18].mxu0 %v6089_v27  ;;  %825 = vmatmul.mubr.f32.vlgmr.msra.gmra.mrb[18].mxu1 %v6089_v27 }
 0x160   :  { %4153 = vmatpush1.bf16.msra.mxu0 %v5638_v22  ;;  %4185 = vmatpush1.bf16.msra.mxu1 %v5641_v25 }
 0x161   :  { %4155 = vmatprep.subr.bf16.mxu0 %v5645_v29  ;;  %4187 = vmatprep.subr.bf16.mxu1 %v5652_v34 }
 0x162   :  { %923 = vmatprep.mubr.f32.mxu0 %v7528_v40  ;;  %994 = vmatprep.mubr.f32.mxu1 %v7528_v40 }
 0x164   :  { %4157 = vmatpush1.bf16.msra.mxu0 %v5654_v35  ;;  %4189 = vmatpush1.bf16.msra.mxu1 %v5658_v38 }
 0x165   :  { %4159 = vmatprep.subr.bf16.mxu0 %v5662_v42  ;;  %4191 = vmatprep.subr.bf16.mxu1 %v5669_v47 }
 0x168   :  { %4161 = vmatpush1.bf16.msra.mxu0 %v5673_v50  ;;  %4193 = vmatpush1.bf16.msra.mxu1 %v5677_v54 }
 0x169   :  { %4163 = vmatprep.subr.bf16.mxu0 %v5681_v58  ;;  %4195 = vmatprep.subr.bf16.mxu1 %v5685_v61 }
 0x16c   :  { %4165 = vmatpush1.bf16.msra.mxu0 %v5692_v2  ;;  %4197 = vmatpush1.bf16.msra.mxu1 %v5696_v5 }
 0x16d   :  { %4167 = vmatprep.subr.bf16.mxu0 %v5700_v8  ;;  %4199 = vmatprep.subr.bf16.mxu1 %v5704_v11 }
 0x170   :  { %4169 = vmatpush1.bf16.msra.mxu0 %v5711_v15  ;;  %4201 = vmatpush1.bf16.msra.mxu1 %v5715_v19 }
 0x171   :  { %4171 = vmatprep.subr.bf16.mxu0 %v5719_v24  ;;  %4203 = vmatprep.subr.bf16.mxu1 %v5723_v28 }
 0x174   :  { %4173 = vmatpush1.bf16.msra.mxu0 %v5730_v33  ;;  %4205 = vmatpush1.bf16.msra.mxu1 %v5734_v39 }
 0x175   :  { %4175 = vmatprep.subr.bf16.mxu0 %v5738_v43  ;;  %4207 = vmatprep.subr.bf16.mxu1 %v5742_v46 }
 0x178   :  { %4177 = vmatpush1.bf16.msra.mxu0 %v5749_v52  ;;  %4209 = vmatpush1.bf16.msra.mxu1 %v5753_v56 }
 0x179   :  { %4179 = vmatprep.subr.bf16.mxu0 %v5757_v60  ;;  %4211 = vmatprep.subr.bf16.mxu1 %v5761_v1 }
 0x17c   :  { %4181 = vmatpush1.bf16.msra.mxu0 %v5768_v4  ;;  %4213 = vmatpush1.bf16.msra.mxu1 %v5772_v6 }
 0x17d   :  { %4215 = vmatprep.subr.bf16.mxu0 %v7529_v63  ;;  %4247 = vmatprep.subr.bf16.mxu1 %v7530_v31 }
 0x232   :  { %v755_v36 = vpop.f32.mrb[18].mxu0  ;;  %v826_v16 = vpop.f32.mrb[18].mxu1 }
 0x233   :  { %v831_v20 = vadd.f32 %v755_v36, %v6001_v9  ;;  %v833_v41 = vadd.f32 %v826_v16, %v7531_v30  ;;  %v757_v23 = vpop.f32.mrb[19].mxu0  ;;  %v828_v59 = vpop.f32.mrb[19].mxu1 }
 0x234   :  { %v832_v32 = vadd.f32 %v757_v23, %v7532_v18  ;;  %v834_v9 = vadd.f32 %v828_v59, %v7533_v10 }
 0x235   :  { %v3915_v26 = vmul.f32 -1.442695, %v831_v20 }
 0x236   :  { %v3916_v0 = vmul.f32 -1.442695, %v832_v32  ;;  %v3917_v12 = vmul.f32 -1.442695, %v834_v9 }
 0x237   :  { %5161 = vpow2.f32 %v3915_v26 }
 0x238   :  { %5163 = vpow2.f32 %v3916_v0 }
 0x239   :  { %5165 = vpow2.f32 %v3917_v12 }
 0x23a   :  { %5167 = vtanh.f32 %v833_v41 }
 0x241   :  { %v5162_v37 = vpop.eup %5161 }
 0x242   :  { %v5164_v62 = vpop.eup %5163  ;;  %v838_v36 = vadd.f32 1.0, %v5162_v37  ;;  %v7537_v37 = vld [vmem:[#allocation16_spill] sm:$0xff] }
 0x243   :  { %v844_v16 = vadd.f32 1.0, %v5164_v62  ;;  %v5166_v30 = vpop.eup %5165  ;;  %v7538_v62 = vld [vmem:[#allocation26_spill] sm:$0xff] }
 0x244   :  { %5169 = vrcp.f32 %v838_v36  ;;  %v5168_v23 = vpop.eup %5167  ;;  %v851_v55 = vadd.f32 1.0, %v5166_v30  ;;  %v7539_v36 = vsel %vm5892_vm2, %v7537_v37, %v7538_v62  ;;  %v7540_v30 = vld [vmem:[#allocation17_spill] sm:$0xff] }
 0x245   :  { %5171 = vrcp.f32 %v844_v16 }
 0x246   :  { %5173 = vrcp.f32 %v851_v55 }
 0x24e   :  { %v5170_v18 = vpop.eup %5169 }
 0x24f   :  { %v5172_v27 = vpop.eup %5171  ;;  %v855_v3 = vmul.f32 %v5170_v18, %v5168_v23  ;;  %v7541_v23 = vld [vmem:[#allocation28_spill] sm:$0xff] }
 0x250   :  { %v854_v20 = vmul.f32 %v5172_v27, %v6086_v13  ;;  %v5174_v32 = vpop.eup %5173  ;;  %v7535_v27 = vld [vmem:[#allocation27_spill] sm:$0xff]  ;;  %v7542_v18 = vsel %vm5907_vm4, %v7540_v30, %v7541_v23 }
 0x251   :  { %v7536_v41 = vsel %vm5897_vm3, %v5875_v7, %v7535_v27 }
 0x252   :  { %v6144_v59 = vadd.f32 %v855_v3, %v854_v20 }
 0x254   :  { %5175 = vtanh.f32 %v6144_v59 }
 0x25e   :  { %v5176_v10 = vpop.eup %5175 }
 0x25f   :  { %v6147_v9 = vmul.f32 %v5176_v10, %v5174_v32 }
 0x261   :  { %7534 = vst [vmem:[#allocation9_spill] sm:$0xff] %v6147_v9  ;;  %924 = vmatmul.mubr.f32.vlgmr.msra.gmra.mrb[20].mxu0 %v6147_v9  ;;  %995 = vmatmul.mubr.f32.vlgmr.msra.gmra.mrb[20].mxu1 %v6147_v9 }
 0x262   :  { %4217 = vmatpush1.bf16.msra.mxu0 %v5638_v22  ;;  %4249 = vmatpush1.bf16.msra.mxu1 %v5641_v25 }
 0x263   :  { %4219 = vmatprep.subr.bf16.mxu0 %v5645_v29  ;;  %4251 = vmatprep.subr.bf16.mxu1 %v5652_v34 }
 0x264   :  { %1093 = vmatprep.mubr.f32.mxu0 %v7528_v40  ;;  %1164 = vmatprep.mubr.f32.mxu1 %v7528_v40 }
 0x266   :  { %4221 = vmatpush1.bf16.msra.mxu0 %v5654_v35  ;;  %4253 = vmatpush1.bf16.msra.mxu1 %v5658_v38 }
 0x267   :  { %4223 = vmatprep.subr.bf16.mxu0 %v5662_v42  ;;  %4255 = vmatprep.subr.bf16.mxu1 %v5669_v47 }
 0x26a   :  { %4225 = vmatpush1.bf16.msra.mxu0 %v5673_v50  ;;  %4257 = vmatpush1.bf16.msra.mxu1 %v5677_v54 }
 0x26b   :  { %4227 = vmatprep.subr.bf16.mxu0 %v5681_v58  ;;  %4259 = vmatprep.subr.bf16.mxu1 %v5685_v61 }
 0x26e   :  { %4229 = vmatpush1.bf16.msra.mxu0 %v5692_v2  ;;  %4261 = vmatpush1.bf16.msra.mxu1 %v5696_v5 }
 0x26f   :  { %4231 = vmatprep.subr.bf16.mxu0 %v5700_v8  ;;  %4263 = vmatprep.subr.bf16.mxu1 %v5704_v11 }
 0x272   :  { %4233 = vmatpush1.bf16.msra.mxu0 %v5711_v15  ;;  %4265 = vmatpush1.bf16.msra.mxu1 %v5715_v19 }
 0x273   :  { %4235 = vmatprep.subr.bf16.mxu0 %v5719_v24  ;;  %4267 = vmatprep.subr.bf16.mxu1 %v5723_v28 }
 0x276   :  { %4237 = vmatpush1.bf16.msra.mxu0 %v5730_v33  ;;  %4269 = vmatpush1.bf16.msra.mxu1 %v5734_v39 }
 0x277   :  { %4239 = vmatprep.subr.bf16.mxu0 %v5738_v43  ;;  %4271 = vmatprep.subr.bf16.mxu1 %v5742_v46 }
 0x27a   :  { %4241 = vmatpush1.bf16.msra.mxu0 %v5749_v52  ;;  %4273 = vmatpush1.bf16.msra.mxu1 %v5753_v56 }
 0x27b   :  { %4243 = vmatprep.subr.bf16.mxu0 %v5757_v60  ;;  %4275 = vmatprep.subr.bf16.mxu1 %v5761_v1 }
 0x27e   :  { %4245 = vmatpush1.bf16.msra.mxu0 %v5768_v4  ;;  %4277 = vmatpush1.bf16.msra.mxu1 %v5772_v6 }
 0x27f   :  { %4279 = vmatprep.subr.bf16.mxu0 %v7529_v63  ;;  %4311 = vmatprep.subr.bf16.mxu1 %v7530_v31 }
 0x334   :  { %v925_v3 = vpop.f32.mrb[20].mxu0  ;;  %v996_v55 = vpop.f32.mrb[20].mxu1 }
 0x335   :  { %v1001_v13 = vadd.f32 %v925_v3, %v5958_v14  ;;  %v1003_v26 = vadd.f32 %v996_v55, %v7536_v41  ;;  %v927_v0 = vpop.f32.mrb[21].mxu0  ;;  %v998_v12 = vpop.f32.mrb[21].mxu1 }
 0x336   :  { %v1002_v16 = vadd.f32 %v927_v0, %v7539_v36  ;;  %v1004_v14 = vadd.f32 %v998_v12, %v7542_v18 }
 0x337   :  { %v3918_v20 = vmul.f32 -1.442695, %v1001_v13 }
 0x338   :  { %v3919_v32 = vmul.f32 -1.442695, %v1002_v16  ;;  %v3920_v10 = vmul.f32 -1.442695, %v1004_v14 }
 0x339   :  { %5177 = vpow2.f32 %v3918_v20 }
 0x33a   :  { %5179 = vpow2.f32 %v3919_v32 }
 0x33b   :  { %5181 = vpow2.f32 %v3920_v10 }
 0x33c   :  { %5183 = vtanh.f32 %v1003_v26 }
 0x343   :  { %v5178_v3 = vpop.eup %5177 }
 0x344   :  { %v5180_v55 = vpop.eup %5179  ;;  %v1008_v41 = vadd.f32 1.0, %v5178_v3  ;;  %v7548_v3 = vld [vmem:[#allocation18_spill] sm:$0xff] }
 0x345   :  { %v1014_v9 = vadd.f32 1.0, %v5180_v55  ;;  %v5182_v0 = vpop.eup %5181  ;;  %v7549_v55 = vld [vmem:[#allocation21_spill] sm:$0xff] }
 0x346   :  { %5185 = vrcp.f32 %v1008_v41  ;;  %v5184_v36 = vpop.eup %5183  ;;  %v1021_v17 = vadd.f32 1.0, %v5182_v0  ;;  %v7550_v41 = vsel %vm5892_vm2, %v7548_v3, %v7549_v55 }
 0x347   :  { %5187 = vrcp.f32 %v1014_v9  ;;  %v7546_v9 = vld [vmem:[#allocation22_spill] sm:$0xff] }
 0x348   :  { %5189 = vrcp.f32 %v1021_v17 }
 0x350   :  { %v5186_v51 = vpop.eup %5185 }
 0x351   :  { %v5188_v57 = vpop.eup %5187  ;;  %v1025_v45 = vmul.f32 %v5186_v51, %v5184_v36  ;;  %v7544_v51 = vld [vmem:[#allocation24_spill] sm:$0xff] }
 0x352   :  { %v1024_v13 = vmul.f32 %v5188_v57, %v6144_v59  ;;  %v5190_v16 = vpop.eup %5189  ;;  %v7545_v59 = vld [vmem:[#allocation19_spill] sm:$0xff]  ;;  %v7551_v36 = vld [vmem:[#allocation20_spill] sm:$0xff] }
 0x353   :  { %v7547_v26 = vsel %vm5897_vm3, %v7545_v59, %v7546_v9 }
 0x354   :  { %v6202_v12 = vadd.f32 %v1025_v45, %v1024_v13  ;;  %v7552_v13 = vld [vmem:[#allocation23_spill] sm:$0xff] }
 0x356   :  { %5191 = vtanh.f32 %v6202_v12 }
 0x360   :  { %v5192_v18 = vpop.eup %5191 }
 0x361   :  { %v6205_v14 = vmul.f32 %v5192_v18, %v5190_v16  ;;  %v7553_v16 = vsel %vm5907_vm4, %v7551_v36, %v7552_v13 }
 0x363   :  { %7543 = vst [vmem:[#allocation10_spill] sm:$0xff] %v6205_v14  ;;  %1094 = vmatmul.mubr.f32.vlgmr.msra.gmra.mrb[22].mxu0 %v6205_v14  ;;  %1165 = vmatmul.mubr.f32.vlgmr.msra.gmra.mrb[22].mxu1 %v6205_v14 }
 0x364   :  { %4281 = vmatpush1.bf16.msra.mxu0 %v5638_v22  ;;  %4313 = vmatpush1.bf16.msra.mxu1 %v5641_v25 }
 0x365   :  { %4283 = vmatprep.subr.bf16.mxu0 %v5645_v29  ;;  %4315 = vmatprep.subr.bf16.mxu1 %v5652_v34 }
 0x366   :  { %1263 = vmatprep.mubr.f32.mxu0 %v7528_v40  ;;  %1334 = vmatprep.mubr.f32.mxu1 %v7528_v40 }
 0x368   :  { %4285 = vmatpush1.bf16.msra.mxu0 %v5654_v35  ;;  %4317 = vmatpush1.bf16.msra.mxu1 %v5658_v38 }
 0x369   :  { %4287 = vmatprep.subr.bf16.mxu0 %v5662_v42  ;;  %4319 = vmatprep.subr.bf16.mxu1 %v5669_v47 }
 0x36c   :  { %4289 = vmatpush1.bf16.msra.mxu0 %v5673_v50  ;;  %4321 = vmatpush1.bf16.msra.mxu1 %v5677_v54 }
 0x36d   :  { %4291 = vmatprep.subr.bf16.mxu0 %v5681_v58  ;;  %4323 = vmatprep.subr.bf16.mxu1 %v5685_v61 }
 0x370   :  { %4293 = vmatpush1.bf16.msra.mxu0 %v5692_v2  ;;  %4325 = vmatpush1.bf16.msra.mxu1 %v5696_v5 }
 0x371   :  { %4295 = vmatprep.subr.bf16.mxu0 %v5700_v8  ;;  %4327 = vmatprep.subr.bf16.mxu1 %v5704_v11 }
 0x374   :  { %4297 = vmatpush1.bf16.msra.mxu0 %v5711_v15  ;;  %4329 = vmatpush1.bf16.msra.mxu1 %v5715_v19 }
 0x375   :  { %4299 = vmatprep.subr.bf16.mxu0 %v5719_v24  ;;  %4331 = vmatprep.subr.bf16.mxu1 %v5723_v28 }
 0x378   :  { %4301 = vmatpush1.bf16.msra.mxu0 %v5730_v33  ;;  %4333 = vmatpush1.bf16.msra.mxu1 %v5734_v39 }
 0x379   :  { %4303 = vmatprep.subr.bf16.mxu0 %v5738_v43  ;;  %4335 = vmatprep.subr.bf16.mxu1 %v5742_v46 }
 0x37c   :  { %4305 = vmatpush1.bf16.msra.mxu0 %v5749_v52  ;;  %4337 = vmatpush1.bf16.msra.mxu1 %v5753_v56 }
 0x37d   :  { %4307 = vmatprep.subr.bf16.mxu0 %v5757_v60  ;;  %4339 = vmatprep.subr.bf16.mxu1 %v5761_v1 }
 0x380   :  { %4309 = vmatpush1.bf16.msra.mxu0 %v5768_v4  ;;  %4341 = vmatpush1.bf16.msra.mxu1 %v5772_v6 }
 0x381   :  { %4343 = vmatprep.subr.bf16.mxu0 %v7529_v63  ;;  %4375 = vmatprep.subr.bf16.mxu1 %v7530_v31 }
 0x436   :  { %v1095_v17 = vpop.f32.mrb[22].mxu0  ;;  %v1166_v45 = vpop.f32.mrb[22].mxu1 }
 0x437   :  { %v1171_v57 = vadd.f32 %v1095_v17, %v7544_v51  ;;  %v1173_v20 = vadd.f32 %v1166_v45, %v7547_v26  ;;  %v1097_v32 = vpop.f32.mrb[23].mxu0  ;;  %v1168_v10 = vpop.f32.mrb[23].mxu1 }
 0x438   :  { %v1172_v0 = vadd.f32 %v1097_v32, %v7550_v41  ;;  %v1174_v18 = vadd.f32 %v1168_v10, %v7553_v16 }
 0x439   :  { %v3921_v17 = vmul.f32 -1.442695, %v1171_v57 }
 0x43a   :  { %v3922_v51 = vmul.f32 -1.442695, %v1172_v0  ;;  %v3923_v14 = vmul.f32 -1.442695, %v1174_v18  ;;  %v7556_v18 = vsel %vm5892_vm2, %v7549_v55, %v7548_v3 }
 0x43b   :  { %5193 = vpow2.f32 %v3921_v17 }
 0x43c   :  { %5195 = vpow2.f32 %v3922_v51  ;;  %v7557_v51 = vsel %vm5907_vm4, %v7552_v13, %v7551_v36 }
 0x43d   :  { %5197 = vpow2.f32 %v3923_v14 }
 0x43e   :  { %5199 = vtanh.f32 %v1173_v20 }
 0x445   :  { %v5194_v45 = vpop.eup %5193 }
 0x446   :  { %v5196_v26 = vpop.eup %5195  ;;  %v1178_v48 = vadd.f32 1.0, %v5194_v45 }
 0x447   :  { %v1184_v49 = vadd.f32 1.0, %v5196_v26  ;;  %v5198_v32 = vpop.eup %5197 }
 0x448   :  { %5201 = vrcp.f32 %v1178_v48  ;;  %v5200_v41 = vpop.eup %5199  ;;  %v1191_v62 = vadd.f32 1.0, %v5198_v32 }
 0x449   :  { %5203 = vrcp.f32 %v1184_v49 }
 0x44a   :  { %5205 = vrcp.f32 %v1191_v62 }
 0x452   :  { %v5202_v30 = vpop.eup %5201 }
 0x453   :  { %v5204_v23 = vpop.eup %5203  ;;  %v1195_v37 = vmul.f32 %v5202_v30, %v5200_v41  ;;  %v7555_v30 = vsel %vm5897_vm3, %v7546_v9, %v7545_v59 }
 0x454   :  { %v1194_v57 = vmul.f32 %v5204_v23, %v6202_v12  ;;  %v5206_v0 = vpop.eup %5205 }
 0x456   :  { %v6260_v10 = vadd.f32 %v1195_v37, %v1194_v57  ;;  %v7554_v37 = vld [vmem:[#allocation25_spill] sm:$0xff] }
 0x458   :  { %5207 = vtanh.f32 %v6260_v10 }
 0x462   :  { %v5208_v16 = vpop.eup %5207 }
 0x463   :  { %v6263_v14 = vmul.f32 %v5208_v16, %v5206_v0 }
 0x465   :  { %1264 = vmatmul.mubr.f32.vlgmr.msra.gmra.mrb[24].mxu0 %v6263_v14  ;;  %1335 = vmatmul.mubr.f32.vlgmr.msra.gmra.mrb[24].mxu1 %v6263_v14 }
 0x466   :  { %4345 = vmatpush1.bf16.msra.mxu0 %v5638_v22  ;;  %4377 = vmatpush1.bf16.msra.mxu1 %v5641_v25 }
 0x467   :  { %4347 = vmatprep.subr.bf16.mxu0 %v5645_v29  ;;  %4379 = vmatprep.subr.bf16.mxu1 %v5652_v34 }
 0x468   :  { %1433 = vmatprep.mubr.f32.mxu0 %v7528_v40  ;;  %1504 = vmatprep.mubr.f32.mxu1 %v7528_v40 }
 0x46a   :  { %4349 = vmatpush1.bf16.msra.mxu0 %v5654_v35  ;;  %4381 = vmatpush1.bf16.msra.mxu1 %v5658_v38 }
 0x46b   :  { %4351 = vmatprep.subr.bf16.mxu0 %v5662_v42  ;;  %4383 = vmatprep.subr.bf16.mxu1 %v5669_v47 }
 0x46e   :  { %4353 = vmatpush1.bf16.msra.mxu0 %v5673_v50  ;;  %4385 = vmatpush1.bf16.msra.mxu1 %v5677_v54 }
 0x46f   :  { %4355 = vmatprep.subr.bf16.mxu0 %v5681_v58  ;;  %4387 = vmatprep.subr.bf16.mxu1 %v5685_v61 }
 0x472   :  { %4357 = vmatpush1.bf16.msra.mxu0 %v5692_v2  ;;  %4389 = vmatpush1.bf16.msra.mxu1 %v5696_v5 }
 0x473   :  { %4359 = vmatprep.subr.bf16.mxu0 %v5700_v8  ;;  %4391 = vmatprep.subr.bf16.mxu1 %v5704_v11 }
 0x476   :  { %4361 = vmatpush1.bf16.msra.mxu0 %v5711_v15  ;;  %4393 = vmatpush1.bf16.msra.mxu1 %v5715_v19 }
 0x477   :  { %4363 = vmatprep.subr.bf16.mxu0 %v5719_v24  ;;  %4395 = vmatprep.subr.bf16.mxu1 %v5723_v28 }
 0x47a   :  { %4365 = vmatpush1.bf16.msra.mxu0 %v5730_v33  ;;  %4397 = vmatpush1.bf16.msra.mxu1 %v5734_v39 }
 0x47b   :  { %4367 = vmatprep.subr.bf16.mxu0 %v5738_v43  ;;  %4399 = vmatprep.subr.bf16.mxu1 %v5742_v46 }
 0x47e   :  { %4369 = vmatpush1.bf16.msra.mxu0 %v5749_v52  ;;  %4401 = vmatpush1.bf16.msra.mxu1 %v5753_v56 }
 0x47f   :  { %4371 = vmatprep.subr.bf16.mxu0 %v5757_v60  ;;  %4403 = vmatprep.subr.bf16.mxu1 %v5761_v1 }
 0x482   :  { %4373 = vmatpush1.bf16.msra.mxu0 %v5768_v4  ;;  %4405 = vmatpush1.bf16.msra.mxu1 %v5772_v6 }
 0x483   :  { %4407 = vmatprep.subr.bf16.mxu0 %v7529_v63  ;;  %4439 = vmatprep.subr.bf16.mxu1 %v7530_v31 }
 0x538   :  { %v1265_v48 = vpop.f32.mrb[24].mxu0  ;;  %v1336_v49 = vpop.f32.mrb[24].mxu1 }
 0x539   :  { %v1341_v62 = vadd.f32 %v1265_v48, %v7554_v37  ;;  %v1343_v23 = vadd.f32 %v1336_v49, %v7555_v30  ;;  %v1267_v12 = vpop.f32.mrb[25].mxu0  ;;  %v1338_v20 = vpop.f32.mrb[25].mxu1 }
 0x53a   :  { %v1342_v17 = vadd.f32 %v1267_v12, %v7556_v18  ;;  %v1344_v45 = vadd.f32 %v1338_v20, %v7557_v51  ;;  %v7558_v20 = vld [vmem:[#allocation29_spill] sm:$0xff] }
 0x53b   :  { %v3924_v26 = vmul.f32 -1.442695, %v1341_v62 }
 0x53c   :  { %v3925_v32 = vmul.f32 -1.442695, %v1342_v17  ;;  %v3926_v59 = vmul.f32 -1.442695, %v1344_v45  ;;  %v7559_v17 = vsel %vm5897_vm3, %v7535_v27, %v5875_v7 }
 0x53d   :  { %5209 = vpow2.f32 %v3924_v26 }
 0x53e   :  { %5211 = vpow2.f32 %v3925_v32  ;;  %v7560_v32 = vld [vmem:[#allocation26_spill] sm:$0xff] }
 0x53f   :  { %5213 = vpow2.f32 %v3926_v59  ;;  %v7561_v59 = vld [vmem:[#allocation16_spill] sm:$0xff] }
 0x540   :  { %5215 = vtanh.f32 %v1343_v23 }
 0x547   :  { %v5210_v9 = vpop.eup %5209 }
 0x548   :  { %v5212_v41 = vpop.eup %5211  ;;  %v1348_v57 = vadd.f32 1.0, %v5210_v9  ;;  %v7562_v9 = vsel %vm5892_vm2, %v7560_v32, %v7561_v59 }
 0x549   :  { %v1354_v0 = vadd.f32 1.0, %v5212_v41  ;;  %v5214_v3 = vpop.eup %5213  ;;  %v7564_v41 = vld [vmem:[#allocation17_spill] sm:$0xff] }
 0x54a   :  { %5217 = vrcp.f32 %v1348_v57  ;;  %v5216_v55 = vpop.eup %5215  ;;  %v1361_v36 = vadd.f32 1.0, %v5214_v3 }
 0x54b   :  { %5219 = vrcp.f32 %v1354_v0 }
 0x54c   :  { %5221 = vrcp.f32 %v1361_v36 }
 0x554   :  { %v5218_v16 = vpop.eup %5217 }
 0x555   :  { %v5220_v48 = vpop.eup %5219  ;;  %v1365_v49 = vmul.f32 %v5218_v16, %v5216_v55 }
 0x556   :  { %v1364_v13 = vmul.f32 %v5220_v48, %v6260_v10  ;;  %v5222_v62 = vpop.eup %5221 }
 0x558   :  { %v6318_v37 = vadd.f32 %v1365_v49, %v1364_v13 }
 0x55a   :  { %5223 = vtanh.f32 %v6318_v37 }
 0x564   :  { %v5224_v30 = vpop.eup %5223 }
 0x565   :  { %v6321_v12 = vmul.f32 %v5224_v30, %v5222_v62 }
 0x567   :  { %1434 = vmatmul.mubr.f32.vlgmr.msra.gmra.mrb[26].mxu0 %v6321_v12  ;;  %1505 = vmatmul.mubr.f32.vlgmr.msra.gmra.mrb[26].mxu1 %v6321_v12 }
 0x568   :  { %4409 = vmatpush1.bf16.msra.mxu0 %v5638_v22  ;;  %4441 = vmatpush1.bf16.msra.mxu1 %v5641_v25 }
 0x569   :  { %4411 = vmatprep.subr.bf16.mxu0 %v5645_v29  ;;  %4443 = vmatprep.subr.bf16.mxu1 %v5652_v34 }
 0x56a   :  { %1603 = vmatprep.mubr.f32.mxu0 %v7528_v40  ;;  %1674 = vmatprep.mubr.f32.mxu1 %v7528_v40 }
 0x56c   :  { %4413 = vmatpush1.bf16.msra.mxu0 %v5654_v35  ;;  %4445 = vmatpush1.bf16.msra.mxu1 %v5658_v38 }
 0x56d   :  { %4415 = vmatprep.subr.bf16.mxu0 %v5662_v42  ;;  %4447 = vmatprep.subr.bf16.mxu1 %v5669_v47 }
 0x570   :  { %4417 = vmatpush1.bf16.msra.mxu0 %v5673_v50  ;;  %4449 = vmatpush1.bf16.msra.mxu1 %v5677_v54 }
 0x571   :  { %4419 = vmatprep.subr.bf16.mxu0 %v5681_v58  ;;  %4451 = vmatprep.subr.bf16.mxu1 %v5685_v61 }
 0x574   :  { %4421 = vmatpush1.bf16.msra.mxu0 %v5692_v2  ;;  %4453 = vmatpush1.bf16.msra.mxu1 %v5696_v5 }
 0x575   :  { %4423 = vmatprep.subr.bf16.mxu0 %v5700_v8  ;;  %4455 = vmatprep.subr.bf16.mxu1 %v5704_v11 }
 0x578   :  { %4425 = vmatpush1.bf16.msra.mxu0 %v5711_v15  ;;  %4457 = vmatpush1.bf16.msra.mxu1 %v5715_v19 }
 0x579   :  { %4427 = vmatprep.subr.bf16.mxu0 %v5719_v24  ;;  %4459 = vmatprep.subr.bf16.mxu1 %v5723_v28 }
 0x57c   :  { %4429 = vmatpush1.bf16.msra.mxu0 %v5730_v33  ;;  %4461 = vmatpush1.bf16.msra.mxu1 %v5734_v39 }
 0x57d   :  { %4431 = vmatprep.subr.bf16.mxu0 %v5738_v43  ;;  %4463 = vmatprep.subr.bf16.mxu1 %v5742_v46 }
 0x580   :  { %4433 = vmatpush1.bf16.msra.mxu0 %v5749_v52  ;;  %4465 = vmatpush1.bf16.msra.mxu1 %v5753_v56 }
 0x581   :  { %4435 = vmatprep.subr.bf16.mxu0 %v5757_v60  ;;  %4467 = vmatprep.subr.bf16.mxu1 %v5761_v1 }
 0x584   :  { %4437 = vmatpush1.bf16.msra.mxu0 %v5768_v4  ;;  %4469 = vmatpush1.bf16.msra.mxu1 %v5772_v6 }
 0x585   :  { %4471 = vmatprep.subr.bf16.mxu0 %v7529_v63  ;;  %4503 = vmatprep.subr.bf16.mxu1 %v7530_v31  ;;  %v7563_v31 = vld [vmem:[#allocation28_spill] sm:$0xff] }
 0x586   :  { %v7565_v57 = vsel %vm5907_vm4, %v7563_v31, %v7564_v41  ;;  %v1888_v31 = vld [vmem:[#allocation4 + $0x8] sm:$0xff] }
 0x587   :  { %v1892_v41 = vld [vmem:[#allocation4 + $0x28] sm:$0xff] }
 0x63a   :  { %v1435_v10 = vpop.f32.mrb[26].mxu0  ;;  %v1506_v23 = vpop.f32.mrb[26].mxu1 }
 0x63b   :  { %v1511_v18 = vadd.f32 %v1435_v10, %v7558_v20  ;;  %v1513_v51 = vadd.f32 %v1506_v23, %v7559_v17  ;;  %v1437_v45 = vpop.f32.mrb[27].mxu0  ;;  %v1508_v26 = vpop.f32.mrb[27].mxu1 }
 0x63c   :  { %v1512_v63 = vadd.f32 %v1437_v45, %v7562_v9  ;;  %v1514_v0 = vadd.f32 %v1508_v26, %v7565_v57  ;;  %v1890_v57 = vld [vmem:[#allocation4 + $0x18] sm:$0xff] }
 0x63d   :  { %v3927_v3 = vmul.f32 -1.442695, %v1511_v18 }
 0x63e   :  { %v3928_v55 = vmul.f32 -1.442695, %v1512_v63  ;;  %v3929_v7 = vmul.f32 -1.442695, %v1514_v0  ;;  %v4534_v0 = vpack.c.bf16 %v1892_v41, %v1888_v31 }
 0x63f   :  { %5225 = vpow2.f32 %v3927_v3  ;;  %v1894_v3 = vld [vmem:[#allocation4 + $0x38] sm:$0xff] }
 0x640   :  { %5227 = vpow2.f32 %v3928_v55  ;;  %v1887_v55 = vld [vmem:[#allocation4] sm:$0xff] }
 0x641   :  { %5229 = vpow2.f32 %v3929_v7  ;;  %v1891_v7 = vld [vmem:[#allocation4 + $0x20] sm:$0xff] }
 0x642   :  { %5231 = vtanh.f32 %v1513_v51 }
 0x649   :  { %v5226_v27 = vpop.eup %5225 }
 0x64a   :  { %v5228_v16 = vpop.eup %5227  ;;  %v1518_v48 = vadd.f32 1.0, %v5226_v27  ;;  %v4566_v27 = vpack.c.bf16 %v1894_v3, %v1890_v57  ;;  %v1921_v57 = vld [vmem:[#allocation4 + $0x110] sm:$0xff] }
 0x64b   :  { %v1524_v49 = vadd.f32 1.0, %v5228_v16  ;;  %v5230_v36 = vpop.eup %5229  ;;  %v4536_v16 = vpack.c.bf16 %v1891_v7, %v1887_v55  ;;  %v1928_v55 = vld [vmem:[#allocation4 + $0x148] sm:$0xff] }
 0x64c   :  { %5233 = vrcp.f32 %v1518_v48  ;;  %v5232_v13 = vpop.eup %5231  ;;  %v1531_v23 = vadd.f32 1.0, %v5230_v36  ;;  %v1889_v48 = vld [vmem:[#allocation4 + $0x10] sm:$0xff]  ;;  %v1932_v7 = vld [vmem:[#allocation4 + $0x168] sm:$0xff] }
 0x64d   :  { %5235 = vrcp.f32 %v1524_v49  ;;  %v1893_v49 = vld [vmem:[#allocation4 + $0x30] sm:$0xff] }
 0x64e   :  { %5237 = vrcp.f32 %v1531_v23  ;;  %v4568_v36 = vpack.c.bf16 %v1893_v49, %v1889_v48  ;;  %v1902_v23 = vld [vmem:[#allocation4 + $0x78] sm:$0xff]  ;;  %v1927_v49 = vld [vmem:[#allocation4 + $0x140] sm:$0xff] }
 0x64f   :  { %v1934_v48 = vld [vmem:[#allocation4 + $0x178] sm:$0xff] }
 0x656   :  { %v5234_v62 = vpop.eup %5233 }
 0x657   :  { %v5236_v30 = vpop.eup %5235  ;;  %v1535_v10 = vmul.f32 %v5234_v62, %v5232_v13  ;;  %v1896_v13 = vld [vmem:[#allocation4 + $0x48] sm:$0xff] }
 0x658   :  { %v1534_v20 = vmul.f32 %v5236_v30, %v6318_v37  ;;  %v5238_v17 = vpop.eup %5237  ;;  %v1900_v62 = vld [vmem:[#allocation4 + $0x68] sm:$0xff]  ;;  %v1898_v30 = vld [vmem:[#allocation4 + $0x58] sm:$0xff] }
 0x65a   :  { %v6376_v18 = vadd.f32 %v1535_v10, %v1534_v20  ;;  %v4538_v10 = vpack.c.bf16 %v1900_v62, %v1896_v13  ;;  %v1895_v20 = vld [vmem:[#allocation4 + $0x40] sm:$0xff] }
 0x65c   :  { %5239 = vtanh.f32 %v6376_v18 }
 0x666   :  { %v5240_v45 = vpop.eup %5239 }
 0x667   :  { %v6379_v26 = vmul.f32 %v5240_v45, %v5238_v17  ;;  %v4570_v17 = vpack.c.bf16 %v1902_v23, %v1898_v30  ;;  %v1929_v30 = vld [vmem:[#allocation4 + $0x150] sm:$0xff]  ;;  %v1936_v23 = vld [vmem:[#allocation4 + $0x188] sm:$0xff] }
 0x669   :  { %1604 = vmatmul.mubr.f32.vlgmr.msra.gmra.mrb[28].mxu0 %v6379_v26  ;;  %1675 = vmatmul.mubr.f32.vlgmr.msra.gmra.mrb[28].mxu1 %v6379_v26 }
 0x66a   :  { %4473 = vmatpush1.bf16.msra.mxu0 %v5638_v22  ;;  %4505 = vmatpush1.bf16.msra.mxu1 %v5641_v25 }
 0x66b   :  { %4475 = vmatprep.subr.bf16.mxu0 %v5645_v29  ;;  %4507 = vmatprep.subr.bf16.mxu1 %v5652_v34  ;;  %v7566_v29 = vld [vmem:[#allocation33_spill] sm:$0xff] }
 0x66c   :  { %1773 = vmatprep.mubr.f32.mxu0 %v7528_v40  ;;  %1844 = vmatprep.mubr.f32.mxu1 %v7528_v40 }
 0x66e   :  { %4477 = vmatpush1.bf16.msra.mxu0 %v5654_v35  ;;  %4509 = vmatpush1.bf16.msra.mxu1 %v5658_v38  ;;  %v7567_v35 = vld [vmem:[#allocation30_spill] sm:$0xff] }
 0x66f   :  { %4479 = vmatprep.subr.bf16.mxu0 %v5662_v42  ;;  %4511 = vmatprep.subr.bf16.mxu1 %v5669_v47  ;;  %v7568_v38 = vld [vmem:[#allocation14_spill] sm:$0xff] }
 0x670   :  { %v7569_v42 = vsel %vm5897_vm3, %v7567_v35, %v7568_v38  ;;  %v1908_v35 = vld [vmem:[#allocation4 + $0xa8] sm:$0xff]  ;;  %v1906_v38 = vld [vmem:[#allocation4 + $0x98] sm:$0xff] }
 0x672   :  { %4481 = vmatpush1.bf16.msra.mxu0 %v5673_v50  ;;  %4513 = vmatpush1.bf16.msra.mxu1 %v5677_v54 }
 0x673   :  { %4483 = vmatprep.subr.bf16.mxu0 %v5681_v58  ;;  %4515 = vmatprep.subr.bf16.mxu1 %v5685_v61  ;;  %v7570_v58 = vld [vmem:[#allocation31_spill] sm:$0xff]  ;;  %v7571_v61 = vld [vmem:[#allocation13_spill] sm:$0xff] }
 0x676   :  { %4485 = vmatpush1.bf16.msra.mxu0 %v5692_v2  ;;  %4517 = vmatpush1.bf16.msra.mxu1 %v5696_v5  ;;  %v7572_v2 = vsel %vm5892_vm2, %v7570_v58, %v7571_v61 }
 0x677   :  { %4487 = vmatprep.subr.bf16.mxu0 %v5700_v8  ;;  %4519 = vmatprep.subr.bf16.mxu1 %v5704_v11  ;;  %v7573_v8 = vld [vmem:[#allocation32_spill] sm:$0xff]  ;;  %v7574_v11 = vld [vmem:[#allocation15_spill] sm:$0xff] }
 0x67a   :  { %4489 = vmatpush1.bf16.msra.mxu0 %v5711_v15  ;;  %4521 = vmatpush1.bf16.msra.mxu1 %v5715_v19  ;;  %v7575_v15 = vsel %vm5907_vm4, %v7573_v8, %v7574_v11  ;;  %v1912_v11 = vld [vmem:[#allocation4 + $0xc8] sm:$0xff] }
 0x67b   :  { %4491 = vmatprep.subr.bf16.mxu0 %v5719_v24  ;;  %4523 = vmatprep.subr.bf16.mxu1 %v5723_v28 }
 0x67e   :  { %4493 = vmatpush1.bf16.msra.mxu0 %v5730_v33  ;;  %4525 = vmatpush1.bf16.msra.mxu1 %v5734_v39 }
 0x67f   :  { %4495 = vmatprep.subr.bf16.mxu0 %v5738_v43  ;;  %4527 = vmatprep.subr.bf16.mxu1 %v5742_v46 }
 0x682   :  { %4497 = vmatpush1.bf16.msra.mxu0 %v5749_v52  ;;  %4529 = vmatpush1.bf16.msra.mxu1 %v5753_v56 }
 0x683   :  { %4499 = vmatprep.subr.bf16.mxu0 %v5757_v60  ;;  %4531 = vmatprep.subr.bf16.mxu1 %v5761_v1 }
 0x686   :  { %4501 = vmatpush1.bf16.msra.mxu0 %v5768_v4  ;;  %4533 = vmatpush1.bf16.msra.mxu1 %v5772_v6 }
 0x687   :  { %4535 = vmatprep.subr.bf16.mxu0 %v4534_v0  ;;  %4567 = vmatprep.subr.bf16.mxu1 %v4566_v27  ;;  %v1925_v0 = vld [vmem:[#allocation4 + $0x130] sm:$0xff]  ;;  %v1930_v27 = vld [vmem:[#allocation4 + $0x158] sm:$0xff] }
 0x688   :  { %v4584_v3 = vpack.c.bf16 %v1925_v0, %v1921_v57  ;;  %v4586_v13 = vpack.c.bf16 %v1934_v48, %v1930_v27  ;;  %v7582_v57 = vld [vmem:[#allocation37_spill] sm:$0xff]  ;;  %v7583_v0 = vld [vmem:[#allocation34_spill] sm:$0xff] }
 0x689   :  { %v7586_v27 = vld [vmem:[#allocation38_spill] sm:$0xff] }
 0x73c   :  { %v1605_v22 = vpop.f32.mrb[28].mxu0  ;;  %v1676_v25 = vpop.f32.mrb[28].mxu1 }
 0x73d   :  { %v1681_v34 = vadd.f32 %v1605_v22, %v7566_v29  ;;  %v1683_v47 = vadd.f32 %v1676_v25, %v7569_v42  ;;  %v1607_v50 = vpop.f32.mrb[29].mxu0  ;;  %v1678_v54 = vpop.f32.mrb[29].mxu1  ;;  %v1897_v22 = vld [vmem:[#allocation4 + $0x50] sm:$0xff] }
 0x73e   :  { %v1682_v5 = vadd.f32 %v1607_v50, %v7572_v2  ;;  %v1684_v19 = vadd.f32 %v1678_v54, %v7575_v15  ;;  %v1901_v25 = vld [vmem:[#allocation4 + $0x70] sm:$0xff]  ;;  %v1903_v50 = vld [vmem:[#allocation4 + $0x80] sm:$0xff]  ;;  %v1916_v15 = vld [vmem:[#allocation4 + $0xe8] sm:$0xff] }
 0x73f   :  { %v3930_v24 = vmul.f32 -1.442695, %v1681_v34  ;;  %v4572_v29 = vpack.c.bf16 %v1901_v25, %v1897_v22  ;;  %v1904_v34 = vld [vmem:[#allocation4 + $0x88] sm:$0xff]  ;;  %v1907_v54 = vld [vmem:[#allocation4 + $0xa0] sm:$0xff]  ;;  %v1905_v2 = vld [vmem:[#allocation4 + $0x90] sm:$0xff] }
 0x740   :  { %v3931_v28 = vmul.f32 -1.442695, %v1682_v5  ;;  %v3932_v33 = vmul.f32 -1.442695, %v1684_v19  ;;  %v4542_v42 = vpack.c.bf16 %v1908_v35, %v1904_v34  ;;  %v4544_v61 = vpack.c.bf16 %v1907_v54, %v1903_v50  ;;  %v1909_v5 = vld [vmem:[#allocation4 + $0xb0] sm:$0xff]  ;;  %v1914_v19 = vld [vmem:[#allocation4 + $0xd8] sm:$0xff] }
 0x741   :  { %5241 = vpow2.f32 %v3930_v24  ;;  %v4576_v8 = vpack.c.bf16 %v1909_v5, %v1905_v2  ;;  %v4546_v24 = vpack.c.bf16 %v1916_v15, %v1912_v11  ;;  %v1939_v34 = vld [vmem:[#allocation4 + $0x1a0] sm:$0xff]  ;;  %v1937_v35 = vld [vmem:[#allocation4 + $0x190] sm:$0xff]  ;;  %v1948_v50 = vld [vmem:[#allocation4 + $0x1e8] sm:$0xff] }
 0x742   :  { %5243 = vpow2.f32 %v3931_v28  ;;  %v1918_v28 = vld [vmem:[#allocation4 + $0xf8] sm:$0xff]  ;;  %v1943_v5 = vld [vmem:[#allocation4 + $0x1c0] sm:$0xff]  ;;  %v1945_v15 = vld [vmem:[#allocation4 + $0x1d0] sm:$0xff] }
 0x743   :  { %5245 = vpow2.f32 %v3932_v33  ;;  %v1911_v33 = vld [vmem:[#allocation4 + $0xc0] sm:$0xff]  ;;  %v1950_v2 = vld [vmem:[#allocation4 + $0x1f8] sm:$0xff] }
 0x744   :  { %5247 = vtanh.f32 %v1683_v47  ;;  %v1910_v47 = vld [vmem:[#allocation4 + $0xb8] sm:$0xff]  ;;  %v1947_v11 = vld [vmem:[#allocation4 + $0x1e0] sm:$0xff] }
 0x745   :  { %v4574_v58 = vpack.c.bf16 %v1910_v47, %v1906_v38  ;;  %v1944_v47 = vld [vmem:[#allocation4 + $0x1c8] sm:$0xff] }
 0x74b   :  { %v5242_v39 = vpop.eup %5241 }
 0x74c   :  { %v5244_v43 = vpop.eup %5243  ;;  %v1688_v46 = vadd.f32 1.0, %v5242_v39  ;;  %v1915_v39 = vld [vmem:[#allocation4 + $0xe0] sm:$0xff] }
 0x74d   :  { %v1694_v52 = vadd.f32 1.0, %v5244_v43  ;;  %v5246_v56 = vpop.eup %5245  ;;  %v4578_v43 = vpack.c.bf16 %v1918_v28, %v1914_v19  ;;  %v1949_v19 = vld [vmem:[#allocation4 + $0x1f0] sm:$0xff] }
 0x74e   :  { %5249 = vrcp.f32 %v1688_v46  ;;  %v5248_v60 = vpop.eup %5247  ;;  %v1701_v37 = vadd.f32 1.0, %v5246_v56  ;;  %v4548_v46 = vpack.c.bf16 %v1915_v39, %v1911_v33  ;;  %v1917_v56 = vld [vmem:[#allocation4 + $0xf0] sm:$0xff]  ;;  %v4596_v28 = vpack.c.bf16 %v1949_v19, %v1945_v15  ;;  %v1952_v33 = vld [vmem:[#allocation6 + $0x8] sm:$0xff]  ;;  %v1963_v19 = vld [vmem:[#allocation6 + $0x60] sm:$0xff] }
 0x74f   :  { %5251 = vrcp.f32 %v1694_v52  ;;  %v1913_v52 = vld [vmem:[#allocation4 + $0xd0] sm:$0xff]  ;;  %v1956_v39 = vld [vmem:[#allocation6 + $0x28] sm:$0xff] }
 0x750   :  { %5253 = vrcp.f32 %v1701_v37 }
 0x758   :  { %v5250_v1 = vpop.eup %5249 }
 0x759   :  { %v5252_v4 = vpop.eup %5251  ;;  %v1705_v6 = vmul.f32 %v5250_v1, %v5248_v60  ;;  %v4580_v60 = vpack.c.bf16 %v1917_v56, %v1913_v52  ;;  %v1920_v1 = vld [vmem:[#allocation4 + $0x108] sm:$0xff]  ;;  %v1958_v52 = vld [vmem:[#allocation6 + $0x38] sm:$0xff] }
 0x75a   :  { %v1704_v51 = vmul.f32 %v5252_v4, %v6376_v18  ;;  %v5254_v59 = vpop.eup %5253  ;;  %v1899_v18 = vld [vmem:[#allocation4 + $0x60] sm:$0xff]  ;;  %v1924_v4 = vld [vmem:[#allocation4 + $0x128] sm:$0xff] }
 0x75b   :  { %v4540_v45 = vpack.c.bf16 %v1899_v18, %v1895_v20  ;;  %v4550_v37 = vpack.c.bf16 %v1924_v4, %v1920_v1  ;;  %v1940_v18 = vld [vmem:[#allocation4 + $0x1a8] sm:$0xff]  ;;  %v7578_v4 = vld [vmem:[#allocation40_spill] sm:$0xff] }
 0x75c   :  { %v6432_v32 = vadd.f32 %v1705_v6, %v1704_v51  ;;  %v1922_v6 = vld [vmem:[#allocation4 + $0x118] sm:$0xff]  ;;  %v4558_v22 = vpack.c.bf16 %v1940_v18, %v1936_v23 }
 0x75d   :  { %v1926_v51 = vld [vmem:[#allocation4 + $0x138] sm:$0xff] }
 0x75e   :  { %5255 = vtanh.f32 %v6432_v32  ;;  %v4582_v31 = vpack.c.bf16 %v1926_v51, %v1922_v6  ;;  %v7580_v51 = vld [vmem:[#allocation35_spill] sm:$0xff] }
 0x768   :  { %v5256_v9 = vpop.eup %5255 }
 0x769   :  { %v6435_v63 = vmul.f32 %v5256_v9, %v5254_v59  ;;  %v1919_v59 = vld [vmem:[#allocation4 + $0x100] sm:$0xff] }
 0x76a   :  { %v1923_v9 = vld [vmem:[#allocation4 + $0x120] sm:$0xff] }
 0x76b   :  { %1774 = vmatmul.mubr.f32.vlgmr.msra.gmra.mrb[30].mxu0 %v6435_v63  ;;  %1845 = vmatmul.mubr.f32.vlgmr.msra.gmra.mrb[30].mxu1 %v6435_v63  ;;  %v4552_v41 = vpack.c.bf16 %v1923_v9, %v1919_v59 }
 0x76c   :  { %2101 = vmatprep.mubr.f32.mxu0 %v7528_v40  ;;  %2214 = vmatprep.mubr.f32.mxu1 %v7528_v40 }
 0x76d   :  { %4537 = vmatpush1.bf16.msra.mxu0 %v4536_v16  ;;  %4569 = vmatpush1.bf16.msra.mxu1 %v4568_v36  ;;  %v4554_v16 = vpack.c.bf16 %v1932_v7, %v1928_v55  ;;  %v1931_v36 = vld [vmem:[#allocation4 + $0x160] sm:$0xff]  ;;  %v7585_v7 = vld [vmem:[#allocation39_spill] sm:$0xff] }
 0x76e   :  { %4539 = vmatprep.subr.bf16.mxu0 %v4538_v10  ;;  %4571 = vmatprep.subr.bf16.mxu1 %v4570_v17  ;;  %v4556_v62 = vpack.c.bf16 %v1931_v36, %v1927_v49  ;;  %v1933_v10 = vld [vmem:[#allocation4 + $0x170] sm:$0xff]  ;;  %v1938_v17 = vld [vmem:[#allocation4 + $0x198] sm:$0xff] }
 0x76f   :  { %v4588_v20 = vpack.c.bf16 %v1933_v10, %v1929_v30 }
 0x771   :  { %4541 = vmatpush1.bf16.msra.mxu0 %v4540_v45  ;;  %4573 = vmatpush1.bf16.msra.mxu1 %v4572_v29  ;;  %v1942_v45 = vld [vmem:[#allocation4 + $0x1b8] sm:$0xff]  ;;  %v1935_v29 = vld [vmem:[#allocation4 + $0x180] sm:$0xff] }
 0x772   :  { %4543 = vmatprep.subr.bf16.mxu0 %v4542_v42  ;;  %4575 = vmatprep.subr.bf16.mxu1 %v4574_v58  ;;  %v4590_v25 = vpack.c.bf16 %v1942_v45, %v1938_v17  ;;  %v4560_v38 = vpack.c.bf16 %v1939_v34, %v1935_v29  ;;  %v1941_v42 = vld [vmem:[#allocation4 + $0x1b0] sm:$0xff]  ;;  %v4562_v58 = vpack.c.bf16 %v1948_v50, %v1944_v47 }
 0x773   :  { %v4592_v54 = vpack.c.bf16 %v1941_v42, %v1937_v35  ;;  %v1951_v35 = vld [vmem:[#allocation6] sm:$0xff]  ;;  %v1953_v42 = vld [vmem:[#allocation6 + $0x10] sm:$0xff] }
 0x774   :  { %v1957_v47 = vld [vmem:[#allocation6 + $0x30] sm:$0xff] }
 0x775   :  { %4545 = vmatpush1.bf16.msra.mxu0 %v4544_v61  ;;  %4577 = vmatpush1.bf16.msra.mxu1 %v4576_v8  ;;  %v1946_v61 = vld [vmem:[#allocation4 + $0x1d8] sm:$0xff]  ;;  %v6468_v15 = vpack.c.bf16 %v1957_v47, %v1953_v42  ;;  %v1983_v42 = vld [vmem:[#allocation6 + $0x100] sm:$0xff] }
 0x776   :  { %4547 = vmatprep.subr.bf16.mxu0 %v4546_v24  ;;  %4579 = vmatprep.subr.bf16.mxu1 %v4578_v43  ;;  %v4594_v8 = vpack.c.bf16 %v1950_v2, %v1946_v61  ;;  %v4564_v24 = vpack.c.bf16 %v1947_v11, %v1943_v5  ;;  %v1954_v43 = vld [vmem:[#allocation6 + $0x18] sm:$0xff]  ;;  %v1964_v61 = vld [vmem:[#allocation6 + $0x68] sm:$0xff]  ;;  %v1987_v47 = vld [vmem:[#allocation6 + $0x120] sm:$0xff] }
 0x777   :  { %v6443_v56 = vpack.c.bf16 %v1958_v52, %v1954_v43  ;;  %v1962_v2 = vld [vmem:[#allocation6 + $0x58] sm:$0xff] }
 0x778   :  { %v1966_v5 = vld [vmem:[#allocation6 + $0x78] sm:$0xff] }
 0x779   :  { %4549 = vmatpush1.bf16.msra.mxu0 %v4548_v46  ;;  %4581 = vmatpush1.bf16.msra.mxu1 %v4580_v60  ;;  %v6441_v46 = vpack.c.bf16 %v1956_v39, %v1952_v33  ;;  %7577 = vst [vmem:[#allocation24_spill] sm:$0xff] %v6443_v56  ;;  %v7588_v33 = vld [vmem:[#allocation41_spill] sm:$0xff] }
 0x77a   :  { %4551 = vmatprep.subr.bf16.mxu0 %v4550_v37  ;;  %4583 = vmatprep.subr.bf16.mxu1 %v4582_v31  ;;  %v7579_v37 = vld [vmem:[#allocation36_spill] sm:$0xff] }
 0x77b   :  { %7576 = vst [vmem:[#allocation27_spill] sm:$0xff] %v6441_v46  ;;  %v7581_v59 = vsel %vm5897_vm3, %v7579_v37, %v7580_v51  ;;  %v1974_v37 = vld [vmem:[#allocation6 + $0xb8] sm:$0xff] }
 0x77d   :  { %4553 = vmatpush1.bf16.msra.mxu0 %v4552_v41  ;;  %4585 = vmatpush1.bf16.msra.mxu1 %v4584_v3  ;;  %v7584_v3 = vsel %vm5892_vm2, %v7582_v57, %v7583_v0  ;;  %v1973_v57 = vld [vmem:[#allocation6 + $0xb0] sm:$0xff]  ;;  %v7590_v0 = vld [vmem:[#allocation9_spill] sm:$0xff] }
 0x77e   :  { %4555 = vmatprep.subr.bf16.mxu0 %v4554_v16  ;;  %4587 = vmatprep.subr.bf16.mxu1 %v4586_v13  ;;  %v7587_v16 = vsel %vm5907_vm4, %v7585_v7, %v7586_v27  ;;  %v1976_v27 = vld [vmem:[#allocation6 + $0xc8] sm:$0xff] }
 0x781   :  { %4557 = vmatpush1.bf16.msra.mxu0 %v4556_v62  ;;  %4589 = vmatpush1.bf16.msra.mxu1 %v4588_v20 }
 0x782   :  { %4559 = vmatprep.subr.bf16.mxu0 %v4558_v22  ;;  %4591 = vmatprep.subr.bf16.mxu1 %v4590_v25 }
 0x785   :  { %4561 = vmatpush1.bf16.msra.mxu0 %v4560_v38  ;;  %4593 = vmatpush1.bf16.msra.mxu1 %v4592_v54  ;;  %v1955_v38 = vld [vmem:[#allocation6 + $0x20] sm:$0xff]  ;;  %v1960_v54 = vld [vmem:[#allocation6 + $0x48] sm:$0xff] }
 0x786   :  { %4563 = vmatprep.subr.bf16.mxu0 %v4562_v58  ;;  %4595 = vmatprep.subr.bf16.mxu1 %v4594_v8  ;;  %v6466_v11 = vpack.c.bf16 %v1955_v38, %v1951_v35  ;;  %v6474_v52 = vpack.c.bf16 %v1964_v61, %v1960_v54  ;;  %v1989_v54 = vld [vmem:[#allocation6 + $0x130] sm:$0xff] }
 0x789   :  { %4565 = vmatpush1.bf16.msra.mxu0 %v4564_v24  ;;  %4597 = vmatpush1.bf16.msra.mxu1 %v4596_v28  ;;  %v1961_v24 = vld [vmem:[#allocation6 + $0x50] sm:$0xff] }
 0x78a   :  { %4599 = vmatprep.subr.bf16.mxu0 %v6441_v46  ;;  %4631 = vmatprep.subr.bf16.mxu1 %v6443_v56  ;;  %v1965_v28 = vld [vmem:[#allocation6 + $0x70] sm:$0xff] }
 0x83e   :  { %v1775_v60 = vpop.f32.mrb[30].mxu0  ;;  %v1846_v1 = vpop.f32.mrb[30].mxu1 }
 0x83f   :  { %v1851_v6 = vadd.f32 %v1775_v60, %v7578_v4  ;;  %v1853_v9 = vadd.f32 %v1846_v1, %v7581_v59  ;;  %v1777_v31 = vpop.f32.mrb[31].mxu0  ;;  %v1848_v41 = vpop.f32.mrb[31].mxu1  ;;  %v6476_v60 = vpack.c.bf16 %v1966_v5, %v1962_v2  ;;  %v1968_v1 = vld [vmem:[#allocation6 + $0x88] sm:$0xff]  ;;  %v6482_v59 = vpack.c.bf16 %v1965_v28, %v1961_v24  ;;  %v1998_v24 = vld [vmem:[#allocation6 + $0x178] sm:$0xff] }
 0x840   :  { %v1852_v55 = vadd.f32 %v1777_v31, %v7584_v3  ;;  %v1854_v48 = vadd.f32 %v1848_v41, %v7587_v16  ;;  %v1972_v4 = vld [vmem:[#allocation6 + $0xa8] sm:$0xff]  ;;  %v1971_v31 = vld [vmem:[#allocation6 + $0xa0] sm:$0xff]  ;;  %v1969_v41 = vld [vmem:[#allocation6 + $0x90] sm:$0xff]  ;;  %v1880_v3 = vsel %vm129_vm1, %v7590_v0, %v6435_v63  ;;  %v6534_v28 = vpack.c.bf16 %v1987_v47, %v1983_v42 }
 0x841   :  { %v3933_v49 = vmul.f32 -1.442695, %v1851_v6  ;;  %v1970_v6 = vld [vmem:[#allocation6 + $0x98] sm:$0xff]  ;;  %v1980_v16 = vld [vmem:[#allocation6 + $0xe8] sm:$0xff]  ;;  %v2011_v47 = vld [vmem:[#allocation6 + $0x1e0] sm:$0xff] }
 0x842   :  { %v3934_v36 = vmul.f32 -1.442695, %v1852_v55  ;;  %v3935_v13 = vmul.f32 -1.442695, %v1854_v48  ;;  %v6492_v55 = vpack.c.bf16 %v1972_v4, %v1968_v1  ;;  %v6494_v7 = vpack.c.bf16 %v1974_v37, %v1970_v6  ;;  %v1978_v48 = vld [vmem:[#allocation6 + $0xd8] sm:$0xff]  ;;  %v1992_v5 = vld [vmem:[#allocation6 + $0x148] sm:$0xff] }
 0x843   :  { %5257 = vpow2.f32 %v3933_v49  ;;  %v1982_v49 = vld [vmem:[#allocation6 + $0xf8] sm:$0xff]  ;;  %v1991_v1 = vld [vmem:[#allocation6 + $0x140] sm:$0xff]  ;;  %v1993_v6 = vld [vmem:[#allocation6 + $0x150] sm:$0xff] }
 0x844   :  { %5259 = vpow2.f32 %v3934_v36  ;;  %v1995_v4 = vld [vmem:[#allocation6 + $0x160] sm:$0xff]  ;;  %v1997_v37 = vld [vmem:[#allocation6 + $0x170] sm:$0xff] }
 0x845   :  { %5261 = vpow2.f32 %v3935_v13  ;;  %v6500_v13 = vpack.c.bf16 %v1973_v57, %v1969_v41  ;;  %v2000_v57 = vld [vmem:[#allocation6 + $0x188] sm:$0xff] }
 0x846   :  { %5263 = vtanh.f32 %v1853_v9  ;;  %v1967_v9 = vld [vmem:[#allocation6 + $0x80] sm:$0xff] }
 0x847   :  { %v6498_v36 = vpack.c.bf16 %v1971_v31, %v1967_v9  ;;  %v1883_v9 = vsel %vm129_vm1, %v6321_v12, %v6263_v14 }
 0x84d   :  { %v5258_v62 = vpop.eup %5257 }
 0x84e   :  { %v5260_v30 = vpop.eup %5259  ;;  %v1858_v10 = vadd.f32 1.0, %v5258_v62  ;;  %v1975_v62 = vld [vmem:[#allocation6 + $0xc0] sm:$0xff] }
 0x84f   :  { %v1864_v23 = vadd.f32 1.0, %v5260_v30  ;;  %v5262_v20 = vpop.eup %5261  ;;  %v1979_v30 = vld [vmem:[#allocation6 + $0xe0] sm:$0xff] }
 0x850   :  { %5265 = vrcp.f32 %v1858_v10  ;;  %v5264_v18 = vpop.eup %5263  ;;  %v1871_v25 = vadd.f32 1.0, %v5262_v20  ;;  %v1977_v10 = vld [vmem:[#allocation6 + $0xd0] sm:$0xff]  ;;  %v7591_v20 = vld [vmem:[#allocation10_spill] sm:$0xff]  ;;  %v6516_v35 = vpack.c.bf16 %v1979_v30, %v1975_v62 }
 0x851   :  { %5267 = vrcp.f32 %v1864_v23  ;;  %v1981_v23 = vld [vmem:[#allocation6 + $0xf0] sm:$0xff] }
 0x852   :  { %5269 = vrcp.f32 %v1871_v25  ;;  %v1988_v25 = vld [vmem:[#allocation6 + $0x128] sm:$0xff]  ;;  %v6518_v38 = vpack.c.bf16 %v1981_v23, %v1977_v10  ;;  %v2001_v62 = vld [vmem:[#allocation6 + $0x190] sm:$0xff]  ;;  %v1884_v10 = vsel %vm129_vm1, %v6379_v26, %v7591_v20 }
 0x853   :  { %v2005_v30 = vld [vmem:[#allocation6 + $0x1b0] sm:$0xff] }
 0x85a   :  { %v5266_v17 = vpop.eup %5265 }
 0x85b   :  { %v5268_v45 = vpop.eup %5267  ;;  %v1875_v22 = vmul.f32 %v5266_v17, %v5264_v18  ;;  %v1881_v18 = vsel %vm129_vm1, %v7591_v20, %v6379_v26  ;;  %v6510_v17 = vpack.c.bf16 %v1980_v16, %v1976_v27  ;;  %v2002_v27 = vld [vmem:[#allocation6 + $0x198] sm:$0xff]  ;;  %v6572_v26 = vpack.c.bf16 %v2005_v30, %v2001_v62  ;;  %v2007_v20 = vld [vmem:[#allocation6 + $0x1c0] sm:$0xff] }
 0x85c   :  { %v1874_v29 = vmul.f32 %v5268_v45, %v6432_v32  ;;  %v5270_v50 = vpop.eup %5269  ;;  %v1959_v32 = vld [vmem:[#allocation6 + $0x40] sm:$0xff]  ;;  %v6512_v45 = vpack.c.bf16 %v1982_v49, %v1978_v48  ;;  %v2006_v16 = vld [vmem:[#allocation6 + $0x1b8] sm:$0xff]  ;;  %v6552_v48 = vpack.c.bf16 %v1995_v4, %v1991_v1 }
 0x85d   :  { %v6480_v51 = vpack.c.bf16 %v1963_v19, %v1959_v32  ;;  %v1996_v32 = vld [vmem:[#allocation6 + $0x168] sm:$0xff]  ;;  %v1994_v19 = vld [vmem:[#allocation6 + $0x158] sm:$0xff]  ;;  %v2003_v49 = vld [vmem:[#allocation6 + $0x1a0] sm:$0xff] }
 0x85e   :  { %v1876_v34 = vadd.f32 %v1875_v22, %v1874_v29  ;;  %v1984_v22 = vld [vmem:[#allocation6 + $0x108] sm:$0xff]  ;;  %v1986_v29 = vld [vmem:[#allocation6 + $0x118] sm:$0xff]  ;;  %v6546_v31 = vpack.c.bf16 %v1996_v32, %v1992_v5  ;;  %v6548_v41 = vpack.c.bf16 %v1998_v24, %v1994_v19  ;;  %v6588_v19 = vpack.c.bf16 %v2011_v47, %v2007_v20 }
 0x85f   :  { %v6528_v61 = vpack.c.bf16 %v1988_v25, %v1984_v22  ;;  %v2008_v22 = vld [vmem:[#allocation6 + $0x1c8] sm:$0xff] }
 0x860   :  { %5271 = vtanh.f32 %v1876_v34  ;;  %v1990_v34 = vld [vmem:[#allocation6 + $0x138] sm:$0xff]  ;;  %v2012_v25 = vld [vmem:[#allocation6 + $0x1e8] sm:$0xff] }
 0x861   :  { %v6530_v2 = vpack.c.bf16 %v1990_v34, %v1986_v29  ;;  %v2010_v29 = vld [vmem:[#allocation6 + $0x1d8] sm:$0xff]  ;;  %v6582_v5 = vpack.c.bf16 %v2012_v25, %v2008_v22 }
 0x862   :  { %v2014_v34 = vld [vmem:[#allocation6 + $0x1f8] sm:$0xff] }
 0x863   :  { %v6584_v32 = vpack.c.bf16 %v2014_v34, %v2010_v29 }
 0x86a   :  { %v5272_v58 = vpop.eup %5271 }
 0x86b   :  { %v6464_v8 = vmul.f32 %v5272_v58, %v5270_v50  ;;  %v1985_v50 = vld [vmem:[#allocation6 + $0x110] sm:$0xff]  ;;  %v1882_v58 = vsel %vm129_vm1, %v6263_v14, %v6321_v12  ;;  %v6554_v14 = vpack.c.bf16 %v1997_v37, %v1993_v6  ;;  %v1999_v12 = vld [vmem:[#allocation6 + $0x180] sm:$0xff] }
 0x86c   :  { %v6570_v42 = vpack.c.bf16 %v2003_v49, %v1999_v12  ;;  %v7593_v6 = vld [vmem:[#allocation11_spill] sm:$0xff] }
 0x86d   :  { %v1879_v43 = vsel %vm129_vm1, %v7588_v33, %v6464_v8  ;;  %v7594_v37 = vsub.s32 0, %v7593_v6  ;;  %v7597_v12 = vsub.s32 3, %v7593_v6 }
 0x86e   :  { %2102 = vmatmul.mubr.f32.vlgmr.msra.gmra.mrb[32].mxu0 %v1879_v43  ;;  %2215 = vmatmul.mubr.f32.vlgmr.msra.gmra.mrb[32].mxu1 %v1879_v43  ;;  %v6536_v43 = vpack.c.bf16 %v1989_v54, %v1985_v50  ;;  %v2009_v50 = vld [vmem:[#allocation6 + $0x1d0] sm:$0xff] }
 0x86f   :  { %4601 = vmatpush1.bf16.msra.mxu0 %v6466_v11  ;;  %4633 = vmatpush1.bf16.msra.mxu1 %v6468_v15  ;;  %v2013_v54 = vld [vmem:[#allocation6 + $0x1f0] sm:$0xff] }
 0x870   :  { %2107 = vmatprep.mubr.f32.mxu0 %v7528_v40  ;;  %2220 = vmatprep.mubr.f32.mxu1 %v7528_v40  ;;  %v6590_v24 = vpack.c.bf16 %v2013_v54, %v2009_v50 }
 0x871   :  { %4603 = vmatprep.subr.bf16.mxu0 %v6474_v52  ;;  %4635 = vmatprep.subr.bf16.mxu1 %v6476_v60 }
 0x872   :  { %2108 = vmatmul.mubr.f32.gmra.mrb[34].mxu0 %v1880_v3  ;;  %2221 = vmatmul.mubr.f32.gmra.mrb[34].mxu1 %v1880_v3  ;;  %v2004_v3 = vld [vmem:[#allocation6 + $0x1a8] sm:$0xff]  ;;  %7592 = vst [vmem:[#allocation19_spill] sm:$0xff] %v6590_v24 }
 0x873   :  { %4605 = vmatpush1.bf16.msra.mxu0 %v6480_v51  ;;  %4637 = vmatpush1.bf16.msra.mxu1 %v6482_v59  ;;  %v6564_v23 = vpack.c.bf16 %v2004_v3, %v2000_v57  ;;  %v7595_v57 = vsub.s32 2, %v7593_v6 }
 0x874   :  { %2113 = vmatprep.mubr.f32.mxu0 %v7528_v40  ;;  %2226 = vmatprep.mubr.f32.mxu1 %v7528_v40 }
 0x875   :  { %4607 = vmatprep.subr.bf16.mxu0 %v6492_v55  ;;  %4639 = vmatprep.subr.bf16.mxu1 %v6494_v7 }
 0x876   :  { %2114 = vmatmul.mubr.f32.gmra.mrb[36].mxu0 %v1881_v18  ;;  %2227 = vmatmul.mubr.f32.gmra.mrb[36].mxu1 %v1881_v18  ;;  %v6566_v18 = vpack.c.bf16 %v2006_v16, %v2002_v27  ;;  %v7596_v27 = vsub.s32 1, %v7593_v6 }
 0x877   :  { %4609 = vmatpush1.bf16.msra.mxu0 %v6498_v36  ;;  %4641 = vmatpush1.bf16.msra.mxu1 %v6500_v13 }
 0x878   :  { %2119 = vmatprep.mubr.f32.mxu0 %v7528_v40  ;;  %2232 = vmatprep.mubr.f32.mxu1 %v7528_v40 }
 0x879   :  { %4611 = vmatprep.subr.bf16.mxu0 %v6510_v17  ;;  %4643 = vmatprep.subr.bf16.mxu1 %v6512_v45 }
 0x87a   :  { %2120 = vmatmul.mubr.f32.gmra.mrb[38].mxu0 %v1882_v58  ;;  %2233 = vmatmul.mubr.f32.gmra.mrb[38].mxu1 %v1882_v58  ;;  %v1885_v58 = vsel %vm129_vm1, %v6435_v63, %v7590_v0  ;;  %v1886_v63 = vsel %vm129_vm1, %v6464_v8, %v7588_v33  ;;  %v2015_v8 = vld [vmem:[%s7381_s6] sm:$0xf] }
 0x87b   :  { %4613 = vmatpush1.bf16.msra.mxu0 %v6516_v35  ;;  %4645 = vmatpush1.bf16.msra.mxu1 %v6518_v38  ;;  %v6659_v3 = vrot.slane %v2015_v8, %v7595_v57  ;;  %v6663_v16 = vrot.slane %v2015_v8, %v7596_v27  ;;  %v6667_v49 = vrot.slane %v2015_v8, %v7597_v12 }
 0x87c   :  { %2125 = vmatprep.mubr.f32.mxu0 %v7528_v40  ;;  %2238 = vmatprep.mubr.f32.mxu1 %v7528_v40 }
 0x87d   :  { %4615 = vmatprep.subr.bf16.mxu0 %v6528_v61  ;;  %4647 = vmatprep.subr.bf16.mxu1 %v6530_v2 }
 0x87e   :  { %2126 = vmatmul.mubr.f32.gmra.mrb[40].mxu0 %v1883_v9  ;;  %2239 = vmatmul.mubr.f32.gmra.mrb[40].mxu1 %v1883_v9  ;;  %v6655_v9 = vrot.slane %v2015_v8, %v7594_v37 }
 0x87f   :  { %4617 = vmatpush1.bf16.msra.mxu0 %v6534_v28  ;;  %4649 = vmatpush1.bf16.msra.mxu1 %v6536_v43 }
 0x880   :  { %2131 = vmatprep.mubr.f32.mxu0 %v7528_v40  ;;  %2244 = vmatprep.mubr.f32.mxu1 %v7528_v40 }
 0x881   :  { %4619 = vmatprep.subr.bf16.mxu0 %v6546_v31  ;;  %4651 = vmatprep.subr.bf16.mxu1 %v6548_v41 }
 0x882   :  { %2132 = vmatmul.mubr.f32.gmra.mrb[42].mxu0 %v1884_v10  ;;  %2245 = vmatmul.mubr.f32.gmra.mrb[42].mxu1 %v1884_v10 }
 0x883   :  { %4621 = vmatpush1.bf16.msra.mxu0 %v6552_v48  ;;  %4653 = vmatpush1.bf16.msra.mxu1 %v6554_v14 }
 0x884   :  { %2137 = vmatprep.mubr.f32.mxu0 %v7528_v40  ;;  %2250 = vmatprep.mubr.f32.mxu1 %v7528_v40 }
 0x885   :  { %4623 = vmatprep.subr.bf16.mxu0 %v6564_v23  ;;  %4655 = vmatprep.subr.bf16.mxu1 %v6566_v18 }
 0x886   :  { %2138 = vmatmul.mubr.f32.gmra.mrb[44].mxu0 %v1885_v58  ;;  %2251 = vmatmul.mubr.f32.gmra.mrb[44].mxu1 %v1885_v58 }
 0x887   :  { %4625 = vmatpush1.bf16.msra.mxu0 %v6570_v42  ;;  %4657 = vmatpush1.bf16.msra.mxu1 %v6572_v26 }
 0x888   :  { %2143 = vmatprep.mubr.f32.mxu0 %v7528_v40  ;;  %2256 = vmatprep.mubr.f32.mxu1 %v7528_v40 }
 0x889   :  { %4627 = vmatprep.subr.bf16.mxu0 %v6582_v5  ;;  %4659 = vmatprep.subr.bf16.mxu1 %v6584_v32 }
 0x88a   :  { %2144 = vmatmul.mubr.f32.gmra.mrb[46].mxu0 %v1886_v63  ;;  %2257 = vmatmul.mubr.f32.gmra.mrb[46].mxu1 %v1886_v63 }
 0x88b   :  { %4629 = vmatpush1.bf16.msra.mxu0 %v6588_v19  ;;  %4661 = vmatpush1.bf16.msra.mxu1 %v6590_v24 }
 0x88c   :  { %2359 = vmatprep.mubr.f32.mxu0 %v7528_v40  ;;  %2430 = vmatprep.mubr.f32.mxu1 %v7528_v40 }
 0x88d   :  { %4663 = vmatprep.subr.bf16.mxu0 %v6441_v46  ;;  %4695 = vmatprep.subr.bf16.mxu1 %v6443_v56 }
 0x88e   :  { %2360 = vmatmul.mubr.f32.vlgmr.msra.gmra.mrb[48].mxu0 %v7528_v40  ;;  %2431 = vmatmul.mubr.f32.vlgmr.msra.gmra.mrb[48].mxu1 %v7528_v40 }
 0x88f   :  { %4665 = vmatpush1.bf16.msra.mxu0 %v6466_v11  ;;  %4697 = vmatpush1.bf16.msra.mxu1 %v6468_v15 }
 0x890   :  { %4667 = vmatprep.subr.bf16.mxu0 %v6474_v52  ;;  %4699 = vmatprep.subr.bf16.mxu1 %v6476_v60 }
 0x891   :  { %2529 = vmatprep.mubr.f32.mxu0 %v7528_v40  ;;  %2600 = vmatprep.mubr.f32.mxu1 %v7528_v40 }
 0x893   :  { %4669 = vmatpush1.bf16.msra.mxu0 %v6480_v51  ;;  %4701 = vmatpush1.bf16.msra.mxu1 %v6482_v59 }
 0x894   :  { %4671 = vmatprep.subr.bf16.mxu0 %v6492_v55  ;;  %4703 = vmatprep.subr.bf16.mxu1 %v6494_v7 }
 0x897   :  { %4673 = vmatpush1.bf16.msra.mxu0 %v6498_v36  ;;  %4705 = vmatpush1.bf16.msra.mxu1 %v6500_v13 }
 0x898   :  { %4675 = vmatprep.subr.bf16.mxu0 %v6510_v17  ;;  %4707 = vmatprep.subr.bf16.mxu1 %v6512_v45 }
 0x89b   :  { %4677 = vmatpush1.bf16.msra.mxu0 %v6516_v35  ;;  %4709 = vmatpush1.bf16.msra.mxu1 %v6518_v38 }
 0x89c   :  { %4679 = vmatprep.subr.bf16.mxu0 %v6528_v61  ;;  %4711 = vmatprep.subr.bf16.mxu1 %v6530_v2 }
 0x89f   :  { %4681 = vmatpush1.bf16.msra.mxu0 %v6534_v28  ;;  %4713 = vmatpush1.bf16.msra.mxu1 %v6536_v43 }
 0x8a0   :  { %4683 = vmatprep.subr.bf16.mxu0 %v6546_v31  ;;  %4715 = vmatprep.subr.bf16.mxu1 %v6548_v41 }
 0x8a3   :  { %4685 = vmatpush1.bf16.msra.mxu0 %v6552_v48  ;;  %4717 = vmatpush1.bf16.msra.mxu1 %v6554_v14 }
 0x8a4   :  { %4687 = vmatprep.subr.bf16.mxu0 %v6564_v23  ;;  %4719 = vmatprep.subr.bf16.mxu1 %v6566_v18 }
 0x8a7   :  { %4689 = vmatpush1.bf16.msra.mxu0 %v6570_v42  ;;  %4721 = vmatpush1.bf16.msra.mxu1 %v6572_v26 }
 0x8a8   :  { %4691 = vmatprep.subr.bf16.mxu0 %v6582_v5  ;;  %4723 = vmatprep.subr.bf16.mxu1 %v6584_v32 }
 0x8ab   :  { %4693 = vmatpush1.bf16.msra.mxu0 %v6588_v19  ;;  %4725 = vmatpush1.bf16.msra.mxu1 %v6590_v24 }
 0x8ac   :  { %4727 = vmatprep.subr.bf16.mxu0 %v6441_v46  ;;  %4759 = vmatprep.subr.bf16.mxu1 %v6443_v56 }
 0x941   :  { %v6645_v33 = vpop.f32.mrb[32].mxu0  ;;  %v6647_v0 = vpop.f32.mrb[32].mxu1 }
 0x942   :  { %v6649_v1 = vpop.f32.mrb[33].mxu0  ;;  %v6651_v4 = vpop.f32.mrb[33].mxu1 }
 0x945   :  { %v2109_v62 = vpop.f32.mrb[34].mxu0  ;;  %v2222_v30 = vpop.f32.mrb[34].mxu1 }
 0x946   :  { %v6670_v10 = vadd.f32 %v2109_v62, %v6655_v9  ;;  %v6673_v22 = vadd.f32 %v2222_v30, %v6659_v3  ;;  %v2111_v25 = vpop.f32.mrb[35].mxu0  ;;  %v2224_v29 = vpop.f32.mrb[35].mxu1 }
 0x947   :  { %v6676_v34 = vadd.f32 %v2111_v25, %v6663_v16  ;;  %v6679_v20 = vadd.f32 %v2224_v29, %v6667_v49 }
 0x948   :  { %7598 = vst [vmem:[#allocation22_spill] sm:$0xff] %v6673_v22 }
 0x949   :  { %7599 = vst [vmem:[#allocation18_spill] sm:$0xff] %v6676_v34  ;;  %7600 = vst [vmem:[#allocation21_spill] sm:$0xff] %v6679_v20  ;;  %v2115_v47 = vpop.f32.mrb[36].mxu0  ;;  %v2228_v50 = vpop.f32.mrb[36].mxu1 }
 0x94a   :  { %v2116_v54 = vadd.f32 %v2115_v47, %v6655_v9  ;;  %v6683_v58 = vadd.f32 %v2228_v50, %v6659_v3  ;;  %v2117_v63 = vpop.f32.mrb[37].mxu0  ;;  %v2230_v8 = vpop.f32.mrb[37].mxu1 }
 0x94b   :  { %v6686_v6 = vadd.f32 %v2117_v63, %v6663_v16  ;;  %v6689_v37 = vadd.f32 %v2230_v8, %v6667_v49 }
 0x94c   :  { %7601 = vst [vmem:[#allocation20_spill] sm:$0xff] %v6683_v58 }
 0x94d   :  { %7602 = vst [vmem:[#allocation23_spill] sm:$0xff] %v6686_v6  ;;  %7603 = vst [vmem:[#allocation25_spill] sm:$0xff] %v6689_v37  ;;  %v2121_v57 = vpop.f32.mrb[38].mxu0  ;;  %v2234_v27 = vpop.f32.mrb[38].mxu1 }
 0x94e   :  { %v2122_v12 = vadd.f32 %v2121_v57, %v6655_v9  ;;  %v6693_v62 = vadd.f32 %v2234_v27, %v6659_v3  ;;  %v2123_v30 = vpop.f32.mrb[39].mxu0  ;;  %v2236_v25 = vpop.f32.mrb[39].mxu1 }
 0x94f   :  { %v6696_v29 = vadd.f32 %v2123_v30, %v6663_v16  ;;  %v6699_v47 = vadd.f32 %v2236_v25, %v6667_v49 }
 0x950   :  { %7604 = vst [vmem:[#allocation29_spill] sm:$0xff] %v6693_v62 }
 0x951   :  { %7605 = vst [vmem:[#allocation26_spill] sm:$0xff] %v6696_v29  ;;  %7606 = vst [vmem:[#allocation16_spill] sm:$0xff] %v6699_v47  ;;  %v2127_v50 = vpop.f32.mrb[40].mxu0  ;;  %v2240_v63 = vpop.f32.mrb[40].mxu1  ;;  %v6833_v29 = vadd.f32 %v6647_v0, %v6659_v3 }
 0x952   :  { %v2128_v8 = vadd.f32 %v2127_v50, %v6655_v9  ;;  %v6703_v56 = vadd.f32 %v2240_v63, %v6659_v3  ;;  %v2129_v46 = vpop.f32.mrb[41].mxu0  ;;  %v2242_v57 = vpop.f32.mrb[41].mxu1 }
 0x953   :  { %v6706_v27 = vadd.f32 %v2129_v46, %v6663_v16  ;;  %v6709_v24 = vadd.f32 %v2242_v57, %v6667_v49  ;;  %7621 = vst [vmem:[#allocation39_spill] sm:$0xff] %v6833_v29 }
 0x954   :  { %7607 = vst [vmem:[#allocation28_spill] sm:$0xff] %v6703_v56  ;;  %v6713_v30 = vsel %vm129_vm1, %v2122_v12, %v2128_v8  ;;  %v6721_v50 = vsel %vm129_vm1, %v2128_v8, %v2122_v12 }
 0x955   :  { %7608 = vst [vmem:[#allocation17_spill] sm:$0xff] %v6706_v27  ;;  %7609 = vst [vmem:[#allocation33_spill] sm:$0xff] %v6709_v24  ;;  %v2133_v63 = vpop.f32.mrb[42].mxu0  ;;  %v2246_v57 = vpop.f32.mrb[42].mxu1 }
 0x956   :  { %7610 = vst [vmem:[#allocation30_spill] sm:$0xff] %v6713_v30  ;;  %7611 = vst [vmem:[#allocation14_spill] sm:$0xff] %v6721_v50  ;;  %v2134_v46 = vadd.f32 %v2133_v63, %v6655_v9  ;;  %v6745_v50 = vadd.f32 %v2246_v57, %v6659_v3  ;;  %v2135_v30 = vpop.f32.mrb[43].mxu0  ;;  %v2248_v56 = vpop.f32.mrb[43].mxu1 }
 0x957   :  { %v6748_v62 = vadd.f32 %v2135_v30, %v6663_v16  ;;  %v6751_v25 = vadd.f32 %v2248_v56, %v6667_v49 }
 0x958   :  { %7612 = vst [vmem:[#allocation31_spill] sm:$0xff] %v6745_v50  ;;  %v6755_v12 = vsel %vm129_vm1, %v2116_v54, %v2134_v46  ;;  %v6763_v57 = vsel %vm129_vm1, %v2134_v46, %v2116_v54 }
 0x959   :  { %7613 = vst [vmem:[#allocation13_spill] sm:$0xff] %v6748_v62  ;;  %7614 = vst [vmem:[#allocation32_spill] sm:$0xff] %v6751_v25  ;;  %v2139_v56 = vpop.f32.mrb[44].mxu0  ;;  %v2252_v8 = vpop.f32.mrb[44].mxu1 }
 0x95a   :  { %7615 = vst [vmem:[#allocation15_spill] sm:$0xff] %v6755_v12  ;;  %7616 = vst [vmem:[#allocation40_spill] sm:$0xff] %v6763_v57  ;;  %v2140_v30 = vadd.f32 %v2139_v56, %v6655_v9  ;;  %v6787_v57 = vadd.f32 %v2252_v8, %v6659_v3  ;;  %v2141_v24 = vpop.f32.mrb[45].mxu0  ;;  %v2254_v47 = vpop.f32.mrb[45].mxu1 }
 0x95b   :  { %v6790_v27 = vadd.f32 %v2141_v24, %v6663_v16  ;;  %v6793_v63 = vadd.f32 %v2254_v47, %v6667_v49  ;;  %v2104_v24 = vadd.f32 %v6645_v33, %v6655_v9 }
 0x95c   :  { %7617 = vst [vmem:[#allocation36_spill] sm:$0xff] %v6787_v57  ;;  %v6798_v54 = vsel %vm129_vm1, %v6670_v10, %v2140_v30  ;;  %v6807_v8 = vsel %vm129_vm1, %v2140_v30, %v6670_v10  ;;  %v6841_v10 = vadd.f32 %v6649_v1, %v6663_v16  ;;  %v6845_v30 = vadd.f32 %v6651_v4, %v6667_v49 }
 0x95d   :  { %7618 = vst [vmem:[#allocation35_spill] sm:$0xff] %v6790_v27  ;;  %7619 = vst [vmem:[#allocation37_spill] sm:$0xff] %v6793_v63  ;;  %v2145_v47 = vpop.f32.mrb[46].mxu0  ;;  %v2258_v46 = vpop.f32.mrb[46].mxu1 }
 0x95e   :  { %7620 = vst [vmem:[#allocation34_spill] sm:$0xff] %v6807_v8  ;;  %v2146_v8 = vadd.f32 %v2145_v47, %v6655_v9  ;;  %v6837_v56 = vadd.f32 %v2258_v46, %v6659_v3  ;;  %v2147_v25 = vpop.f32.mrb[47].mxu0  ;;  %v2260_v37 = vpop.f32.mrb[47].mxu1  ;;  %7623 = vst [vmem:[#allocation41_spill] sm:$0xff] %v6841_v10 }
 0x95f   :  { %7624 = vst [vmem:[#allocation9_spill] sm:$0xff] %v6845_v30  ;;  %v6848_v33 = vadd.f32 %v2147_v25, %v6663_v16  ;;  %v6851_v0 = vadd.f32 %v2260_v37, %v6667_v49 }
 0x960   :  { %7622 = vst [vmem:[#allocation38_spill] sm:$0xff] %v6837_v56  ;;  %v2263_v9 = vsel %vm129_vm1, %v2104_v24, %v2146_v8  ;;  %v2265_v3 = vsel %vm5897_vm3, %v6833_v29, %v6837_v56  ;;  %v6861_v1 = vsel %vm129_vm1, %v2146_v8, %v2104_v24 }
 0x961   :  { %7625 = vst [vmem:[#allocation10_spill] sm:$0xff] %v6848_v33  ;;  %7626 = vst [vmem:[#allocation11_spill] sm:$0xff] %v6851_v0  ;;  %v2361_v16 = vpop.f32.mrb[48].mxu0  ;;  %v2432_v49 = vpop.f32.mrb[48].mxu1  ;;  %v2264_v37 = vsel %vm5892_vm2, %v6841_v10, %v6848_v33  ;;  %v2266_v25 = vsel %vm5907_vm4, %v6845_v30, %v6851_v0 }
 0x962   :  { %7627 = vst [vmem:[#allocation42_spill] sm:$0xff] %v6861_v1  ;;  %v2437_v24 = vadd.f32 %v2361_v16, %v2263_v9  ;;  %v2439_v47 = vadd.f32 %v2432_v49, %v2265_v3  ;;  %v2363_v4 = vpop.f32.mrb[49].mxu0  ;;  %v2434_v29 = vpop.f32.mrb[49].mxu1 }
 0x963   :  { %v2438_v56 = vadd.f32 %v2363_v4, %v2264_v37  ;;  %v2440_v1 = vadd.f32 %v2434_v29, %v2266_v25 }
 0x964   :  { %v3936_v39 = vmul.f32 -1.442695, %v2437_v24 }
 0x965   :  { %v3937_v62 = vmul.f32 -1.442695, %v2438_v56  ;;  %v3938_v6 = vmul.f32 -1.442695, %v2440_v1 }
 0x966   :  { %5273 = vpow2.f32 %v3936_v39 }
 0x967   :  { %5275 = vpow2.f32 %v3937_v62 }
 0x968   :  { %5277 = vpow2.f32 %v3938_v6  ;;  %v7630_v6 = vld [vmem:[#allocation27_spill] sm:$0xff] }
 0x969   :  { %5279 = vtanh.f32 %v2439_v47 }
 0x970   :  { %v5274_v50 = vpop.eup %5273 }
 0x971   :  { %v5276_v58 = vpop.eup %5275  ;;  %v2444_v12 = vadd.f32 1.0, %v5274_v50 }
 0x972   :  { %v2450_v46 = vadd.f32 1.0, %v5276_v58  ;;  %v5278_v8 = vpop.eup %5277  ;;  %v7629_v58 = vld [vmem:[#allocation19_spill] sm:$0xff] }
 0x973   :  { %5281 = vrcp.f32 %v2444_v12  ;;  %v5280_v9 = vpop.eup %5279  ;;  %v2457_v4 = vadd.f32 1.0, %v5278_v8  ;;  %v7631_v12 = vld [vmem:[#allocation24_spill] sm:$0xff] }
 0x974   :  { %5283 = vrcp.f32 %v2450_v46  ;;  %v7632_v46 = vsel %vm5897_vm3, %v6673_v22, %v6787_v57 }
 0x975   :  { %5285 = vrcp.f32 %v2457_v4 }
 0x97d   :  { %v5282_v3 = vpop.eup %5281 }
 0x97e   :  { %v5284_v16 = vpop.eup %5283  ;;  %v2461_v49 = vmul.f32 %v5282_v3, %v5280_v9  ;;  %v7633_v9 = vsel %vm5892_vm2, %v6676_v34, %v6790_v27 }
 0x97f   :  { %v2460_v29 = vmul.f32 0.0, %v5284_v16  ;;  %v5286_v39 = vpop.eup %5285  ;;  %v7634_v16 = vsel %vm5907_vm4, %v6679_v20, %v6793_v63 }
 0x981   :  { %v6883_v37 = vadd.f32 %v2461_v49, %v2460_v29 }
 0x983   :  { %5287 = vtanh.f32 %v6883_v37 }
 0x98d   :  { %v5288_v62 = vpop.eup %5287 }
 0x98e   :  { %v6886_v50 = vmul.f32 %v5288_v62, %v5286_v39 }
 0x990   :  { %7628 = vst [vmem:[#allocation43_spill] sm:$0xff] %v6886_v50  ;;  %2530 = vmatmul.mubr.f32.vlgmr.msra.gmra.mrb[50].mxu0 %v6886_v50  ;;  %2601 = vmatmul.mubr.f32.vlgmr.msra.gmra.mrb[50].mxu1 %v6886_v50 }
 0x991   :  { %4729 = vmatpush1.bf16.msra.mxu0 %v6466_v11  ;;  %4761 = vmatpush1.bf16.msra.mxu1 %v6468_v15 }
 0x992   :  { %4731 = vmatprep.subr.bf16.mxu0 %v6474_v52  ;;  %4763 = vmatprep.subr.bf16.mxu1 %v6476_v60 }
 0x993   :  { %2699 = vmatprep.mubr.f32.mxu0 %v7528_v40  ;;  %2770 = vmatprep.mubr.f32.mxu1 %v7528_v40 }
 0x995   :  { %4733 = vmatpush1.bf16.msra.mxu0 %v6480_v51  ;;  %4765 = vmatpush1.bf16.msra.mxu1 %v6482_v59 }
 0x996   :  { %4735 = vmatprep.subr.bf16.mxu0 %v6492_v55  ;;  %4767 = vmatprep.subr.bf16.mxu1 %v6494_v7 }
 0x999   :  { %4737 = vmatpush1.bf16.msra.mxu0 %v6498_v36  ;;  %4769 = vmatpush1.bf16.msra.mxu1 %v6500_v13 }
 0x99a   :  { %4739 = vmatprep.subr.bf16.mxu0 %v6510_v17  ;;  %4771 = vmatprep.subr.bf16.mxu1 %v6512_v45 }
 0x99d   :  { %4741 = vmatpush1.bf16.msra.mxu0 %v6516_v35  ;;  %4773 = vmatpush1.bf16.msra.mxu1 %v6518_v38 }
 0x99e   :  { %4743 = vmatprep.subr.bf16.mxu0 %v6528_v61  ;;  %4775 = vmatprep.subr.bf16.mxu1 %v6530_v2 }
 0x9a1   :  { %4745 = vmatpush1.bf16.msra.mxu0 %v6534_v28  ;;  %4777 = vmatpush1.bf16.msra.mxu1 %v6536_v43 }
 0x9a2   :  { %4747 = vmatprep.subr.bf16.mxu0 %v6546_v31  ;;  %4779 = vmatprep.subr.bf16.mxu1 %v6548_v41 }
 0x9a5   :  { %4749 = vmatpush1.bf16.msra.mxu0 %v6552_v48  ;;  %4781 = vmatpush1.bf16.msra.mxu1 %v6554_v14 }
 0x9a6   :  { %4751 = vmatprep.subr.bf16.mxu0 %v6564_v23  ;;  %4783 = vmatprep.subr.bf16.mxu1 %v6566_v18 }
 0x9a9   :  { %4753 = vmatpush1.bf16.msra.mxu0 %v6570_v42  ;;  %4785 = vmatpush1.bf16.msra.mxu1 %v6572_v26 }
 0x9aa   :  { %4755 = vmatprep.subr.bf16.mxu0 %v6582_v5  ;;  %4787 = vmatprep.subr.bf16.mxu1 %v6584_v32 }
 0x9ad   :  { %4757 = vmatpush1.bf16.msra.mxu0 %v6588_v19  ;;  %4789 = vmatpush1.bf16.msra.mxu1 %v7629_v58 }
 0x9ae   :  { %4791 = vmatprep.subr.bf16.mxu0 %v7630_v6  ;;  %4823 = vmatprep.subr.bf16.mxu1 %v7631_v12 }
 0xa63   :  { %v2531_v56 = vpop.f32.mrb[50].mxu0  ;;  %v2602_v1 = vpop.f32.mrb[50].mxu1 }
 0xa64   :  { %v2607_v25 = vadd.f32 %v2531_v56, %v6798_v54  ;;  %v2609_v8 = vadd.f32 %v2602_v1, %v7632_v46  ;;  %v2533_v24 = vpop.f32.mrb[51].mxu0  ;;  %v2604_v47 = vpop.f32.mrb[51].mxu1 }
 0xa65   :  { %v2608_v3 = vadd.f32 %v2533_v24, %v7633_v9  ;;  %v2610_v54 = vadd.f32 %v2604_v47, %v7634_v16 }
 0xa66   :  { %v3939_v49 = vmul.f32 -1.442695, %v2607_v25 }
 0xa67   :  { %v3940_v4 = vmul.f32 -1.442695, %v2608_v3  ;;  %v3941_v29 = vmul.f32 -1.442695, %v2610_v54 }
 0xa68   :  { %5289 = vpow2.f32 %v3939_v49  ;;  %v7638_v49 = vld [vmem:[#allocation31_spill] sm:$0xff] }
 0xa69   :  { %5291 = vpow2.f32 %v3940_v4 }
 0xa6a   :  { %5293 = vpow2.f32 %v3941_v29 }
 0xa6b   :  { %5295 = vtanh.f32 %v2609_v8  ;;  %v7637_v8 = vld [vmem:[#allocation20_spill] sm:$0xff] }
 0xa6c   :  { %v7639_v4 = vsel %vm5897_vm3, %v7637_v8, %v7638_v49 }
 0xa72   :  { %v5290_v39 = vpop.eup %5289 }
 0xa73   :  { %v5292_v62 = vpop.eup %5291  ;;  %v2614_v56 = vadd.f32 1.0, %v5290_v39 }
 0xa74   :  { %v2620_v1 = vadd.f32 1.0, %v5292_v62  ;;  %v5294_v46 = vpop.eup %5293 }
 0xa75   :  { %5297 = vrcp.f32 %v2614_v56  ;;  %v5296_v24 = vpop.eup %5295  ;;  %v2627_v0 = vadd.f32 1.0, %v5294_v46  ;;  %v7640_v56 = vld [vmem:[#allocation23_spill] sm:$0xff] }
 0xa76   :  { %5299 = vrcp.f32 %v2620_v1  ;;  %v7641_v1 = vld [vmem:[#allocation13_spill] sm:$0xff] }
 0xa77   :  { %5301 = vrcp.f32 %v2627_v0  ;;  %v7642_v46 = vsel %vm5892_vm2, %v7640_v56, %v7641_v1 }
 0xa7f   :  { %v5298_v9 = vpop.eup %5297 }
 0xa80   :  { %v5300_v50 = vpop.eup %5299  ;;  %v2631_v30 = vmul.f32 %v5298_v9, %v5296_v24  ;;  %v7643_v9 = vld [vmem:[#allocation25_spill] sm:$0xff] }
 0xa81   :  { %v2630_v25 = vmul.f32 %v5300_v50, %v6883_v37  ;;  %v5302_v3 = vpop.eup %5301  ;;  %v7636_v37 = vld [vmem:[#allocation15_spill] sm:$0xff] }
 0xa83   :  { %v6941_v47 = vadd.f32 %v2631_v30, %v2630_v25  ;;  %v7644_v25 = vld [vmem:[#allocation32_spill] sm:$0xff] }
 0xa85   :  { %5303 = vtanh.f32 %v6941_v47 }
 0xa8f   :  { %v5304_v16 = vpop.eup %5303 }
 0xa90   :  { %v6944_v54 = vmul.f32 %v5304_v16, %v5302_v3  ;;  %v7645_v3 = vsel %vm5907_vm4, %v7643_v9, %v7644_v25 }
 0xa92   :  { %7635 = vst [vmem:[#allocation19_spill] sm:$0xff] %v6944_v54  ;;  %2700 = vmatmul.mubr.f32.vlgmr.msra.gmra.mrb[52].mxu0 %v6944_v54  ;;  %2771 = vmatmul.mubr.f32.vlgmr.msra.gmra.mrb[52].mxu1 %v6944_v54 }
 0xa93   :  { %4793 = vmatpush1.bf16.msra.mxu0 %v6466_v11  ;;  %4825 = vmatpush1.bf16.msra.mxu1 %v6468_v15 }
 0xa94   :  { %4795 = vmatprep.subr.bf16.mxu0 %v6474_v52  ;;  %4827 = vmatprep.subr.bf16.mxu1 %v6476_v60 }
 0xa95   :  { %2869 = vmatprep.mubr.f32.mxu0 %v7528_v40  ;;  %2940 = vmatprep.mubr.f32.mxu1 %v7528_v40 }
 0xa97   :  { %4797 = vmatpush1.bf16.msra.mxu0 %v6480_v51  ;;  %4829 = vmatpush1.bf16.msra.mxu1 %v6482_v59 }
 0xa98   :  { %4799 = vmatprep.subr.bf16.mxu0 %v6492_v55  ;;  %4831 = vmatprep.subr.bf16.mxu1 %v6494_v7 }
 0xa9b   :  { %4801 = vmatpush1.bf16.msra.mxu0 %v6498_v36  ;;  %4833 = vmatpush1.bf16.msra.mxu1 %v6500_v13 }
 0xa9c   :  { %4803 = vmatprep.subr.bf16.mxu0 %v6510_v17  ;;  %4835 = vmatprep.subr.bf16.mxu1 %v6512_v45 }
 0xa9f   :  { %4805 = vmatpush1.bf16.msra.mxu0 %v6516_v35  ;;  %4837 = vmatpush1.bf16.msra.mxu1 %v6518_v38 }
 0xaa0   :  { %4807 = vmatprep.subr.bf16.mxu0 %v6528_v61  ;;  %4839 = vmatprep.subr.bf16.mxu1 %v6530_v2 }
 0xaa3   :  { %4809 = vmatpush1.bf16.msra.mxu0 %v6534_v28  ;;  %4841 = vmatpush1.bf16.msra.mxu1 %v6536_v43 }
 0xaa4   :  { %4811 = vmatprep.subr.bf16.mxu0 %v6546_v31  ;;  %4843 = vmatprep.subr.bf16.mxu1 %v6548_v41 }
 0xaa7   :  { %4813 = vmatpush1.bf16.msra.mxu0 %v6552_v48  ;;  %4845 = vmatpush1.bf16.msra.mxu1 %v6554_v14 }
 0xaa8   :  { %4815 = vmatprep.subr.bf16.mxu0 %v6564_v23  ;;  %4847 = vmatprep.subr.bf16.mxu1 %v6566_v18 }
 0xaab   :  { %4817 = vmatpush1.bf16.msra.mxu0 %v6570_v42  ;;  %4849 = vmatpush1.bf16.msra.mxu1 %v6572_v26 }
 0xaac   :  { %4819 = vmatprep.subr.bf16.mxu0 %v6582_v5  ;;  %4851 = vmatprep.subr.bf16.mxu1 %v6584_v32 }
 0xaaf   :  { %4821 = vmatpush1.bf16.msra.mxu0 %v6588_v19  ;;  %4853 = vmatpush1.bf16.msra.mxu1 %v7629_v58 }
 0xab0   :  { %4855 = vmatprep.subr.bf16.mxu0 %v7630_v6  ;;  %4887 = vmatprep.subr.bf16.mxu1 %v7631_v12 }
 0xb65   :  { %v2701_v30 = vpop.f32.mrb[52].mxu0  ;;  %v2772_v0 = vpop.f32.mrb[52].mxu1 }
 0xb66   :  { %v2777_v50 = vadd.f32 %v2701_v30, %v7636_v37  ;;  %v2779_v29 = vadd.f32 %v2772_v0, %v7639_v4  ;;  %v2703_v39 = vpop.f32.mrb[53].mxu0  ;;  %v2774_v62 = vpop.f32.mrb[53].mxu1 }
 0xb67   :  { %v2778_v24 = vadd.f32 %v2703_v39, %v7642_v46  ;;  %v2780_v16 = vadd.f32 %v2774_v62, %v7645_v3 }
 0xb68   :  { %v3942_v30 = vmul.f32 -1.442695, %v2777_v50 }
 0xb69   :  { %v3943_v37 = vmul.f32 -1.442695, %v2778_v24  ;;  %v3944_v54 = vmul.f32 -1.442695, %v2780_v16 }
 0xb6a   :  { %5305 = vpow2.f32 %v3942_v30 }
 0xb6b   :  { %5307 = vpow2.f32 %v3943_v37  ;;  %v7651_v37 = vld [vmem:[#allocation26_spill] sm:$0xff] }
 0xb6c   :  { %5309 = vpow2.f32 %v3944_v54 }
 0xb6d   :  { %5311 = vtanh.f32 %v2779_v29 }
 0xb74   :  { %v5306_v0 = vpop.eup %5305 }
 0xb75   :  { %v5308_v4 = vpop.eup %5307  ;;  %v2784_v10 = vadd.f32 1.0, %v5306_v0  ;;  %v7652_v0 = vld [vmem:[#allocation17_spill] sm:$0xff] }
 0xb76   :  { %v2790_v33 = vadd.f32 1.0, %v5308_v4  ;;  %v5310_v39 = vpop.eup %5309  ;;  %v7653_v4 = vsel %vm5892_vm2, %v7651_v37, %v7652_v0 }
 0xb77   :  { %5313 = vrcp.f32 %v2784_v10  ;;  %v5312_v46 = vpop.eup %5311  ;;  %v2797_v27 = vadd.f32 1.0, %v5310_v39  ;;  %v7648_v10 = vld [vmem:[#allocation29_spill] sm:$0xff] }
 0xb78   :  { %5315 = vrcp.f32 %v2790_v33  ;;  %v7649_v33 = vld [vmem:[#allocation28_spill] sm:$0xff] }
 0xb79   :  { %5317 = vrcp.f32 %v2797_v27  ;;  %v7647_v27 = vld [vmem:[#allocation30_spill] sm:$0xff] }
 0xb81   :  { %v5314_v20 = vpop.eup %5313 }
 0xb82   :  { %v5316_v63 = vpop.eup %5315  ;;  %v2801_v34 = vmul.f32 %v5314_v20, %v5312_v46  ;;  %v7654_v46 = vld [vmem:[#allocation16_spill] sm:$0xff] }
 0xb83   :  { %v2800_v50 = vmul.f32 %v5316_v63, %v6941_v47  ;;  %v5318_v24 = vpop.eup %5317  ;;  %v7650_v47 = vsel %vm5897_vm3, %v7648_v10, %v7649_v33 }
 0xb85   :  { %v6999_v62 = vadd.f32 %v2801_v34, %v2800_v50  ;;  %v7655_v50 = vld [vmem:[#allocation33_spill] sm:$0xff] }
 0xb87   :  { %5319 = vtanh.f32 %v6999_v62 }
 0xb91   :  { %v5320_v3 = vpop.eup %5319 }
 0xb92   :  { %v7002_v54 = vmul.f32 %v5320_v3, %v5318_v24  ;;  %v7656_v24 = vsel %vm5907_vm4, %v7654_v46, %v7655_v50 }
 0xb94   :  { %7646 = vst [vmem:[#allocation27_spill] sm:$0xff] %v7002_v54  ;;  %2870 = vmatmul.mubr.f32.vlgmr.msra.gmra.mrb[54].mxu0 %v7002_v54  ;;  %2941 = vmatmul.mubr.f32.vlgmr.msra.gmra.mrb[54].mxu1 %v7002_v54 }
 0xb95   :  { %4857 = vmatpush1.bf16.msra.mxu0 %v6466_v11  ;;  %4889 = vmatpush1.bf16.msra.mxu1 %v6468_v15 }
 0xb96   :  { %4859 = vmatprep.subr.bf16.mxu0 %v6474_v52  ;;  %4891 = vmatprep.subr.bf16.mxu1 %v6476_v60 }
 0xb97   :  { %3039 = vmatprep.mubr.f32.mxu0 %v7528_v40  ;;  %3110 = vmatprep.mubr.f32.mxu1 %v7528_v40 }
 0xb99   :  { %4861 = vmatpush1.bf16.msra.mxu0 %v6480_v51  ;;  %4893 = vmatpush1.bf16.msra.mxu1 %v6482_v59 }
 0xb9a   :  { %4863 = vmatprep.subr.bf16.mxu0 %v6492_v55  ;;  %4895 = vmatprep.subr.bf16.mxu1 %v6494_v7 }
 0xb9d   :  { %4865 = vmatpush1.bf16.msra.mxu0 %v6498_v36  ;;  %4897 = vmatpush1.bf16.msra.mxu1 %v6500_v13 }
 0xb9e   :  { %4867 = vmatprep.subr.bf16.mxu0 %v6510_v17  ;;  %4899 = vmatprep.subr.bf16.mxu1 %v6512_v45 }
 0xba1   :  { %4869 = vmatpush1.bf16.msra.mxu0 %v6516_v35  ;;  %4901 = vmatpush1.bf16.msra.mxu1 %v6518_v38 }
 0xba2   :  { %4871 = vmatprep.subr.bf16.mxu0 %v6528_v61  ;;  %4903 = vmatprep.subr.bf16.mxu1 %v6530_v2 }
 0xba5   :  { %4873 = vmatpush1.bf16.msra.mxu0 %v6534_v28  ;;  %4905 = vmatpush1.bf16.msra.mxu1 %v6536_v43 }
 0xba6   :  { %4875 = vmatprep.subr.bf16.mxu0 %v6546_v31  ;;  %4907 = vmatprep.subr.bf16.mxu1 %v6548_v41 }
 0xba9   :  { %4877 = vmatpush1.bf16.msra.mxu0 %v6552_v48  ;;  %4909 = vmatpush1.bf16.msra.mxu1 %v6554_v14 }
 0xbaa   :  { %4879 = vmatprep.subr.bf16.mxu0 %v6564_v23  ;;  %4911 = vmatprep.subr.bf16.mxu1 %v6566_v18 }
 0xbad   :  { %4881 = vmatpush1.bf16.msra.mxu0 %v6570_v42  ;;  %4913 = vmatpush1.bf16.msra.mxu1 %v6572_v26 }
 0xbae   :  { %4883 = vmatprep.subr.bf16.mxu0 %v6582_v5  ;;  %4915 = vmatprep.subr.bf16.mxu1 %v6584_v32 }
 0xbb1   :  { %4885 = vmatpush1.bf16.msra.mxu0 %v6588_v19  ;;  %4917 = vmatpush1.bf16.msra.mxu1 %v7629_v58 }
 0xbb2   :  { %4919 = vmatprep.subr.bf16.mxu0 %v7630_v6  ;;  %4951 = vmatprep.subr.bf16.mxu1 %v7631_v12 }
 0xc67   :  { %v2871_v34 = vpop.f32.mrb[54].mxu0  ;;  %v2942_v20 = vpop.f32.mrb[54].mxu1 }
 0xc68   :  { %v2947_v63 = vadd.f32 %v2871_v34, %v7647_v27  ;;  %v2949_v29 = vadd.f32 %v2942_v20, %v7650_v47  ;;  %v2873_v16 = vpop.f32.mrb[55].mxu0  ;;  %v2944_v30 = vpop.f32.mrb[55].mxu1 }
 0xc69   :  { %v2948_v39 = vadd.f32 %v2873_v16, %v7653_v4  ;;  %v2950_v3 = vadd.f32 %v2944_v30, %v7656_v24 }
 0xc6a   :  { %v3945_v34 = vmul.f32 -1.442695, %v2947_v63 }
 0xc6b   :  { %v3946_v27 = vmul.f32 -1.442695, %v2948_v39  ;;  %v3947_v22 = vmul.f32 -1.442695, %v2950_v3  ;;  %v7659_v3 = vsel %vm5892_vm2, %v7652_v0, %v7651_v37 }
 0xc6c   :  { %5321 = vpow2.f32 %v3945_v34 }
 0xc6d   :  { %5323 = vpow2.f32 %v3946_v27  ;;  %v7660_v27 = vsel %vm5907_vm4, %v7655_v50, %v7654_v46 }
 0xc6e   :  { %5325 = vpow2.f32 %v3947_v22 }
 0xc6f   :  { %5327 = vtanh.f32 %v2949_v29 }
 0xc76   :  { %v5322_v20 = vpop.eup %5321 }
 0xc77   :  { %v5324_v47 = vpop.eup %5323  ;;  %v2954_v57 = vadd.f32 1.0, %v5322_v20 }
 0xc78   :  { %v2960_v54 = vadd.f32 1.0, %v5324_v47  ;;  %v5326_v16 = vpop.eup %5325 }
 0xc79   :  { %5329 = vrcp.f32 %v2954_v57  ;;  %v5328_v4 = vpop.eup %5327  ;;  %v2967_v1 = vadd.f32 1.0, %v5326_v16 }
 0xc7a   :  { %5331 = vrcp.f32 %v2960_v54 }
 0xc7b   :  { %5333 = vrcp.f32 %v2967_v1  ;;  %v7657_v1 = vld [vmem:[#allocation14_spill] sm:$0xff] }
 0xc83   :  { %v5330_v9 = vpop.eup %5329 }
 0xc84   :  { %v5332_v25 = vpop.eup %5331  ;;  %v2971_v56 = vmul.f32 %v5330_v9, %v5328_v4 }
 0xc85   :  { %v2970_v63 = vmul.f32 %v5332_v25, %v6999_v62  ;;  %v5334_v39 = vpop.eup %5333  ;;  %v7658_v25 = vsel %vm5897_vm3, %v7649_v33, %v7648_v10 }
 0xc87   :  { %v7057_v30 = vadd.f32 %v2971_v56, %v2970_v63 }
 0xc89   :  { %5335 = vtanh.f32 %v7057_v30 }
 0xc93   :  { %v5336_v24 = vpop.eup %5335 }
 0xc94   :  { %v7060_v22 = vmul.f32 %v5336_v24, %v5334_v39 }
 0xc96   :  { %3040 = vmatmul.mubr.f32.vlgmr.msra.gmra.mrb[56].mxu0 %v7060_v22  ;;  %3111 = vmatmul.mubr.f32.vlgmr.msra.gmra.mrb[56].mxu1 %v7060_v22 }
 0xc97   :  { %4921 = vmatpush1.bf16.msra.mxu0 %v6466_v11  ;;  %4953 = vmatpush1.bf16.msra.mxu1 %v6468_v15 }
 0xc98   :  { %4923 = vmatprep.subr.bf16.mxu0 %v6474_v52  ;;  %4955 = vmatprep.subr.bf16.mxu1 %v6476_v60 }
 0xc99   :  { %3209 = vmatprep.mubr.f32.mxu0 %v7528_v40  ;;  %3280 = vmatprep.mubr.f32.mxu1 %v7528_v40 }
 0xc9b   :  { %4925 = vmatpush1.bf16.msra.mxu0 %v6480_v51  ;;  %4957 = vmatpush1.bf16.msra.mxu1 %v6482_v59 }
 0xc9c   :  { %4927 = vmatprep.subr.bf16.mxu0 %v6492_v55  ;;  %4959 = vmatprep.subr.bf16.mxu1 %v6494_v7 }
 0xc9f   :  { %4929 = vmatpush1.bf16.msra.mxu0 %v6498_v36  ;;  %4961 = vmatpush1.bf16.msra.mxu1 %v6500_v13 }
 0xca0   :  { %4931 = vmatprep.subr.bf16.mxu0 %v6510_v17  ;;  %4963 = vmatprep.subr.bf16.mxu1 %v6512_v45 }
 0xca3   :  { %4933 = vmatpush1.bf16.msra.mxu0 %v6516_v35  ;;  %4965 = vmatpush1.bf16.msra.mxu1 %v6518_v38 }
 0xca4   :  { %4935 = vmatprep.subr.bf16.mxu0 %v6528_v61  ;;  %4967 = vmatprep.subr.bf16.mxu1 %v6530_v2 }
 0xca7   :  { %4937 = vmatpush1.bf16.msra.mxu0 %v6534_v28  ;;  %4969 = vmatpush1.bf16.msra.mxu1 %v6536_v43 }
 0xca8   :  { %4939 = vmatprep.subr.bf16.mxu0 %v6546_v31  ;;  %4971 = vmatprep.subr.bf16.mxu1 %v6548_v41 }
 0xcab   :  { %4941 = vmatpush1.bf16.msra.mxu0 %v6552_v48  ;;  %4973 = vmatpush1.bf16.msra.mxu1 %v6554_v14 }
 0xcac   :  { %4943 = vmatprep.subr.bf16.mxu0 %v6564_v23  ;;  %4975 = vmatprep.subr.bf16.mxu1 %v6566_v18 }
 0xcaf   :  { %4945 = vmatpush1.bf16.msra.mxu0 %v6570_v42  ;;  %4977 = vmatpush1.bf16.msra.mxu1 %v6572_v26 }
 0xcb0   :  { %4947 = vmatprep.subr.bf16.mxu0 %v6582_v5  ;;  %4979 = vmatprep.subr.bf16.mxu1 %v6584_v32 }
 0xcb3   :  { %4949 = vmatpush1.bf16.msra.mxu0 %v6588_v19  ;;  %4981 = vmatpush1.bf16.msra.mxu1 %v7629_v58 }
 0xcb4   :  { %4983 = vmatprep.subr.bf16.mxu0 %v7630_v6  ;;  %5015 = vmatprep.subr.bf16.mxu1 %v7631_v12 }
 0xd69   :  { %v3041_v57 = vpop.f32.mrb[56].mxu0  ;;  %v3112_v56 = vpop.f32.mrb[56].mxu1 }
 0xd6a   :  { %v3117_v9 = vadd.f32 %v3041_v57, %v7657_v1  ;;  %v3119_v62 = vadd.f32 %v3112_v56, %v7658_v25  ;;  %v3043_v54 = vpop.f32.mrb[57].mxu0  ;;  %v3114_v29 = vpop.f32.mrb[57].mxu1 }
 0xd6b   :  { %v3118_v34 = vadd.f32 %v3043_v54, %v7659_v3  ;;  %v3120_v20 = vadd.f32 %v3114_v29, %v7660_v27  ;;  %v7661_v29 = vld [vmem:[#allocation40_spill] sm:$0xff] }
 0xd6c   :  { %v3948_v47 = vmul.f32 -1.442695, %v3117_v9 }
 0xd6d   :  { %v3949_v16 = vmul.f32 -1.442695, %v3118_v34  ;;  %v3950_v10 = vmul.f32 -1.442695, %v3120_v20  ;;  %v7662_v34 = vsel %vm5897_vm3, %v7638_v49, %v7637_v8 }
 0xd6e   :  { %5337 = vpow2.f32 %v3948_v47 }
 0xd6f   :  { %5339 = vpow2.f32 %v3949_v16  ;;  %v7663_v16 = vld [vmem:[#allocation13_spill] sm:$0xff] }
 0xd70   :  { %5341 = vpow2.f32 %v3950_v10  ;;  %v7664_v10 = vld [vmem:[#allocation23_spill] sm:$0xff] }
 0xd71   :  { %5343 = vtanh.f32 %v3119_v62 }
 0xd78   :  { %v5338_v33 = vpop.eup %5337 }
 0xd79   :  { %v5340_v4 = vpop.eup %5339  ;;  %v3124_v63 = vadd.f32 1.0, %v5338_v33  ;;  %v7665_v33 = vsel %vm5892_vm2, %v7663_v16, %v7664_v10 }
 0xd7a   :  { %v3130_v39 = vadd.f32 1.0, %v5340_v4  ;;  %v5342_v37 = vpop.eup %5341  ;;  %v7667_v4 = vld [vmem:[#allocation25_spill] sm:$0xff] }
 0xd7b   :  { %5345 = vrcp.f32 %v3124_v63  ;;  %v5344_v0 = vpop.eup %5343  ;;  %v3137_v46 = vadd.f32 1.0, %v5342_v37 }
 0xd7c   :  { %5347 = vrcp.f32 %v3130_v39 }
 0xd7d   :  { %5349 = vrcp.f32 %v3137_v46 }
 0xd85   :  { %v5346_v24 = vpop.eup %5345 }
 0xd86   :  { %v5348_v57 = vpop.eup %5347  ;;  %v3141_v56 = vmul.f32 %v5346_v24, %v5344_v0 }
 0xd87   :  { %v3140_v50 = vmul.f32 %v5348_v57, %v7057_v30  ;;  %v5350_v9 = vpop.eup %5349 }
 0xd89   :  { %v7115_v1 = vadd.f32 %v3141_v56, %v3140_v50 }
 0xd8b   :  { %5351 = vtanh.f32 %v7115_v1 }
 0xd95   :  { %v5352_v25 = vpop.eup %5351 }
 0xd96   :  { %v7118_v54 = vmul.f32 %v5352_v25, %v5350_v9 }
 0xd98   :  { %3210 = vmatmul.mubr.f32.vlgmr.msra.gmra.mrb[58].mxu0 %v7118_v54  ;;  %3281 = vmatmul.mubr.f32.vlgmr.msra.gmra.mrb[58].mxu1 %v7118_v54 }
 0xd99   :  { %4985 = vmatpush1.bf16.msra.mxu0 %v6466_v11  ;;  %5017 = vmatpush1.bf16.msra.mxu1 %v6468_v15 }
 0xd9a   :  { %4987 = vmatprep.subr.bf16.mxu0 %v6474_v52  ;;  %5019 = vmatprep.subr.bf16.mxu1 %v6476_v60 }
 0xd9b   :  { %3379 = vmatprep.mubr.f32.mxu0 %v7528_v40  ;;  %3450 = vmatprep.mubr.f32.mxu1 %v7528_v40 }
 0xd9d   :  { %4989 = vmatpush1.bf16.msra.mxu0 %v6480_v51  ;;  %5021 = vmatpush1.bf16.msra.mxu1 %v6482_v59 }
 0xd9e   :  { %4991 = vmatprep.subr.bf16.mxu0 %v6492_v55  ;;  %5023 = vmatprep.subr.bf16.mxu1 %v6494_v7 }
 0xda1   :  { %4993 = vmatpush1.bf16.msra.mxu0 %v6498_v36  ;;  %5025 = vmatpush1.bf16.msra.mxu1 %v6500_v13 }
 0xda2   :  { %4995 = vmatprep.subr.bf16.mxu0 %v6510_v17  ;;  %5027 = vmatprep.subr.bf16.mxu1 %v6512_v45 }
 0xda5   :  { %4997 = vmatpush1.bf16.msra.mxu0 %v6516_v35  ;;  %5029 = vmatpush1.bf16.msra.mxu1 %v6518_v38 }
 0xda6   :  { %4999 = vmatprep.subr.bf16.mxu0 %v6528_v61  ;;  %5031 = vmatprep.subr.bf16.mxu1 %v6530_v2 }
 0xda9   :  { %5001 = vmatpush1.bf16.msra.mxu0 %v6534_v28  ;;  %5033 = vmatpush1.bf16.msra.mxu1 %v6536_v43 }
 0xdaa   :  { %5003 = vmatprep.subr.bf16.mxu0 %v6546_v31  ;;  %5035 = vmatprep.subr.bf16.mxu1 %v6548_v41 }
 0xdad   :  { %5005 = vmatpush1.bf16.msra.mxu0 %v6552_v48  ;;  %5037 = vmatpush1.bf16.msra.mxu1 %v6554_v14 }
 0xdae   :  { %5007 = vmatprep.subr.bf16.mxu0 %v6564_v23  ;;  %5039 = vmatprep.subr.bf16.mxu1 %v6566_v18 }
 0xdb1   :  { %5009 = vmatpush1.bf16.msra.mxu0 %v6570_v42  ;;  %5041 = vmatpush1.bf16.msra.mxu1 %v6572_v26 }
 0xdb2   :  { %5011 = vmatprep.subr.bf16.mxu0 %v6582_v5  ;;  %5043 = vmatprep.subr.bf16.mxu1 %v6584_v32 }
 0xdb5   :  { %5013 = vmatpush1.bf16.msra.mxu0 %v6588_v19  ;;  %5045 = vmatpush1.bf16.msra.mxu1 %v7629_v58 }
 0xdb6   :  { %5047 = vmatprep.subr.bf16.mxu0 %v7630_v6  ;;  %5079 = vmatprep.subr.bf16.mxu1 %v7631_v12  ;;  %v7666_v12 = vld [vmem:[#allocation32_spill] sm:$0xff] }
 0xdb7   :  { %v7668_v63 = vsel %vm5907_vm4, %v7666_v12, %v7667_v4 }
 0xe6b   :  { %v3211_v30 = vpop.f32.mrb[58].mxu0  ;;  %v3282_v62 = vpop.f32.mrb[58].mxu1 }
 0xe6c   :  { %v3287_v3 = vadd.f32 %v3211_v30, %v7661_v29  ;;  %v3289_v27 = vadd.f32 %v3282_v62, %v7662_v34  ;;  %v3213_v20 = vpop.f32.mrb[59].mxu0  ;;  %v3284_v47 = vpop.f32.mrb[59].mxu1 }
 0xe6d   :  { %v3288_v6 = vadd.f32 %v3213_v20, %v7665_v33  ;;  %v3290_v39 = vadd.f32 %v3284_v47, %v7668_v63  ;;  %v7184_v33 = vld [vmem:[%s7382_s7] ss:$0 sm:$0xff] }
 0xe6e   :  { %v3951_v37 = vmul.f32 -1.442695, %v3287_v3 }
 0xe6f   :  { %v3952_v0 = vmul.f32 -1.442695, %v3288_v6  ;;  %v3953_v8 = vmul.f32 -1.442695, %v3290_v39  ;;  %v7194_v6 = vsel %vm129_vm1, %v7060_v22, %v7118_v54 }
 0xe70   :  { %5353 = vpow2.f32 %v3951_v37 }
 0xe71   :  { %5355 = vpow2.f32 %v3952_v0 }
 0xe72   :  { %5357 = vpow2.f32 %v3953_v8 }
 0xe73   :  { %5359 = vtanh.f32 %v3289_v27  ;;  %v7669_v27 = vld [vmem:[#allocation27_spill] sm:$0xff] }
 0xe7a   :  { %v5354_v49 = vpop.eup %5353 }
 0xe7b   :  { %v5356_v24 = vpop.eup %5355  ;;  %v3294_v57 = vadd.f32 1.0, %v5354_v49 }
 0xe7c   :  { %v3300_v56 = vadd.f32 1.0, %v5356_v24  ;;  %v5358_v46 = vpop.eup %5357 }
 0xe7d   :  { %5361 = vrcp.f32 %v3294_v57  ;;  %v5360_v50 = vpop.eup %5359  ;;  %v3307_v62 = vadd.f32 1.0, %v5358_v46  ;;  %v7681_v46 = vld [vmem:[#allocation42_spill] sm:$0xff] }
 0xe7e   :  { %5363 = vrcp.f32 %v3300_v56 }
 0xe7f   :  { %5365 = vrcp.f32 %v3307_v62 }
 0xe87   :  { %v5362_v9 = vpop.eup %5361 }
 0xe88   :  { %v5364_v25 = vpop.eup %5363  ;;  %v3311_v30 = vmul.f32 %v5362_v9, %v5360_v50  ;;  %v7682_v9 = vld [vmem:[#allocation38_spill] sm:$0xff] }
 0xe89   :  { %v3310_v29 = vmul.f32 %v5364_v25, %v7115_v1  ;;  %v5366_v34 = vpop.eup %5365  ;;  %v7683_v25 = vld [vmem:[#allocation39_spill] sm:$0xff] }
 0xe8b   :  { %v7173_v3 = vadd.f32 %v3311_v30, %v3310_v29  ;;  %v7684_v30 = vsel %vm5897_vm3, %v7682_v9, %v7683_v25 }
 0xe8d   :  { %5367 = vtanh.f32 %v7173_v3 }
 0xe97   :  { %v5368_v20 = vpop.eup %5367 }
 0xe98   :  { %v3314_v47 = vmul.f32 %v5368_v20, %v5366_v34  ;;  %v7685_v34 = vld [vmem:[#allocation10_spill] sm:$0xff]  ;;  %v7686_v20 = vld [vmem:[#allocation41_spill] sm:$0xff] }
 0xe9a   :  { %3380 = vmatmul.mubr.f32.vlgmr.msra.gmra.mrb[60].mxu0 %v3314_v47  ;;  %3451 = vmatmul.mubr.f32.vlgmr.msra.gmra.mrb[60].mxu1 %v3314_v47  ;;  %v7179_v10 = vsel %vm129_vm1, %v7669_v27, %v3314_v47 }
 0xe9b   :  { %v3672_v1 = vmul.f32 %v7184_v33, %v7179_v10  ;;  %5049 = vmatpush1.bf16.msra.mxu0 %v6466_v11  ;;  %5081 = vmatpush1.bf16.msra.mxu1 %v6468_v15  ;;  %v3673_v11 = vmul.f32 %v7184_v33, %v7194_v6  ;;  %v7207_v15 = vsel %vm129_vm1, %v3314_v47, %v7669_v27 }
 0xe9c   :  { %5051 = vmatprep.subr.bf16.mxu0 %v6474_v52  ;;  %5083 = vmatprep.subr.bf16.mxu1 %v6476_v60  ;;  %v3675_v52 = vmul.f32 %v7184_v33, %v7207_v15  ;;  %v7687_v47 = vsel %vm5892_vm2, %v7685_v34, %v7686_v20 }
 0xe9d   :  { %3682 = vadd.xlane.f32.xlu1 %v3672_v1  ;;  %3549 = vmatprep.mubr.f32.mxu0 %v7528_v40  ;;  %v7688_v1 = vld [vmem:[#allocation11_spill] sm:$0xff] }
 0xe9e   :  { %3620 = vmatprep.mubr.f32.mxu1 %v7528_v40 }
 0xe9f   :  { %5053 = vmatpush1.bf16.msra.mxu0 %v6480_v51  ;;  %5085 = vmatpush1.bf16.msra.mxu1 %v6482_v59  ;;  %v7671_v59 = vld [vmem:[#allocation34_spill] sm:$0xff] }
 0xea0   :  { %5055 = vmatprep.subr.bf16.mxu0 %v6492_v55  ;;  %5087 = vmatprep.subr.bf16.mxu1 %v6494_v7  ;;  %v7672_v7 = vld [vmem:[#allocation36_spill] sm:$0xff] }
 0xea1   :  { %3684 = vadd.xlane.f32.xlu1 %v3673_v11  ;;  %v7689_v11 = vld [vmem:[#allocation9_spill] sm:$0xff] }
 0xea3   :  { %5057 = vmatpush1.bf16.msra.mxu0 %v6498_v36  ;;  %5089 = vmatpush1.bf16.msra.mxu1 %v6500_v13  ;;  %v7673_v36 = vld [vmem:[#allocation22_spill] sm:$0xff] }
 0xea4   :  { %5059 = vmatprep.subr.bf16.mxu0 %v6510_v17  ;;  %5091 = vmatprep.subr.bf16.mxu1 %v6512_v45  ;;  %v7674_v13 = vsel %vm5897_vm3, %v7672_v7, %v7673_v36 }
 0xea5   :  { %3688 = vadd.xlane.f32.xlu1 %v3675_v52  ;;  %v7690_v52 = vsel %vm5907_vm4, %v7688_v1, %v7689_v11 }
 0xea7   :  { %5061 = vmatpush1.bf16.msra.mxu0 %v6516_v35  ;;  %5093 = vmatpush1.bf16.msra.mxu1 %v6518_v38  ;;  %v7675_v38 = vld [vmem:[#allocation35_spill] sm:$0xff] }
 0xea8   :  { %5063 = vmatprep.subr.bf16.mxu0 %v6528_v61  ;;  %5095 = vmatprep.subr.bf16.mxu1 %v6530_v2  ;;  %v7676_v61 = vld [vmem:[#allocation18_spill] sm:$0xff] }
 0xea9   :  { %v7677_v2 = vsel %vm5892_vm2, %v7675_v38, %v7676_v61 }
 0xeab   :  { %5065 = vmatpush1.bf16.msra.mxu0 %v6534_v28  ;;  %5097 = vmatpush1.bf16.msra.mxu1 %v6536_v43  ;;  %v7678_v43 = vld [vmem:[#allocation37_spill] sm:$0xff] }
 0xeac   :  { %5067 = vmatprep.subr.bf16.mxu0 %v6546_v31  ;;  %5099 = vmatprep.subr.bf16.mxu1 %v6548_v41  ;;  %v7679_v31 = vld [vmem:[#allocation21_spill] sm:$0xff] }
 0xead   :  { %v7680_v41 = vsel %vm5907_vm4, %v7678_v43, %v7679_v31 }
 0xeaf   :  { %5069 = vmatpush1.bf16.msra.mxu0 %v6552_v48  ;;  %5101 = vmatpush1.bf16.msra.mxu1 %v6554_v14 }
 0xeb0   :  { %5071 = vmatprep.subr.bf16.mxu0 %v6564_v23  ;;  %5103 = vmatprep.subr.bf16.mxu1 %v6566_v18 }
 0xeb3   :  { %5073 = vmatpush1.bf16.msra.mxu0 %v6570_v42  ;;  %5105 = vmatpush1.bf16.msra.mxu1 %v6572_v26 }
 0xeb4   :  { %5075 = vmatprep.subr.bf16.mxu0 %v6582_v5  ;;  %5107 = vmatprep.subr.bf16.mxu1 %v6584_v32 }
 0xeb7   :  { %5077 = vmatpush1.bf16.msra.mxu0 %v6588_v19  ;;  %5109 = vmatpush1.bf16.msra.mxu1 %v7629_v58 }
 0xf6d   :  { %v3381_v60 = vpop.f32.mrb[60].mxu0  ;;  %v3452_v51 = vpop.f32.mrb[60].mxu1 }
 0xf6e   :  { %v3457_v55 = vadd.f32 %v3381_v60, %v7671_v59  ;;  %v3459_v17 = vadd.f32 %v3452_v51, %v7674_v13  ;;  %v3383_v45 = vpop.f32.mrb[61].mxu0  ;;  %v3454_v35 = vpop.f32.mrb[61].mxu1 }
 0xf6f   :  { %v3458_v28 = vadd.f32 %v3383_v45, %v7677_v2  ;;  %v3460_v48 = vadd.f32 %v3454_v35, %v7680_v41  ;;  %v7691_v41 = vld [vmem:[#allocation43_spill] sm:$0xff] }
 0xf70   :  { %v3954_v14 = vmul.f32 -1.442695, %v3457_v55 }
 0xf71   :  { %v3955_v23 = vmul.f32 -1.442695, %v3458_v28  ;;  %v3956_v18 = vmul.f32 -1.442695, %v3460_v48 }
 0xf72   :  { %5369 = vpow2.f32 %v3954_v14 }
 0xf73   :  { %5371 = vpow2.f32 %v3955_v23 }
 0xf74   :  { %5373 = vpow2.f32 %v3956_v18 }
 0xf75   :  { %5375 = vtanh.f32 %v3459_v17 }
 0xf7c   :  { %v5370_v42 = vpop.eup %5369 }
 0xf7d   :  { %v5372_v26 = vpop.eup %5371  ;;  %v3464_v5 = vadd.f32 1.0, %v5370_v42  ;;  %v7692_v42 = vld [vmem:[#allocation19_spill] sm:$0xff] }
 0xf7e   :  { %v3470_v32 = vadd.f32 1.0, %v5372_v26  ;;  %v5374_v19 = vpop.eup %5373 }
 0xf7f   :  { %5377 = vrcp.f32 %v3464_v5  ;;  %v5376_v58 = vpop.eup %5375  ;;  %v3477_v39 = vadd.f32 1.0, %v5374_v19 }
 0xf80   :  { %5379 = vrcp.f32 %v3470_v32  ;;  %v7293_v32 = vsel %vm129_vm1, %v7118_v54, %v7060_v22  ;;  %v3796_v22 = vld [vmem:[%s7383_s8] sm:$0xff]  ;;  %v3797_v54 = vld [vmem:[%s7383_s8 + $0x8] sm:$0xff] }
 0xf81   :  { %5381 = vrcp.f32 %v3477_v39  ;;  %v3674_v19 = vmul.f32 %v7184_v33, %v7293_v32  ;;  %v5111_v16 = vpack.c.bf16 %v3797_v54, %v3796_v22  ;;  %v3799_v22 = vld [vmem:[%s7383_s8 + $0x18] sm:$0xff] }
 0xf89   :  { %v5378_v12 = vpop.eup %5377 }
 0xf8a   :  { %v5380_v4 = vpop.eup %5379  ;;  %v3481_v63 = vmul.f32 %v5378_v12, %v5376_v58 }
 0xf8b   :  { %v3480_v37 = vmul.f32 %v5380_v4, %v7173_v3  ;;  %v5382_v8 = vpop.eup %5381  ;;  %v5495_v4 = vmov 0  }
 0xf8c   :  { %5144 = vset.pattern.permute.xlu1 %v5495_v4  ;;  %5143 = vset.pattern.permute.xlu0 %v5495_v4  ;;  %v3798_v4 = vld [vmem:[%s7383_s8 + $0x10] sm:$0xff] }
 0xf8d   :  { %v3482_v0 = vadd.f32 %v3481_v63, %v3480_v37  ;;  %v5496_v63 = vmov 0.0|0.0   ;;  %v5114_v54 = vpack.c.bf16 %v3799_v22, %v3798_v4 }
 0xf8e   :  { %5110 = vmatprep.subr.bf16.mxu0 %v5496_v63 }
 0xf8f   :  { %5383 = vtanh.f32 %v3482_v0 }
 0xf99   :  { %v5384_v49 = vpop.eup %5383 }
 0xf9a   :  { %v3484_v24 = vmul.f32 %v5384_v49, %v5382_v8 }
 0xf9c   :  { %3550 = vmatmul.mubr.f32.vlgmr.msra.gmra.mrb[62].mxu0 %v3484_v24  ;;  %3621 = vmatmul.mubr.f32.vlgmr.msra.gmra.mrb[62].mxu1 %v3484_v24  ;;  %v7285_v26 = vsel %vm129_vm1, %v7692_v42, %v3484_v24  ;;  %v7300_v58 = vsel %vm129_vm1, %v3484_v24, %v7692_v42 }
 0xf9d   :  { %v3671_v5 = vmul.f32 %v7184_v33, %v7285_v26  ;;  %v3676_v12 = vmul.f32 %v7184_v33, %v7300_v58  ;;  %5112 = vmatpush3.bf16.msra.mxu0 %v5111_v16  ;;  %4011 = vmatprep.mubr.msk.f32.mxu0 %vm5497_vm5, %v7528_v40 }
 0xf9e   :  { %5113 = vmatprep.subr.bf16.mxu0 %v5496_v63 }
 0xfa1   :  { %5115 = vmatpush3.bf16.msra.mxu0 %v5114_v54 }
 0xfa2   :  { %5116 = vmatprep.subr.bf16.mxu0 %v5496_v63 }
0x106f   :  { %v3551_v57 = vpop.f32.mrb[62].mxu0  ;;  %v3622_v56 = vpop.f32.mrb[62].mxu1 }
0x1070   :  { %v3627_v50 = vadd.f32 %v3551_v57, %v7681_v46  ;;  %v3629_v62 = vadd.f32 %v3622_v56, %v7684_v30  ;;  %v3553_v29 = vpop.f32.mrb[63].mxu0  ;;  %v3624_v3 = vpop.f32.mrb[63].mxu1 }
0x1071   :  { %v3628_v27 = vadd.f32 %v3553_v29, %v7687_v47  ;;  %v3630_v60 = vadd.f32 %v3624_v3, %v7690_v52 }
0x1072   :  { %v3957_v51 = vmul.f32 -1.442695, %v3627_v50 }
0x1073   :  { %v3958_v21 = vmul.f32 -1.442695, %v3628_v27  ;;  %v3959_v59 = vmul.f32 -1.442695, %v3630_v60 }
0x1074   :  { %5385 = vpow2.f32 %v3957_v51 }
0x1075   :  { %5387 = vpow2.f32 %v3958_v21 }
0x1076   :  { %5389 = vpow2.f32 %v3959_v59 }
0x1077   :  { %5391 = vtanh.f32 %v3629_v62 }
0x107e   :  { %v5386_v55 = vpop.eup %5385 }
0x107f   :  { %v5388_v7 = vpop.eup %5387  ;;  %v3634_v36 = vadd.f32 1.0, %v5386_v55 }
0x1080   :  { %v3640_v44 = vadd.f32 1.0, %v5388_v7  ;;  %v5390_v13 = vpop.eup %5389 }
0x1081   :  { %5393 = vrcp.f32 %v3634_v36  ;;  %v5392_v17 = vpop.eup %5391  ;;  %v3647_v38 = vadd.f32 1.0, %v5390_v13 }
0x1082   :  { %5395 = vrcp.f32 %v3640_v44 }
0x1083   :  { %5397 = vrcp.f32 %v3647_v38 }
0x108b   :  { %v5394_v53 = vpop.eup %5393 }
0x108c   :  { %v5396_v45 = vpop.eup %5395  ;;  %v3651_v35 = vmul.f32 %v5394_v53, %v5392_v17 }
0x108d   :  { %v3650_v61 = vmul.f32 %v5396_v45, %v3482_v0  ;;  %v5398_v28 = vpop.eup %5397 }
0x108f   :  { %v3652_v2 = vadd.f32 %v3651_v35, %v3650_v61 }
0x1091   :  { %5399 = vtanh.f32 %v3652_v2 }
0x109b   :  { %v5400_v43 = vpop.eup %5399 }
0x109c   :  { %v3654_v31 = vmul.f32 %v5400_v43, %v5398_v28 }
0x109e   :  { %v7271_v48 = vsel %vm129_vm1, %v3654_v31, %v7691_v41  ;;  %v7276_v14 = vsel %vm129_vm1, %v7691_v41, %v3654_v31 }
0x109f   :  { %v3677_v23 = vmul.f32 %v7184_v33, %v7271_v48  ;;  %v3670_v18 = vmul.f32 %v7184_v33, %v7276_v14  ;;  %v3683_v33 = vpop.xlane.xlu1 %3682 }
0x10a1   :  { %3692 = vadd.xlane.f32.xlu1 %v3677_v23  ;;  %3678 = vadd.xlane.f32.xlu0 %v3670_v18 }
0x10a3   :  { %v3685_v8 = vpop.xlane.xlu1 %3684 }
0x10a5   :  { %3680 = vadd.xlane.f32.xlu0 %v3671_v5 }
0x10a7   :  { %v3689_v46 = vpop.xlane.xlu1 %3688 }
0x10a9   :  { %3686 = vadd.xlane.f32.xlu0 %v3674_v19 }
0x10ad   :  { %3690 = vadd.xlane.f32.xlu0 %v3676_v12 }
0x112e   :  { %v3679_v39 = vpop.xlane.xlu0 %3678  ;;  %v3693_v30 = vpop.xlane.xlu1 %3692 }
0x1132   :  { %v3681_v37 = vpop.xlane.xlu0 %3680 }
0x1133   :  { %v3694_v0 = vmax.f32 %v3679_v39, %v3681_v37 }
0x1135   :  { %v3695_v49 = vmax.f32 %v3694_v0, %v3683_v33 }
0x1136   :  { %v3687_v24 = vpop.xlane.xlu0 %3686 }
0x1137   :  { %v3696_v57 = vmax.f32 %v3695_v49, %v3685_v8  ;;  %v3803_v49 = vld [vmem:[%s7383_s8 + $0x38] sm:$0xff] }
0x1139   :  { %v3697_v56 = vmax.f32 %v3696_v57, %v3687_v24 }
0x113a   :  { %v3691_v9 = vpop.xlane.xlu0 %3690 }
0x113b   :  { %v3698_v50 = vmax.f32 %v3697_v56, %v3689_v46  ;;  %v3804_v56 = vld [vmem:[%s7383_s8 + $0x40] sm:$0xff] }
0x113d   :  { %v3699_v25 = vmax.f32 %v3698_v50, %v3691_v9 }
0x113f   :  { %v3700_v62 = vmax.f32 %v3699_v25, %v3693_v30  ;;  %v3806_v25 = vld [vmem:[%s7383_s8 + $0x50] sm:$0xff] }
0x1141   :  { %v3701_v29 = vsub.f32 %v3679_v39, %v3700_v62  ;;  %v3702_v3 = vsub.f32 %v3681_v37, %v3700_v62  ;;  %v3703_v34 = vsub.f32 %v3683_v33, %v3700_v62  ;;  %v3704_v20 = vsub.f32 %v3685_v8, %v3700_v62  ;;  %v3800_v33 = vld [vmem:[%s7383_s8 + $0x20] sm:$0xff]  ;;  %v3801_v39 = vld [vmem:[%s7383_s8 + $0x28] sm:$0xff]  ;;  %v3802_v8 = vld [vmem:[%s7383_s8 + $0x30] sm:$0xff] }
0x1142   :  { %v3705_v1 = vsub.f32 %v3687_v24, %v3700_v62  ;;  %v3706_v52 = vsub.f32 %v3689_v46, %v3700_v62  ;;  %v3707_v51 = vsub.f32 %v3691_v9, %v3700_v62  ;;  %v3708_v59 = vsub.f32 %v3693_v30, %v3700_v62  ;;  %v3805_v46 = vld [vmem:[%s7383_s8 + $0x48] sm:$0xff]  ;;  %v3807_v30 = vld [vmem:[%s7383_s8 + $0x58] sm:$0xff] }
0x1143   :  { %v3709_v47 = vmul.f32 1.442695, %v3701_v29  ;;  %v3711_v27 = vmul.f32 1.442695, %v3702_v3  ;;  %v3713_v11 = vmul.f32 1.442695, %v3703_v34  ;;  %v5117_v37 = vpack.c.bf16 %v3801_v39, %v3800_v33 }
0x1144   :  { %v3715_v60 = vmul.f32 1.442695, %v3704_v20  ;;  %v3717_v21 = vmul.f32 1.442695, %v3705_v1  ;;  %v3719_v55 = vmul.f32 1.442695, %v3706_v52  ;;  %v5120_v24 = vpack.c.bf16 %v3803_v49, %v3802_v8 }
0x1145   :  { %5401 = vpow2.f32 %v3709_v47  ;;  %v3721_v7 = vmul.f32 1.442695, %v3707_v51  ;;  %v3723_v36 = vmul.f32 1.442695, %v3708_v59  ;;  %5118 = vmatpush3.bf16.msra.mxu0 %v5117_v37  ;;  %v5123_v50 = vpack.c.bf16 %v3805_v46, %v3804_v56  ;;  %v3808_v3 = vld [vmem:[%s7383_s8 + $0x60] sm:$0xff]  ;;  %v3809_v34 = vld [vmem:[%s7383_s8 + $0x68] sm:$0xff] }
0x1146   :  { %5403 = vpow2.f32 %v3711_v27  ;;  %5119 = vmatprep.subr.bf16.mxu0 %v5496_v63  ;;  %v5126_v62 = vpack.c.bf16 %v3807_v30, %v3806_v25  ;;  %v5129_v20 = vpack.c.bf16 %v3809_v34, %v3808_v3  ;;  %v3810_v47 = vld [vmem:[%s7383_s8 + $0x70] sm:$0xff]  ;;  %v3811_v27 = vld [vmem:[%s7383_s8 + $0x78] sm:$0xff] }
0x1147   :  { %5405 = vpow2.f32 %v3713_v11  ;;  %v5132_v1 = vpack.c.bf16 %v3811_v27, %v3810_v47 }
0x1148   :  { %5407 = vpow2.f32 %v3715_v60 }
0x1149   :  { %5409 = vpow2.f32 %v3717_v21  ;;  %5121 = vmatpush3.bf16.msra.mxu0 %v5120_v24 }
0x114a   :  { %5411 = vpow2.f32 %v3719_v55  ;;  %5122 = vmatprep.subr.bf16.mxu0 %v5496_v63 }
0x114b   :  { %5413 = vpow2.f32 %v3721_v7 }
0x114c   :  { %5415 = vpow2.f32 %v3723_v36 }
0x114d   :  { %5124 = vmatpush3.bf16.msra.mxu0 %v5123_v50 }
0x114e   :  { %5125 = vmatprep.subr.bf16.mxu0 %v5496_v63 }
0x114f   :  { %v5402_v44 = vpop.eup %5401 }
0x1150   :  { %v5404_v13 = vpop.eup %5403 }
0x1151   :  { %v3725_v17 = vadd.f32 %v5404_v13, %v5402_v44  ;;  %v5406_v53 = vpop.eup %5405  ;;  %5127 = vmatpush3.bf16.msra.mxu0 %v5126_v62 }
0x1152   :  { %v5408_v35 = vpop.eup %5407  ;;  %5128 = vmatprep.subr.bf16.mxu0 %v5496_v63 }
0x1153   :  { %v3726_v45 = vadd.f32 %v5406_v53, %v3725_v17  ;;  %v5410_v61 = vpop.eup %5409 }
0x1154   :  { %v5412_v28 = vpop.eup %5411 }
0x1155   :  { %v3727_v38 = vadd.f32 %v5408_v35, %v3726_v45  ;;  %v5414_v31 = vpop.eup %5413  ;;  %5130 = vmatpush3.bf16.msra.mxu0 %v5129_v20 }
0x1156   :  { %v5416_v23 = vpop.eup %5415  ;;  %5131 = vmatprep.subr.bf16.mxu0 %v5496_v63 }
0x1157   :  { %v3728_v2 = vadd.f32 %v5410_v61, %v3727_v38 }
0x1159   :  { %v3729_v43 = vadd.f32 %v5412_v28, %v3728_v2  ;;  %5133 = vmatpush3.bf16.msra.mxu0 %v5132_v1 }
0x115b   :  { %v3730_v41 = vadd.f32 %v5414_v31, %v3729_v43 }
0x115d   :  { %v3731_v18 = vadd.f32 %v5416_v23, %v3730_v41 }
0x115f   :  { %5417 = vrcp.f32 %v3731_v18 }
0x1169   :  { %v5418_v42 = vpop.eup %5417 }
0x116a   :  { %v3734_v5 = vmul.f32 %v5418_v42, %v5404_v13  ;;  %v3733_v19 = vmul.f32 %v5418_v42, %v5402_v44  ;;  %v3735_v12 = vmul.f32 %v5418_v42, %v5406_v53  ;;  %v3736_v16 = vmul.f32 %v5418_v42, %v5408_v35 }
0x116b   :  { %v3737_v0 = vmul.f32 %v5418_v42, %v5410_v61  ;;  %v3738_v57 = vmul.f32 %v5418_v42, %v5412_v28  ;;  %v3739_v9 = vmul.f32 %v5418_v42, %v5414_v31  ;;  %v3740_v29 = vmul.f32 %v5418_v42, %v5416_v23 }
0x116c   :  { %3748 = vperm.xlu1 %5144, %v3734_v5   ;;  %3743 = vperm.xlu0 %5143, %v3733_v19  }
0x1170   :  { %3753 = vperm.xlu1 %5144, %v3735_v12  }
0x1174   :  { %3758 = vperm.xlu1 %5144, %v3736_v16  }
0x1178   :  { %3763 = vperm.xlu1 %5144, %v3737_v0  }
0x117c   :  { %3768 = vperm.xlu1 %5144, %v3738_v57  }
0x1180   :  { %3773 = vperm.xlu1 %5144, %v3739_v9  }
0x1184   :  { %3778 = vperm.xlu1 %5144, %v3740_v29  }
0x11eb   :  { %v3749_v11 = vpop.permute.xlu1 %3748  ;;  %v3744_v60 = vpop.permute.xlu0 %3743 }
0x11ec   :  { %v3782_v21 = vmul.f32 %v3749_v11, %v7285_v26  ;;  %v3781_v63 = vmul.f32 %v3744_v60, %v7276_v14 }
0x11ee   :  { %v3789_v7 = vadd.f32 %v3782_v21, %v3781_v63 }
0x11ef   :  { %v3754_v52 = vpop.permute.xlu1 %3753 }
0x11f0   :  { %v3783_v55 = vmul.f32 %v3754_v52, %v7179_v10 }
0x11f2   :  { %v3790_v13 = vadd.f32 %v3789_v7, %v3783_v55 }
0x11f3   :  { %v3759_v51 = vpop.permute.xlu1 %3758 }
0x11f4   :  { %v3784_v36 = vmul.f32 %v3759_v51, %v7194_v6  ;;  %v3961_v6 = vld [vmem:[%s7384_s9] ss:$0 sm:$0xff] }
0x11f6   :  { %v3791_v40 = vadd.f32 %v3790_v13, %v3784_v36 }
0x11f7   :  { %v3764_v59 = vpop.permute.xlu1 %3763 }
0x11f8   :  { %v3785_v17 = vmul.f32 %v3764_v59, %v7293_v32 }
0x11fa   :  { %v3792_v35 = vadd.f32 %v3791_v40, %v3785_v17 }
0x11fb   :  { %v3769_v44 = vpop.permute.xlu1 %3768 }
0x11fc   :  { %v3786_v53 = vmul.f32 %v3769_v44, %v7207_v15 }
0x11fe   :  { %v3793_v26 = vadd.f32 %v3792_v35, %v3786_v53 }
0x11ff   :  { %v3774_v45 = vpop.permute.xlu1 %3773 }
0x1200   :  { %v3787_v38 = vmul.f32 %v3774_v45, %v7300_v58 }
0x1202   :  { %v3794_v14 = vadd.f32 %v3793_v26, %v3787_v38 }
0x1203   :  { %v3779_v61 = vpop.permute.xlu1 %3778 }
0x1204   :  { %v3788_v2 = vmul.f32 %v3779_v61, %v7271_v48 }
0x1206   :  { %v3795_v10 = vadd.f32 %v3794_v14, %v3788_v2 }
0x1208   :  { %4012 = vmatmul.mubr.f32.vlgmr.msra.gmra.mrb[64].mxu0 %v3795_v10 }
0x12db   :  { %v3885_v28 = vpop.f32.mrb[64].mxu0 }
0x12dc   :  { %v3886_v32 = vadd.f32 %v3961_v6, %v3885_v28  ;;  %v4013_v43 = vpop.f32.mrb[65].mxu0 }
0x12de   :  { %3889 = vst [vmem:[%s7385_s10] sm:$0xff] %v3886_v32 }
0x12df   :  { %3894 = vsyncpa [#allocation3], 1 }
0x12e0   :  { %3895 = vsyncpa [#allocation5], 1 }

</bundles_post_ra>
